<compile_context>
chip_gen: v6e
topology: v6e:2x2x1
jax: 0.10.0
libtpu: 0.0.40
codegen_flags: <defaults>
</compile_context>

<pallas_src>
import jax
import jax.numpy as jnp
from jax.experimental import pallas as pl
from jax.experimental.pallas import tpu as pltpu


def _vq_kernel(z_ref, emb_ref, esq_ref,
               zq_ref, idx_ref, sqsum_ref, counts_ref):
    i = pl.program_id(1)  # inner (reduction) axis

    # Per-core partial accumulators: init once per outer (parallel) block.
    @pl.when(i == 0)
    def _():
        sqsum_ref[...] = jnp.zeros_like(sqsum_ref)
        counts_ref[...] = jnp.zeros_like(counts_ref)

    z = z_ref[...]          # (tm, e_dim) f32
    e = emb_ref[...]        # (n_e, e_dim) f32  (resident codebook)
    e_sq = esq_ref[...]     # (1, n_e)     f32  precomputed ||e_j||^2

    tm = z.shape[0]
    n_e = e.shape[0]

    # d = ||z||^2 + ||e||^2 - 2 z . e   (f32 for exact argmin parity)
    z_sq = jnp.sum(z * z, axis=-1, keepdims=True)                    # (tm, 1)
    cross = jax.lax.dot_general(                                     # (tm, n_e)
        z, e, dimension_numbers=(((1,), (1,)), ((), ())),
        preferred_element_type=jnp.float32)
    d = z_sq + e_sq - 2.0 * cross

    # argmin over the codebook axis (first minimal index, like torch).
    col = jax.lax.broadcasted_iota(jnp.int32, (tm, n_e), 1)
    d_min = jnp.min(d, axis=-1, keepdims=True)
    idx = jnp.min(jnp.where(d == d_min, col, n_e), axis=-1,
                  keepdims=True)                                     # (tm, 1)

    # codebook "gather" via one-hot @ embedding (exact row select, MXU).
    onehot = (col == idx).astype(jnp.float32)                        # (tm, n_e)
    z_q = jnp.dot(onehot, e, preferred_element_type=jnp.float32)     # (tm, e_dim)

    zq_ref[...] = z_q
    idx_ref[...] = idx.astype(jnp.int32)

    # Squared-error: lane reduce to (tm,1), then one sublane reduce to (1,1).
    diff = z_q - z
    row_sq = jnp.sum(diff * diff, axis=-1, keepdims=True)            # (tm, 1)
    sqsum_ref[...] += jnp.sum(row_sq, axis=0, keepdims=True)[None]   # (1, 1, 1)
    # Histogram: single sublane reduce over the one-hot tile.
    counts_ref[...] += jnp.sum(onehot, axis=0, keepdims=True)[None]  # (1, 1, n_e)


def _round_up(x, m):
    return (x + m - 1) // m * m


def _vmem_cap_bytes():
    try:
        info = pltpu.get_tpu_info()
        cap = getattr(info, "vmem_capacity_bytes", None)
        if cap:
            return int(cap)
    except Exception:
        pass
    return 64 << 20  # conservative: v7x physical VMEM per TensorCore


def _vmem_limit_bytes(tile_m, e_dim, n_e):
    f32 = 4
    z_blk = tile_m * _round_up(e_dim, 128) * f32
    zq_blk = z_blk
    idx_blk = tile_m * 128 * f32                      # lane-padded (tm, 1)
    emb = _round_up(n_e, 8) * _round_up(e_dim, 128) * f32
    esq = 8 * _round_up(n_e, 128) * f32
    cnt = 8 * _round_up(n_e, 128) * f32
    sq = 8 * 128 * f32
    per_buf = z_blk + zq_blk + idx_blk + emb + esq + cnt + sq
    temps = 3 * tile_m * _round_up(n_e, 128) * f32    # d / onehot / compares
    est = 2 * per_buf + temps                          # x2 double buffering
    cap = max(32 << 20, _vmem_cap_bytes() - (16 << 20))
    return int(min(max(est + (4 << 20), 32 << 20), cap))


def vector_quantizer_forward(z, embedding, beta, *, tile_m=512):
    """z: (B, C, H, W) f32, embedding: (n_e, e_dim) f32, C == e_dim."""
    B, C, H, W = z.shape
    n_e, e_dim = embedding.shape
    assert C == e_dim

    # NCHW -> NHWC -> (N, e_dim), mirroring z.permute(0,2,3,1).view(-1, e_dim)
    z_flat = jnp.transpose(z, (0, 2, 3, 1)).reshape(-1, e_dim).astype(jnp.float32)
    N = z_flat.shape[0]

    tile_m = max(8, min(tile_m, N))
    while N % tile_m != 0 and tile_m > 8:
        tile_m //= 2
    assert N % tile_m == 0 and tile_m % 8 == 0, (
        "N = B*H*W must be divisible by a multiple-of-8 tile_m")

    tiles = N // tile_m
    n_par = 2 if (tiles >= 2 and tiles % 2 == 0) else 1   # split for 2-TC chips
    n_inner = tiles // n_par

    emb = embedding.astype(jnp.float32)
    e_sq = jnp.sum(emb * emb, axis=-1, keepdims=True).T   # (1, n_e)

    out_shapes = (
        jax.ShapeDtypeStruct((N, e_dim), jnp.float32),    # z_q (flat, NHWC order)
        jax.ShapeDtypeStruct((N, 1), jnp.int32),          # min_encoding_indices
        jax.ShapeDtypeStruct((n_par, 1, 1), jnp.float32), # per-core sum((z_q-z)^2)
        jax.ShapeDtypeStruct((n_par, 1, n_e), jnp.float32),  # per-core counts
    )
    in_specs = [
        pl.BlockSpec((tile_m, e_dim), lambda p, i: (p * n_inner + i, 0)),
        pl.BlockSpec((n_e, e_dim), lambda p, i: (0, 0)),
        pl.BlockSpec((1, n_e), lambda p, i: (0, 0)),
    ]
    out_specs = (
        pl.BlockSpec((tile_m, e_dim), lambda p, i: (p * n_inner + i, 0)),
        pl.BlockSpec((tile_m, 1), lambda p, i: (p * n_inner + i, 0)),
        pl.BlockSpec((1, 1, 1), lambda p, i: (p, 0, 0)),
        pl.BlockSpec((1, 1, n_e), lambda p, i: (p, 0, 0)),
    )

    # Advisory cost: distance matmul + one-hot matmul + elementwise distance work.
    cost = pl.CostEstimate(
        flops=int(4 * N * n_e * e_dim + 8 * N * n_e),
        transcendentals=0,
        bytes_accessed=int(2 * N * e_dim * 4 + N * 4 + n_e * e_dim * 4 + n_e * 4),
    )

    zq_flat, min_idx, sq_part, cnt_part = pl.pallas_call(
        _vq_kernel,
        out_shape=out_shapes,
        grid_spec=pltpu.PrefetchScalarGridSpec(
            num_scalar_prefetch=0,
            grid=(n_par, n_inner),
            in_specs=in_specs,
            out_specs=out_specs,
        ),
        compiler_params=pltpu.CompilerParams(
            dimension_semantics=("parallel", "arbitrary"),
            vmem_limit_bytes=_vmem_limit_bytes(tile_m, e_dim, n_e)),
        cost_estimate=cost,
    )(z_flat, emb, e_sq)

    # Reduce per-core partials on the host side of the call.
    sqsum = jnp.sum(sq_part)
    counts = jnp.sum(cnt_part, axis=(0, 1))               # (n_e,)

    # loss = mean((sg[z_q]-z)^2) + beta*mean((z_q-sg[z])^2); stop-gradient does
    # not change the forward value, so both terms equal the same MSE.
    # TODO(synk): forward-only; the stop-gradient / straight-through structure
    # has no effect on forward values and no custom VJP is provided.
    mse = sqsum / (N * e_dim)
    loss = mse + beta * mse

    # straight-through z_q = z + sg[z_q - z]  (numerically == z_q in forward)
    z_q_nchw = jnp.transpose(zq_flat.reshape(B, H, W, e_dim), (0, 3, 1, 2))

    e_mean = counts / N
    perplexity = jnp.exp(-jnp.sum(e_mean * jnp.log(e_mean + 1e-10)))

    # Dense one-hot is reconstructed outside the kernel (identical forward value,
    # keeps the kernel's HBM traffic to z / z_q / idx only).
    min_encodings = jax.nn.one_hot(min_idx[:, 0], n_e, dtype=jnp.float32)

    return loss, z_q_nchw, perplexity, min_encodings, min_idx


def _reference(z, embedding, beta):
    """Pure-JAX reference mirroring the PyTorch forward."""
    B, C, H, W = z.shape
    n_e, e_dim = embedding.shape
    zf = jnp.transpose(z, (0, 2, 3, 1)).reshape(-1, e_dim)
    d = (jnp.sum(zf ** 2, axis=1, keepdims=True)
         + jnp.sum(embedding ** 2, axis=1)
         - 2.0 * zf @ embedding.T)
    idx = jnp.argmin(d, axis=1)[:, None]
    enc = jax.nn.one_hot(idx[:, 0], n_e, dtype=jnp.float32)
    zq = (enc @ embedding).reshape(B, H, W, e_dim)
    z_nhwc = jnp.transpose(z, (0, 2, 3, 1))
    loss = jnp.mean((zq - z_nhwc) ** 2) + beta * jnp.mean((zq - z_nhwc) ** 2)
    e_mean = jnp.mean(enc, axis=0)
    perp = jnp.exp(-jnp.sum(e_mean * jnp.log(e_mean + 1e-10)))
    return loss, jnp.transpose(zq, (0, 3, 1, 2)), perp, enc, idx.astype(jnp.int32)


if __name__ == "__main__":
    # Module config: n_e codebook entries of dimension e_dim (= channels C).
    n_e, e_dim, beta = 8, 4, 0.25
    B, C, H, W = 2, e_dim, 16, 16

    key = jax.random.PRNGKey(0)
    k_emb, k_z = jax.random.split(key)
    # nn.init.uniform_(weight, -1/n_e, 1/n_e), deterministic via PRNGKey(0).
    embedding = jax.random.uniform(
        k_emb, (n_e, e_dim), dtype=jnp.float32,
        minval=-1.0 / n_e, maxval=1.0 / n_e)
    z = jax.random.normal(k_z, (B, C, H, W), dtype=jnp.float32)

    r_loss, r_zq, r_perp, r_enc, r_idx = _reference(z, embedding, beta)

    # Check both the single-tile default and a multi-tile (2-axis grid) config,
    # exercising the per-core partial accumulation path.
    for tm in (512, 128):
        outs = vector_quantizer_forward(z, embedding, beta, tile_m=tm)
        outs = jax.block_until_ready(outs)
        loss, z_q, perplexity, min_encodings, min_idx = outs

        assert jnp.allclose(loss, r_loss, atol=1e-5), (tm, loss, r_loss)
        assert jnp.allclose(z_q, r_zq, atol=1e-5), tm
        assert jnp.allclose(perplexity, r_perp, atol=1e-5), tm
        assert jnp.allclose(min_encodings, r_enc), tm
        assert jnp.array_equal(min_idx, r_idx), tm
        assert z_q.shape == (B, C, H, W)
        assert min_encodings.shape == (B * H * W, n_e)
        assert min_idx.shape == (B * H * W, 1)

    print("KERNEL_OK")
</pallas_src>

<mosaic_0001>
module attributes {stable_mosaic.version = 11 : i64} {
  func.func @_vq_kernel(%arg0: i32, %arg1: i32, %arg2: memref<512x4xf32, #tpu.memory_space<vmem>>, %arg3: memref<8x4xf32, #tpu.memory_space<vmem>>, %arg4: memref<1x8xf32, #tpu.memory_space<vmem>>, %arg5: memref<512x4xf32, #tpu.memory_space<vmem>>, %arg6: memref<512x1xi32, #tpu.memory_space<vmem>>, %arg7: memref<1x1x1xf32, #tpu.memory_space<vmem>>, %arg8: memref<1x1x8xf32, #tpu.memory_space<vmem>>) attributes {dimension_semantics = [#tpu.dimension_semantics<parallel>, #tpu.dimension_semantics<arbitrary>], iteration_bounds = array<i64: 1, 1>, scalar_prefetch = 0 : i64, scratch_operands = 0 : i64, tpu.core_type = #tpu.core_type<tc>, window_params = [{transform_indices = @transform_0, window_bounds = array<i64: 512, 4>}, {pipeline_mode = #tpu.pipeline_mode<synchronous>, transform_indices = @transform_1, window_bounds = array<i64: 8, 4>}, {pipeline_mode = #tpu.pipeline_mode<synchronous>, transform_indices = @transform_2, window_bounds = array<i64: 1, 8>}, {transform_indices = @transform_3, window_bounds = array<i64: 512, 4>}, {transform_indices = @transform_4, window_bounds = array<i64: 512, 1>}, {transform_indices = @transform_5, window_bounds = array<i64: 1, 1, 1>}, {transform_indices = @transform_6, window_bounds = array<i64: 1, 1, 8>}]} {
    %c0_i32 = arith.constant 0 : i32
    %0 = arith.cmpi eq, %arg1, %c0_i32 : i32
    %1 = arith.extui %0 : i1 to i32
    %c0_i32_0 = arith.constant 0 : i32
    %2 = arith.cmpi ne, %1, %c0_i32_0 : i32
    scf.if %2 {
      %cst_30 = arith.constant 0.000000e+00 : f32
      %48 = vector.broadcast %cst_30 : f32 to vector<1x1x1xf32>
      %c0_31 = arith.constant 0 : index
      %c0_32 = arith.constant 0 : index
      %c0_33 = arith.constant 0 : index
      %49 = vector.load %arg7[%c0_31, %c0_32, %c0_33] : memref<1x1x1xf32, #tpu.memory_space<vmem>>, vector<1x1x1xf32>
      tpu.vector_store %arg7[%c0_31, %c0_32, %c0_33], %48 {strides = array<i32>} : memref<1x1x1xf32, #tpu.memory_space<vmem>>, vector<1x1x1xf32>,
      %cst_34 = arith.constant 0.000000e+00 : f32
      %50 = vector.broadcast %cst_34 : f32 to vector<1x1x8xf32>
      %c0_35 = arith.constant 0 : index
      %c0_36 = arith.constant 0 : index
      %c0_37 = arith.constant 0 : index
      %51 = vector.load %arg8[%c0_35, %c0_36, %c0_37] : memref<1x1x8xf32, #tpu.memory_space<vmem>>, vector<1x1x8xf32>
      tpu.vector_store %arg8[%c0_35, %c0_36, %c0_37], %50 {strides = array<i32>} : memref<1x1x8xf32, #tpu.memory_space<vmem>>, vector<1x1x8xf32>,
    } else {
    }
    %c0 = arith.constant 0 : index
    %c0_1 = arith.constant 0 : index
    %3 = vector.load %arg2[%c0, %c0_1] : memref<512x4xf32, #tpu.memory_space<vmem>>, vector<512x4xf32>
    %c0_2 = arith.constant 0 : index
    %c0_3 = arith.constant 0 : index
    %4 = vector.load %arg3[%c0_2, %c0_3] : memref<8x4xf32, #tpu.memory_space<vmem>>, vector<8x4xf32>
    %c0_4 = arith.constant 0 : index
    %c0_5 = arith.constant 0 : index
    %5 = vector.load %arg4[%c0_4, %c0_5] : memref<1x8xf32, #tpu.memory_space<vmem>>, vector<1x8xf32>
    %6 = arith.mulf %3, %3 : vector<512x4xf32>
    %cst = arith.constant dense<0.000000e+00> : vector<512xf32>
    %7 = vector.multi_reduction <add>, %6, %cst [1] : vector<512x4xf32> to vector<512xf32>
    %8 = vector.shape_cast %7 : vector<512xf32> to vector<512x1xf32>
    %cst_6 = arith.constant dense<0.000000e+00> : vector<512x8xf32>
    %9 = tpu.matmul %3, %4, %cst_6 {dimension_numbers = #tpu.dot_dimension_numbers<[1], [1], [0], [0], [0, 0, 1, 0], [], []>} : vector<512x4xf32>, vector<8x4xf32>, vector<512x8xf32> -> vector<512x8xf32>
    %10 = vector.broadcast %8 : vector<512x1xf32> to vector<512x8xf32>
    %11 = vector.broadcast %5 : vector<1x8xf32> to vector<512x8xf32>
    %12 = arith.addf %10, %11 : vector<512x8xf32>
    %cst_7 = arith.constant 2.000000e+00 : f32
    %13 = vector.broadcast %cst_7 : f32 to vector<512x8xf32>
    %14 = arith.mulf %13, %9 : vector<512x8xf32>
    %15 = arith.subf %12, %14 : vector<512x8xf32>
    %16 = tpu.iota {dimensions = array<i32: 1>} : vector<512x8xi32>
    %cst_8 = arith.constant dense<0x7F800000> : vector<512xf32>
    %17 = vector.multi_reduction <minimumf>, %15, %cst_8 [1] : vector<512x8xf32> to vector<512xf32>
    %18 = vector.shape_cast %17 : vector<512xf32> to vector<512x1xf32>
    %19 = vector.broadcast %18 : vector<512x1xf32> to vector<512x8xf32>
    %20 = arith.cmpf oeq, %15, %19 : vector<512x8xf32>
    %c8_i32 = arith.constant 8 : i32
    %21 = vector.broadcast %c8_i32 : i32 to vector<512x8xi32>
    %22 = arith.select %20, %16, %21 : vector<512x8xi1>, vector<512x8xi32>
    %cst_9 = arith.constant dense<2147483647> : vector<512xi32>
    %23 = vector.multi_reduction <minsi>, %22, %cst_9 [1] : vector<512x8xi32> to vector<512xi32>
    %24 = vector.shape_cast %23 : vector<512xi32> to vector<512x1xi32>
    %25 = vector.broadcast %24 : vector<512x1xi32> to vector<512x8xi32>
    %26 = arith.cmpi eq, %16, %25 : vector<512x8xi32>
    %27 = arith.extui %26 : vector<512x8xi1> to vector<512x8xi32>
    %28 = arith.sitofp %27 : vector<512x8xi32> to vector<512x8xf32>
    %cst_10 = arith.constant dense<0.000000e+00> : vector<512x4xf32>
    %29 = tpu.matmul %28, %4, %cst_10 {dimension_numbers = #tpu.dot_dimension_numbers<[1], [0], [0], [1], [0, 0, 1, 1], [], []>} : vector<512x8xf32>, vector<8x4xf32>, vector<512x4xf32> -> vector<512x4xf32>
    %c0_11 = arith.constant 0 : index
    %c0_12 = arith.constant 0 : index
    %30 = vector.load %arg5[%c0_11, %c0_12] : memref<512x4xf32, #tpu.memory_space<vmem>>, vector<512x4xf32>
    tpu.vector_store %arg5[%c0_11, %c0_12], %29 {strides = array<i32>} : memref<512x4xf32, #tpu.memory_space<vmem>>, vector<512x4xf32>,
    %c0_13 = arith.constant 0 : index
    %c0_14 = arith.constant 0 : index
    %31 = vector.load %arg6[%c0_13, %c0_14] : memref<512x1xi32, #tpu.memory_space<vmem>>, vector<512x1xi32>
    tpu.vector_store %arg6[%c0_13, %c0_14], %24 {strides = array<i32>} : memref<512x1xi32, #tpu.memory_space<vmem>>, vector<512x1xi32>,
    %32 = arith.subf %29, %3 : vector<512x4xf32>
    %33 = arith.mulf %32, %32 : vector<512x4xf32>
    %cst_15 = arith.constant dense<0.000000e+00> : vector<512xf32>
    %34 = vector.multi_reduction <add>, %33, %cst_15 [1] : vector<512x4xf32> to vector<512xf32>
    %35 = vector.shape_cast %34 : vector<512xf32> to vector<512x1xf32>
    %c0_16 = arith.constant 0 : index
    %c0_17 = arith.constant 0 : index
    %c0_18 = arith.constant 0 : index
    %36 = vector.load %arg7[%c0_16, %c0_17, %c0_18] : memref<1x1x1xf32, #tpu.memory_space<vmem>>, vector<1x1x1xf32>
    %cst_19 = arith.constant dense<0.000000e+00> : vector<1xf32>
    %37 = vector.multi_reduction <add>, %35, %cst_19 [0] : vector<512x1xf32> to vector<1xf32>
    %38 = vector.shape_cast %37 : vector<1xf32> to vector<1x1xf32>
    %39 = vector.shape_cast %38 : vector<1x1xf32> to vector<1x1x1xf32>
    %40 = arith.addf %36, %39 : vector<1x1x1xf32>
    %c0_20 = arith.constant 0 : index
    %c0_21 = arith.constant 0 : index
    %c0_22 = arith.constant 0 : index
    %41 = vector.load %arg7[%c0_20, %c0_21, %c0_22] : memref<1x1x1xf32, #tpu.memory_space<vmem>>, vector<1x1x1xf32>
    tpu.vector_store %arg7[%c0_20, %c0_21, %c0_22], %40 {strides = array<i32>} : memref<1x1x1xf32, #tpu.memory_space<vmem>>, vector<1x1x1xf32>,
    %c0_23 = arith.constant 0 : index
    %c0_24 = arith.constant 0 : index
    %c0_25 = arith.constant 0 : index
    %42 = vector.load %arg8[%c0_23, %c0_24, %c0_25] : memref<1x1x8xf32, #tpu.memory_space<vmem>>, vector<1x1x8xf32>
    %cst_26 = arith.constant dense<0.000000e+00> : vector<8xf32>
    %43 = vector.multi_reduction <add>, %28, %cst_26 [0] : vector<512x8xf32> to vector<8xf32>
    %44 = vector.shape_cast %43 : vector<8xf32> to vector<1x8xf32>
    %45 = vector.shape_cast %44 : vector<1x8xf32> to vector<1x1x8xf32>
    %46 = arith.addf %42, %45 : vector<1x1x8xf32>
    %c0_27 = arith.constant 0 : index
    %c0_28 = arith.constant 0 : index
    %c0_29 = arith.constant 0 : index
    %47 = vector.load %arg8[%c0_27, %c0_28, %c0_29] : memref<1x1x8xf32, #tpu.memory_space<vmem>>, vector<1x1x8xf32>
    tpu.vector_store %arg8[%c0_27, %c0_28, %c0_29], %46 {strides = array<i32>} : memref<1x1x8xf32, #tpu.memory_space<vmem>>, vector<1x1x8xf32>,
    return
  }
  func.func @transform_0(%arg0: i32, %arg1: i32) -> (i32, i32) {
    %c1_i32 = arith.constant 1 : i32
    %0 = arith.muli %arg0, %c1_i32 : i32
    %1 = arith.addi %0, %arg1 : i32
    %c0_i32 = arith.constant 0 : i32
    %c0_i32_0 = arith.constant 0 : i32
    return %1, %c0_i32 : i32, i32
  }
  func.func @transform_1(%arg0: i32, %arg1: i32) -> (i32, i32) {
    %c0_i32 = arith.constant 0 : i32
    %c0_i32_0 = arith.constant 0 : i32
    %c0_i32_1 = arith.constant 0 : i32
    return %c0_i32, %c0_i32_0 : i32, i32
  }
  func.func @transform_2(%arg0: i32, %arg1: i32) -> (i32, i32) {
    %c0_i32 = arith.constant 0 : i32
    %c0_i32_0 = arith.constant 0 : i32
    %c0_i32_1 = arith.constant 0 : i32
    return %c0_i32, %c0_i32_0 : i32, i32
  }
  func.func @transform_3(%arg0: i32, %arg1: i32) -> (i32, i32) {
    %c1_i32 = arith.constant 1 : i32
    %0 = arith.muli %arg0, %c1_i32 : i32
    %1 = arith.addi %0, %arg1 : i32
    %c0_i32 = arith.constant 0 : i32
    %c0_i32_0 = arith.constant 0 : i32
    return %1, %c0_i32 : i32, i32
  }
  func.func @transform_4(%arg0: i32, %arg1: i32) -> (i32, i32) {
    %c1_i32 = arith.constant 1 : i32
    %0 = arith.muli %arg0, %c1_i32 : i32
    %1 = arith.addi %0, %arg1 : i32
    %c0_i32 = arith.constant 0 : i32
    %c0_i32_0 = arith.constant 0 : i32
    return %1, %c0_i32 : i32, i32
  }
  func.func @transform_5(%arg0: i32, %arg1: i32) -> (i32, i32, i32) {
    %c0_i32 = arith.constant 0 : i32
    %c0_i32_0 = arith.constant 0 : i32
    %c0_i32_1 = arith.constant 0 : i32
    return %arg0, %c0_i32, %c0_i32_0 : i32, i32, i32
  }
  func.func @transform_6(%arg0: i32, %arg1: i32) -> (i32, i32, i32) {
    %c0_i32 = arith.constant 0 : i32
    %c0_i32_0 = arith.constant 0 : i32
    %c0_i32_1 = arith.constant 0 : i32
    return %arg0, %c0_i32, %c0_i32_0 : i32, i32, i32
  }
}

</mosaic_0001>

<bundles_post_ra>
// kernel: tpu_custom_call.1
= control target key start
LH: loop header
LB: loop body
LE: loop exit
PB: predicated region body
PF: predicated region fallthrough
CT: control target
= control target key end

     0   :  { %12 = vsyncpa [#allocation3], 0  ;;  %vm208_vm0 = vcmask 31744   ;;  %s7652_s0 = inlined_call_operand.vmem [shape: f32[512,4], index: 0, kind: input, shape index: {}]   ;;  %s7653_s1 = inlined_call_operand.vmem [shape: f32[8,4], index: 1, kind: input, shape index: {}]   ;;  %s7654_s2 = inlined_call_operand.vmem [shape: f32[1,8], index: 2, kind: input, shape index: {}]   ;;  %s7655_s3 = inlined_call_operand.vmem [shape: f32[512,4], index: 3, kind: output, shape index: {0}]   ;;  %s7656_s4 = inlined_call_operand.vmem [shape: s32[512,1], index: 4, kind: output, shape index: {1}]   ;;  %s7657_s5 = inlined_call_operand.hbm [shape: f32[1,1,1], index: 5, kind: output, shape index: {2}]   ;;  %s7658_s6 = inlined_call_operand.hbm [shape: f32[1,1,8], index: 6, kind: output, shape index: {3}]  }
   0x1   :  { %v142_v0 = vld [vmem:[%s7653_s1] sm:$0xff]  ;;  %v79_v2 = vld [vmem:[%s7652_s0 + $0x8] sm:$0xff]  ;;  %v80_v3 = vld [vmem:[%s7652_s0 + $0x10] sm:$0xff] }
   0x2   :  { %v78_v1 = vld [vmem:[%s7652_s0] sm:$0xff]  ;;  %4300 = vmatprep.subr.msk.mxu0 %vm208_vm0, %v142_v0  ;;  %v81_v4 = vld [vmem:[%s7652_s0 + $0x18] sm:$0xff]  ;;  %v145_v6 = vmul.f32 %v79_v2, %v79_v2  ;;  %v146_v7 = vmul.f32 %v80_v3, %v80_v3  ;;  %4398 = vmatprep.subr.mxu1 %v142_v0  ;;  %v83_v9 = vld [vmem:[%s7652_s0 + $0x28] sm:$0xff] }
   0x3   :  { %4302 = vmatprep.mubr.msk.f32.mxu0 %vm208_vm0, %v78_v1  ;;  %v144_v5 = vmul.f32 %v78_v1, %v78_v1  ;;  %4301 = vmatpush3.xpose.msk.msra.mxu0 %vm208_vm0, %v142_v0  ;;  %v147_v8 = vmul.f32 %v81_v4, %v81_v4  ;;  %v82_v12 = vld [vmem:[%s7652_s0 + $0x20] sm:$0xff]  ;;  %v149_v16 = vmul.f32 %v83_v9, %v83_v9  ;;  %v85_v17 = vld [vmem:[%s7652_s0 + $0x38] sm:$0xff]  ;;  %v84_v18 = vld [vmem:[%s7652_s0 + $0x30] sm:$0xff] }
   0x4   :  { %4399 = vmatpush3.msra.mxu1 %v142_v0  ;;  %v215_v11 = vsel %vm208_vm0, %v146_v7, 0.0  ;;  %v212_v13 = vsel %vm208_vm0, %v145_v6, 0.0  ;;  %v148_v14 = vmul.f32 %v82_v12, %v82_v12  ;;  %v150_v20 = vmul.f32 %v84_v18, %v84_v18  ;;  %v87_v23 = vld [vmem:[%s7652_s0 + $0x48] sm:$0xff]  ;;  %v86_v24 = vld [vmem:[%s7652_s0 + $0x40] sm:$0xff]  ;;  %v89_v29 = vld [vmem:[%s7652_s0 + $0x58] sm:$0xff] }
   0x5   :  { %v209_v10 = vsel %vm208_vm0, %v144_v5, 0.0  ;;  %216 = vadd.xlane.f32.xlu1 %v215_v11  ;;  %v218_v15 = vsel %vm208_vm0, %v147_v8, 0.0  ;;  %v224_v21 = vsel %vm208_vm0, %v149_v16, 0.0  ;;  %v151_v22 = vmul.f32 %v85_v17, %v85_v17  ;;  %v88_v30 = vld [vmem:[%s7652_s0 + $0x50] sm:$0xff]  ;;  %v91_v35 = vld [vmem:[%s7652_s0 + $0x68] sm:$0xff]  ;;  %v90_v36 = vld [vmem:[%s7652_s0 + $0x60] sm:$0xff] }
   0x6   :  { %210 = vadd.xlane.f32.xlu0 %v209_v10  ;;  %4303 = vmatmul.mubr.msk.f32.vlgmr.msra.gmra.mxu0 %vm208_vm0, %v79_v2  ;;  %v221_v19 = vsel %vm208_vm0, %v148_v14, 0.0  ;;  %v227_v25 = vsel %vm208_vm0, %v150_v20, 0.0  ;;  %v152_v26 = vmul.f32 %v86_v24, %v86_v24  ;;  %v153_v28 = vmul.f32 %v87_v23, %v87_v23 }
   0x7   :  { %4305 = vmatprep.mubr.msk.f32.mxu0 %vm208_vm0, %v80_v3  ;;  %v230_v27 = vsel %vm208_vm0, %v151_v22, 0.0  ;;  %v154_v32 = vmul.f32 %v88_v30, %v88_v30  ;;  %v155_v34 = vmul.f32 %v89_v29, %v89_v29  ;;  %v156_v38 = vmul.f32 %v90_v36, %v90_v36 }
   0x8   :  { %v233_v31 = vsel %vm208_vm0, %v152_v26, 0.0  ;;  %v236_v33 = vsel %vm208_vm0, %v153_v28, 0.0  ;;  %v157_v40 = vmul.f32 %v91_v35, %v91_v35 }
   0x9   :  { %219 = vadd.xlane.f32.xlu1 %v218_v15  ;;  %v239_v37 = vsel %vm208_vm0, %v154_v32, 0.0  ;;  %v242_v39 = vsel %vm208_vm0, %v155_v34, 0.0 }
   0xa   :  { %213 = vadd.xlane.f32.xlu0 %v212_v13  ;;  %4306 = vmatmul.mubr.msk.f32.gmra.mxu0 %vm208_vm0, %v81_v4 }
   0xb   :  { %4308 = vmatprep.mubr.msk.f32.mxu0 %vm208_vm0, %v82_v12 }
   0xd   :  { %225 = vadd.xlane.f32.xlu1 %v224_v21 }
   0xe   :  { %222 = vadd.xlane.f32.xlu0 %v221_v19  ;;  %4309 = vmatmul.mubr.msk.f32.gmra.mxu0 %vm208_vm0, %v83_v9 }
   0xf   :  { %4311 = vmatprep.mubr.msk.f32.mxu0 %vm208_vm0, %v84_v18 }
  0x11   :  { %231 = vadd.xlane.f32.xlu1 %v230_v27 }
  0x12   :  { %228 = vadd.xlane.f32.xlu0 %v227_v25  ;;  %4312 = vmatmul.mubr.msk.f32.gmra.mxu0 %vm208_vm0, %v85_v17 }
  0x13   :  { %4314 = vmatprep.mubr.msk.f32.mxu0 %vm208_vm0, %v86_v24 }
  0x15   :  { %237 = vadd.xlane.f32.xlu1 %v236_v33 }
  0x16   :  { %234 = vadd.xlane.f32.xlu0 %v233_v31  ;;  %4315 = vmatmul.mubr.msk.f32.gmra.mxu0 %vm208_vm0, %v87_v23 }
  0x17   :  { %4317 = vmatprep.mubr.msk.f32.mxu0 %vm208_vm0, %v88_v30 }
  0x18   :  { %13 = vsyncpa [#allocation5], 0  ;;  %v93_v41 = vld [vmem:[%s7652_s0 + $0x78] sm:$0xff]  ;;  %v92_v42 = vld [vmem:[%s7652_s0 + $0x70] sm:$0xff]  ;;  %v245_v43 = vsel %vm208_vm0, %v156_v38, 0.0  ;;  %v248_v45 = vsel %vm208_vm0, %v157_v40, 0.0 }
  0x19   :  { %243 = vadd.xlane.f32.xlu1 %v242_v39  ;;  %v158_v44 = vmul.f32 %v92_v42, %v92_v42  ;;  %v159_v46 = vmul.f32 %v93_v41, %v93_v41  ;;  %v95_v47 = vld [vmem:[%s7652_s0 + $0x88] sm:$0xff]  ;;  %v94_v48 = vld [vmem:[%s7652_s0 + $0x80] sm:$0xff]  ;;  %v97_v53 = vld [vmem:[%s7652_s0 + $0x98] sm:$0xff]  ;;  %vm1181_vm1 = vcmask 64512  }
  0x1a   :  { %240 = vadd.xlane.f32.xlu0 %v239_v37  ;;  %4318 = vmatmul.mubr.msk.f32.gmra.mxu0 %vm208_vm0, %v89_v29  ;;  %v160_v50 = vmul.f32 %v94_v48, %v94_v48  ;;  %v161_v52 = vmul.f32 %v95_v47, %v95_v47  ;;  %v96_v54 = vld [vmem:[%s7652_s0 + $0x90] sm:$0xff]  ;;  %v163_v58 = vmul.f32 %v97_v53, %v97_v53  ;;  %v99_v59 = vld [vmem:[%s7652_s0 + $0xa8] sm:$0xff]  ;;  %v98_v60 = vld [vmem:[%s7652_s0 + $0xa0] sm:$0xff] }
  0x1b   :  { %4320 = vmatprep.mubr.msk.f32.mxu0 %vm208_vm0, %v90_v36  ;;  %v251_v49 = vsel %vm208_vm0, %v158_v44, 0.0  ;;  %v254_v51 = vsel %vm208_vm0, %v159_v46, 0.0  ;;  %v162_v56 = vmul.f32 %v96_v54, %v96_v54  ;;  %v164_v62 = vmul.f32 %v98_v60, %v98_v60  ;;  %v101_v1 = vld [vmem:[%s7652_s0 + $0xb8] sm:$0xff]  ;;  %v100_v2 = vld [vmem:[%s7652_s0 + $0xb0] sm:$0xff]  ;;  %v103_v7 = vld [vmem:[%s7652_s0 + $0xc8] sm:$0xff] }
  0x1c   :  { %v257_v55 = vsel %vm208_vm0, %v160_v50, 0.0  ;;  %v260_v57 = vsel %vm208_vm0, %v161_v52, 0.0  ;;  %v266_v63 = vsel %vm208_vm0, %v163_v58, 0.0  ;;  %v165_v0 = vmul.f32 %v99_v59, %v99_v59  ;;  %v102_v8 = vld [vmem:[%s7652_s0 + $0xc0] sm:$0xff]  ;;  %v105_v13 = vld [vmem:[%s7652_s0 + $0xd8] sm:$0xff]  ;;  %v104_v14 = vld [vmem:[%s7652_s0 + $0xd0] sm:$0xff] }
  0x1d   :  { %249 = vadd.xlane.f32.xlu1 %v248_v45  ;;  %v263_v61 = vsel %vm208_vm0, %v162_v56, 0.0  ;;  %v269_v3 = vsel %vm208_vm0, %v164_v62, 0.0  ;;  %v166_v4 = vmul.f32 %v100_v2, %v100_v2  ;;  %v167_v6 = vmul.f32 %v101_v1, %v101_v1  ;;  %v107_v19 = vld [vmem:[%s7652_s0 + $0xe8] sm:$0xff]  ;;  %v106_v20 = vld [vmem:[%s7652_s0 + $0xe0] sm:$0xff]  ;;  %v109_v25 = vld [vmem:[%s7652_s0 + $0xf8] sm:$0xff] }
  0x1e   :  { %246 = vadd.xlane.f32.xlu0 %v245_v43  ;;  %4321 = vmatmul.mubr.msk.f32.gmra.mxu0 %vm208_vm0, %v91_v35  ;;  %v272_v5 = vsel %vm208_vm0, %v165_v0, 0.0  ;;  %v168_v10 = vmul.f32 %v102_v8, %v102_v8  ;;  %v169_v12 = vmul.f32 %v103_v7, %v103_v7  ;;  %v170_v16 = vmul.f32 %v104_v14, %v104_v14  ;;  %v108_v26 = vld [vmem:[%s7652_s0 + $0xf0] sm:$0xff]  ;;  %v111_v31 = vld [vmem:[%s7652_s0 + $0x108] sm:$0xff]  ;;  %v110_v32 = vld [vmem:[%s7652_s0 + $0x100] sm:$0xff] }
  0x1f   :  { %4323 = vmatprep.mubr.msk.f32.mxu0 %vm208_vm0, %v92_v42  ;;  %v275_v9 = vsel %vm208_vm0, %v166_v4, 0.0  ;;  %v278_v11 = vsel %vm208_vm0, %v167_v6, 0.0  ;;  %v171_v18 = vmul.f32 %v105_v13, %v105_v13  ;;  %v172_v22 = vmul.f32 %v106_v20, %v106_v20  ;;  %v113_v37 = vld [vmem:[%s7652_s0 + $0x118] sm:$0xff]  ;;  %v112_v38 = vld [vmem:[%s7652_s0 + $0x110] sm:$0xff]  ;;  %v115_v43 = vld [vmem:[%s7652_s0 + $0x128] sm:$0xff] }
  0x20   :  { %v281_v15 = vsel %vm208_vm0, %v168_v10, 0.0  ;;  %v284_v17 = vsel %vm208_vm0, %v169_v12, 0.0  ;;  %v287_v21 = vsel %vm208_vm0, %v170_v16, 0.0  ;;  %v173_v24 = vmul.f32 %v107_v19, %v107_v19  ;;  %v114_v44 = vld [vmem:[%s7652_s0 + $0x120] sm:$0xff]  ;;  %v124_v4 = vld [vmem:[%s7652_s0 + $0x170] sm:$0xff] }
  0x21   :  { %255 = vadd.xlane.f32.xlu1 %v254_v51  ;;  %v290_v23 = vsel %vm208_vm0, %v171_v18, 0.0  ;;  %v293_v27 = vsel %vm208_vm0, %v172_v22, 0.0  ;;  %v174_v28 = vmul.f32 %v108_v26, %v108_v26  ;;  %v175_v30 = vmul.f32 %v109_v25, %v109_v25  ;;  %v118_v56 = vld [vmem:[%s7652_s0 + $0x140] sm:$0xff]  ;;  %v128_v12 = vld [vmem:[%s7652_s0 + $0x190] sm:$0xff] }
  0x22   :  { %252 = vadd.xlane.f32.xlu0 %v251_v49  ;;  %4324 = vmatmul.mubr.msk.f32.gmra.mxu0 %vm208_vm0, %v93_v41  ;;  %v296_v29 = vsel %vm208_vm0, %v173_v24, 0.0  ;;  %v176_v34 = vmul.f32 %v110_v32, %v110_v32  ;;  %v177_v36 = vmul.f32 %v111_v31, %v111_v31  ;;  %v178_v40 = vmul.f32 %v112_v38, %v112_v38  ;;  %v116_v49 = vld [vmem:[%s7652_s0 + $0x130] sm:$0xff]  ;;  %v122_v0 = vld [vmem:[%s7652_s0 + $0x160] sm:$0xff] }
  0x23   :  { %4326 = vmatprep.mubr.msk.f32.mxu0 %vm208_vm0, %v94_v48  ;;  %v299_v33 = vsel %vm208_vm0, %v174_v28, 0.0  ;;  %v302_v35 = vsel %vm208_vm0, %v175_v30, 0.0  ;;  %v179_v42 = vmul.f32 %v113_v37, %v113_v37  ;;  %v180_v46 = vmul.f32 %v114_v44, %v114_v44  ;;  %v130_v16 = vld [vmem:[%s7652_s0 + $0x1a0] sm:$0xff]  ;;  %v136_v28 = vld [vmem:[%s7652_s0 + $0x1d0] sm:$0xff] }
  0x24   :  { %v305_v39 = vsel %vm208_vm0, %v176_v34, 0.0  ;;  %v308_v41 = vsel %vm208_vm0, %v177_v36, 0.0  ;;  %v311_v45 = vsel %vm208_vm0, %v178_v40, 0.0  ;;  %v181_v48 = vmul.f32 %v115_v43, %v115_v43  ;;  %v134_v24 = vld [vmem:[%s7652_s0 + $0x1c0] sm:$0xff]  ;;  %v140_v36 = vld [vmem:[%s7652_s0 + $0x1f0] sm:$0xff] }
  0x25   :  { %261 = vadd.xlane.f32.xlu1 %v260_v57  ;;  %v317_v50 = vsel %vm208_vm0, %v180_v46, 0.0  ;;  %v182_v52 = vmul.f32 %v116_v49, %v116_v49  ;;  %v119_v57 = vld [vmem:[%s7652_s0 + $0x148] sm:$0xff] }
  0x26   :  { %258 = vadd.xlane.f32.xlu0 %v257_v55  ;;  %4327 = vmatmul.mubr.msk.f32.gmra.mxu0 %vm208_vm0, %v95_v47  ;;  %v314_v47 = vsel %vm208_vm0, %v179_v42, 0.0  ;;  %v320_v51 = vsel %vm208_vm0, %v181_v48, 0.0 }
  0x27   :  { %4329 = vmatprep.mubr.msk.f32.mxu0 %vm208_vm0, %v96_v54  ;;  %v323_v54 = vsel %vm208_vm0, %v182_v52, 0.0 }
  0x29   :  { %267 = vadd.xlane.f32.xlu1 %v266_v63  ;;  %v185_v63 = vmul.f32 %v119_v57, %v119_v57 }
  0x2a   :  { %264 = vadd.xlane.f32.xlu0 %v263_v61  ;;  %4330 = vmatmul.mubr.msk.f32.gmra.mxu0 %vm208_vm0, %v97_v53  ;;  %v117_v53 = vld [vmem:[%s7652_s0 + $0x138] sm:$0xff] }
  0x2b   :  { %4332 = vmatprep.mubr.msk.f32.mxu0 %vm208_vm0, %v98_v60  ;;  %v183_v55 = vmul.f32 %v117_v53, %v117_v53  ;;  %v120_v60 = vld [vmem:[%s7652_s0 + $0x150] sm:$0xff]  ;;  %v121_v61 = vld [vmem:[%s7652_s0 + $0x158] sm:$0xff] }
  0x2d   :  { %273 = vadd.xlane.f32.xlu1 %v272_v5  ;;  %v326_v58 = vsel %vm208_vm0, %v183_v55, 0.0  ;;  %v125_v5 = vld [vmem:[%s7652_s0 + $0x178] sm:$0xff] }
  0x2e   :  { %270 = vadd.xlane.f32.xlu0 %v269_v3  ;;  %4333 = vmatmul.mubr.msk.f32.gmra.mxu0 %vm208_vm0, %v99_v59  ;;  %v184_v59 = vmul.f32 %v118_v56, %v118_v56  ;;  %v186_v3 = vmul.f32 %v120_v60, %v120_v60 }
  0x2f   :  { %4335 = vmatprep.mubr.msk.f32.mxu0 %vm208_vm0, %v100_v2  ;;  %v332_v2 = vsel %vm208_vm0, %v185_v63, 0.0 }
  0x30   :  { %v329_v62 = vsel %vm208_vm0, %v184_v59, 0.0  ;;  %v335_v6 = vsel %vm208_vm0, %v186_v3, 0.0 }
  0x31   :  { %279 = vadd.xlane.f32.xlu1 %v278_v11  ;;  %v188_v11 = vmul.f32 %v122_v0, %v122_v0 }
  0x32   :  { %276 = vadd.xlane.f32.xlu0 %v275_v9  ;;  %4336 = vmatmul.mubr.msk.f32.gmra.mxu0 %vm208_vm0, %v101_v1  ;;  %v123_v1 = vld [vmem:[%s7652_s0 + $0x168] sm:$0xff] }
  0x33   :  { %4338 = vmatprep.mubr.msk.f32.mxu0 %vm208_vm0, %v102_v8  ;;  %v126_v8 = vld [vmem:[%s7652_s0 + $0x180] sm:$0xff]  ;;  %v127_v9 = vld [vmem:[%s7652_s0 + $0x188] sm:$0xff] }
  0x35   :  { %285 = vadd.xlane.f32.xlu1 %v284_v17  ;;  %v131_v17 = vld [vmem:[%s7652_s0 + $0x1a8] sm:$0xff] }
  0x36   :  { %282 = vadd.xlane.f32.xlu0 %v281_v15  ;;  %4339 = vmatmul.mubr.msk.f32.gmra.mxu0 %vm208_vm0, %v103_v7  ;;  %v187_v7 = vmul.f32 %v121_v61, %v121_v61  ;;  %v189_v15 = vmul.f32 %v123_v1, %v123_v1 }
  0x37   :  { %4341 = vmatprep.mubr.msk.f32.mxu0 %vm208_vm0, %v104_v14  ;;  %v341_v14 = vsel %vm208_vm0, %v188_v11, 0.0 }
  0x38   :  { %v338_v10 = vsel %vm208_vm0, %v187_v7, 0.0  ;;  %v344_v18 = vsel %vm208_vm0, %v189_v15, 0.0 }
  0x39   :  { %291 = vadd.xlane.f32.xlu1 %v290_v23  ;;  %v191_v23 = vmul.f32 %v125_v5, %v125_v5 }
  0x3a   :  { %288 = vadd.xlane.f32.xlu0 %v287_v21  ;;  %4342 = vmatmul.mubr.msk.f32.gmra.mxu0 %vm208_vm0, %v105_v13  ;;  %v129_v13 = vld [vmem:[%s7652_s0 + $0x198] sm:$0xff] }
  0x3b   :  { %4344 = vmatprep.mubr.msk.f32.mxu0 %vm208_vm0, %v106_v20  ;;  %v132_v20 = vld [vmem:[%s7652_s0 + $0x1b0] sm:$0xff]  ;;  %v133_v21 = vld [vmem:[%s7652_s0 + $0x1b8] sm:$0xff] }
  0x3c   :  { %v199_v48 = vmul.f32 %v133_v21, %v133_v21 }
  0x3d   :  { %297 = vadd.xlane.f32.xlu1 %v296_v29  ;;  %v137_v29 = vld [vmem:[%s7652_s0 + $0x1d8] sm:$0xff] }
  0x3e   :  { %294 = vadd.xlane.f32.xlu0 %v293_v27  ;;  %4345 = vmatmul.mubr.msk.f32.gmra.mxu0 %vm208_vm0, %v107_v19  ;;  %v190_v19 = vmul.f32 %v124_v4, %v124_v4  ;;  %v192_v27 = vmul.f32 %v126_v8, %v126_v8 }
  0x3f   :  { %4347 = vmatprep.mubr.msk.f32.mxu0 %vm208_vm0, %v108_v26  ;;  %v350_v26 = vsel %vm208_vm0, %v191_v23, 0.0 }
  0x40   :  { %v347_v22 = vsel %vm208_vm0, %v190_v19, 0.0  ;;  %v353_v30 = vsel %vm208_vm0, %v192_v27, 0.0 }
  0x41   :  { %303 = vadd.xlane.f32.xlu1 %v302_v35  ;;  %v194_v35 = vmul.f32 %v128_v12, %v128_v12 }
  0x42   :  { %300 = vadd.xlane.f32.xlu0 %v299_v33  ;;  %4348 = vmatmul.mubr.msk.f32.gmra.mxu0 %vm208_vm0, %v109_v25  ;;  %v135_v25 = vld [vmem:[%s7652_s0 + $0x1c8] sm:$0xff] }
  0x43   :  { %4350 = vmatprep.mubr.msk.f32.mxu0 %vm208_vm0, %v110_v32  ;;  %v138_v32 = vld [vmem:[%s7652_s0 + $0x1e0] sm:$0xff]  ;;  %v139_v33 = vld [vmem:[%s7652_s0 + $0x1e8] sm:$0xff] }
  0x44   :  { %v204_v63 = vmul.f32 %v138_v32, %v138_v32 }
  0x45   :  { %309 = vadd.xlane.f32.xlu1 %v308_v41  ;;  %v196_v41 = vmul.f32 %v130_v16, %v130_v16 }
  0x46   :  { %306 = vadd.xlane.f32.xlu0 %v305_v39  ;;  %4351 = vmatmul.mubr.msk.f32.gmra.mxu0 %vm208_vm0, %v111_v31  ;;  %v193_v31 = vmul.f32 %v127_v9, %v127_v9  ;;  %v195_v39 = vmul.f32 %v129_v13, %v129_v13 }
  0x47   :  { %4353 = vmatprep.mubr.msk.f32.mxu0 %vm208_vm0, %v112_v38  ;;  %v359_v38 = vsel %vm208_vm0, %v194_v35, 0.0  ;;  %v365_v42 = vsel %vm208_vm0, %v196_v41, 0.0 }
  0x48   :  { %v356_v34 = vsel %vm208_vm0, %v193_v31, 0.0  ;;  %v362_v40 = vsel %vm208_vm0, %v195_v39, 0.0 }
  0x49   :  { %315 = vadd.xlane.f32.xlu1 %v314_v47 }
  0x4a   :  { %312 = vadd.xlane.f32.xlu0 %v311_v45  ;;  %4354 = vmatmul.mubr.msk.f32.gmra.mxu0 %vm208_vm0, %v113_v37  ;;  %v141_v37 = vld [vmem:[%s7652_s0 + $0x1f8] sm:$0xff]  ;;  %v198_v45 = vmul.f32 %v132_v20, %v132_v20 }
  0x4b   :  { %4356 = vmatprep.mubr.msk.f32.mxu0 %vm208_vm0, %v114_v44 }
  0x4c   :  { %v371_v47 = vsel %vm208_vm0, %v198_v45, 0.0 }
  0x4d   :  { %321 = vadd.xlane.f32.xlu1 %v320_v51  ;;  %v200_v51 = vmul.f32 %v134_v24, %v134_v24 }
  0x4e   :  { %318 = vadd.xlane.f32.xlu0 %v317_v50  ;;  %4357 = vmatmul.mubr.msk.f32.gmra.mxu0 %vm208_vm0, %v115_v43  ;;  %v197_v43 = vmul.f32 %v131_v17, %v131_v17  ;;  %v374_v50 = vsel %vm208_vm0, %v199_v48, 0.0 }
  0x4f   :  { %4359 = vmatprep.mubr.msk.f32.mxu0 %vm208_vm0, %v116_v49 }
  0x50   :  { %v368_v44 = vsel %vm208_vm0, %v197_v43, 0.0 }
  0x51   :  { %324 = vadd.xlane.f32.xlu1 %v323_v54  ;;  %v201_v54 = vmul.f32 %v135_v25, %v135_v25 }
  0x52   :  { %4360 = vmatmul.mubr.msk.f32.gmra.mxu0 %vm208_vm0, %v117_v53  ;;  %v377_v53 = vsel %vm208_vm0, %v200_v51, 0.0 }
  0x53   :  { %4362 = vmatprep.mubr.msk.f32.mxu0 %vm208_vm0, %v118_v56  ;;  %v380_v56 = vsel %vm208_vm0, %v201_v54, 0.0 }
  0x55   :  { %327 = vadd.xlane.f32.xlu1 %v326_v58 }
  0x56   :  { %4363 = vmatmul.mubr.msk.f32.gmra.mxu0 %vm208_vm0, %v119_v57  ;;  %v202_v57 = vmul.f32 %v136_v28, %v136_v28 }
  0x57   :  { %4365 = vmatprep.mubr.msk.f32.mxu0 %vm208_vm0, %v120_v60  ;;  %v203_v60 = vmul.f32 %v137_v29, %v137_v29 }
  0x58   :  { %v383_v59 = vsel %vm208_vm0, %v202_v57, 0.0 }
  0x59   :  { %330 = vadd.xlane.f32.xlu1 %v329_v62  ;;  %v386_v62 = vsel %vm208_vm0, %v203_v60, 0.0 }
  0x5a   :  { %4366 = vmatmul.mubr.msk.f32.gmra.mxu0 %vm208_vm0, %v121_v61 }
  0x5b   :  { %4368 = vmatprep.mubr.msk.f32.mxu0 %vm208_vm0, %v122_v0 }
  0x5d   :  { %333 = vadd.xlane.f32.xlu1 %v332_v2  ;;  %v205_v2 = vmul.f32 %v139_v33, %v139_v33 }
  0x5e   :  { %4369 = vmatmul.mubr.msk.f32.gmra.mxu0 %vm208_vm0, %v123_v1  ;;  %v389_v1 = vsel %vm208_vm0, %v204_v63, 0.0 }
  0x5f   :  { %4371 = vmatprep.mubr.msk.f32.mxu0 %vm208_vm0, %v124_v4  ;;  %v392_v4 = vsel %vm208_vm0, %v205_v2, 0.0 }
  0x61   :  { %336 = vadd.xlane.f32.xlu1 %v335_v6 }
  0x62   :  { %4372 = vmatmul.mubr.msk.f32.gmra.mxu0 %vm208_vm0, %v125_v5  ;;  %v206_v5 = vmul.f32 %v140_v36, %v140_v36 }
  0x63   :  { %4374 = vmatprep.mubr.msk.f32.mxu0 %vm208_vm0, %v126_v8  ;;  %v207_v8 = vmul.f32 %v141_v37, %v141_v37 }
  0x64   :  { %v395_v7 = vsel %vm208_vm0, %v206_v5, 0.0 }
  0x65   :  { %339 = vadd.xlane.f32.xlu1 %v338_v10  ;;  %v398_v10 = vsel %vm208_vm0, %v207_v8, 0.0 }
  0x66   :  { %4375 = vmatmul.mubr.msk.f32.gmra.mxu0 %vm208_vm0, %v127_v9 }
  0x67   :  { %4377 = vmatprep.mubr.msk.f32.mxu0 %vm208_vm0, %v128_v12 }
  0x69   :  { %342 = vadd.xlane.f32.xlu1 %v341_v14 }
  0x6a   :  { %4378 = vmatmul.mubr.msk.f32.gmra.mxu0 %vm208_vm0, %v129_v13 }
  0x6b   :  { %4380 = vmatprep.mubr.msk.f32.mxu0 %vm208_vm0, %v130_v16 }
  0x6d   :  { %345 = vadd.xlane.f32.xlu1 %v344_v18 }
  0x6e   :  { %4381 = vmatmul.mubr.msk.f32.gmra.mxu0 %vm208_vm0, %v131_v17  ;;  %v4999_v17 = vld [vmem:[%s7654_s2] ss:$0 sm:$0xff] }
  0x6f   :  { %4383 = vmatprep.mubr.msk.f32.mxu0 %vm208_vm0, %v132_v20 }
  0x71   :  { %348 = vadd.xlane.f32.xlu1 %v347_v22 }
  0x72   :  { %4384 = vmatmul.mubr.msk.f32.gmra.mxu0 %vm208_vm0, %v133_v21 }
  0x73   :  { %4386 = vmatprep.mubr.msk.f32.mxu0 %vm208_vm0, %v134_v24 }
  0x75   :  { %351 = vadd.xlane.f32.xlu1 %v350_v26 }
  0x76   :  { %4387 = vmatmul.mubr.msk.f32.gmra.mxu0 %vm208_vm0, %v135_v25 }
  0x77   :  { %4389 = vmatprep.mubr.msk.f32.mxu0 %vm208_vm0, %v136_v28 }
  0x79   :  { %354 = vadd.xlane.f32.xlu1 %v353_v30 }
  0x7a   :  { %4390 = vmatmul.mubr.msk.f32.gmra.mxu0 %vm208_vm0, %v137_v29 }
  0x7b   :  { %4392 = vmatprep.mubr.msk.f32.mxu0 %vm208_vm0, %v138_v32 }
  0x7d   :  { %357 = vadd.xlane.f32.xlu1 %v356_v34 }
  0x7e   :  { %4393 = vmatmul.mubr.msk.f32.gmra.mxu0 %vm208_vm0, %v139_v33 }
  0x7f   :  { %4395 = vmatprep.mubr.msk.f32.mxu0 %vm208_vm0, %v140_v36 }
  0x81   :  { %360 = vadd.xlane.f32.xlu1 %v359_v38 }
  0x82   :  { %4396 = vmatmul.mubr.msk.f32.gmra.mxu0 %vm208_vm0, %v141_v37 }
  0x85   :  { %363 = vadd.xlane.f32.xlu1 %v362_v40 }
  0x89   :  { %366 = vadd.xlane.f32.xlu1 %v365_v42 }
  0x8d   :  { %369 = vadd.xlane.f32.xlu1 %v368_v44 }
  0x8e   :  { %v4960_v46 = vpop.xlane.xlu1 %216 }
  0x8f   :  { %v211_v13 = vpop.xlane.xlu0 %210  ;;  %v989_v39 = vadd.f32 %v4999_v17, %v4960_v46 }
  0x90   :  { %v987_v24 = vadd.f32 %v4999_v17, %v211_v13 }
  0x91   :  { %372 = vadd.xlane.f32.xlu1 %v371_v47 }
  0x92   :  { %v220_v49 = vpop.xlane.xlu1 %219 }
  0x93   :  { %v214_v15 = vpop.xlane.xlu0 %213  ;;  %v990_v23 = vadd.f32 %v4999_v17, %v220_v49 }
  0x94   :  { %v988_v18 = vadd.f32 %v4999_v17, %v214_v15 }
  0x95   :  { %375 = vadd.xlane.f32.xlu1 %v374_v50 }
  0x96   :  { %v4964_v52 = vpop.xlane.xlu1 %225 }
  0x97   :  { %v992_v40 = vadd.f32 %v4999_v17, %v4964_v52  ;;  %v223_v48 = vpop.xlane.xlu0 %222 }
  0x98   :  { %v991_v46 = vadd.f32 %v4999_v17, %v223_v48 }
  0x99   :  { %378 = vadd.xlane.f32.xlu1 %v377_v53 }
  0x9a   :  { %v4967_v55 = vpop.xlane.xlu1 %231 }
  0x9b   :  { %v229_v2 = vpop.xlane.xlu0 %228 }
  0x9c   :  { %v993_v8 = vadd.f32 %v4999_v17, %v229_v2 }
  0x9d   :  { %381 = vadd.xlane.f32.xlu1 %v380_v56  ;;  %v994_v56 = vadd.f32 %v4999_v17, %v4967_v55 }
  0x9e   :  { %v4970_v58 = vpop.xlane.xlu1 %237 }
  0xa1   :  { %384 = vadd.xlane.f32.xlu1 %v383_v59 }
  0xa2   :  { %v4973_v61 = vpop.xlane.xlu1 %243 }
  0xa5   :  { %387 = vadd.xlane.f32.xlu1 %v386_v62 }
  0xa6   :  { %v4976_v0 = vpop.xlane.xlu1 %249 }
  0xa9   :  { %390 = vadd.xlane.f32.xlu1 %v389_v1 }
  0xaa   :  { %v4979_v3 = vpop.xlane.xlu1 %255 }
  0xad   :  { %393 = vadd.xlane.f32.xlu1 %v392_v4 }
  0xae   :  { %v4982_v6 = vpop.xlane.xlu1 %261 }
  0xb1   :  { %396 = vadd.xlane.f32.xlu1 %v395_v7 }
  0xb2   :  { %v4985_v9 = vpop.xlane.xlu1 %267 }
  0xb5   :  { %399 = vadd.xlane.f32.xlu1 %v398_v10 }
  0xb6   :  { %v4988_v11 = vpop.xlane.xlu1 %273 }
  0xba   :  { %v4990_v12 = vpop.xlane.xlu1 %279 }
  0xbe   :  { %v4992_v14 = vpop.xlane.xlu1 %285 }
  0xc2   :  { %v4994_v16 = vpop.xlane.xlu1 %291 }
  0xc6   :  { %v4304_v19 = vpop.f32.mrf.mxu0  ;;  %v5002_v21 = vpop.xlane.xlu1 %297 }
  0xc7   :  { %v1052_v20 = vmul.f32 2.0, %v4304_v19  ;;  %v996_v19 = vadd.f32 %v4999_v17, %v4970_v58 }
  0xc8   :  { %v662_v22 = vpop.f32.mrf.mxu0 }
  0xc9   :  { %v1051_v25 = vmul.f32 2.0, %v662_v22  ;;  %v5006_v26 = vsub.f32 %v988_v18, %v1052_v20 }
  0xca   :  { %v4307_v27 = vpop.f32.mrf.mxu0  ;;  %v5010_v30 = vpop.xlane.xlu1 %303 }
  0xcb   :  { %v1054_v28 = vmul.f32 2.0, %v4307_v27  ;;  %v1185_v29 = vsel %vm1181_vm1, %v5006_v26, inf  ;;  %v5012_v31 = vsub.f32 %v987_v24, %v1051_v25  ;;  %v235_v25 = vpop.xlane.xlu0 %234 }
  0xcc   :  { %v672_v32 = vpop.f32.mrf.mxu0  ;;  %1186 = vmin.xlane.f32.xlu0 %v1185_v29  ;;  %v995_v29 = vadd.f32 %v4999_v17, %v235_v25 }
  0xcd   :  { %v5014_v33 = vsub.f32 %v990_v23, %v1054_v28  ;;  %v1053_v35 = vmul.f32 2.0, %v672_v32  ;;  %v1182_v36 = vsel %vm1181_vm1, %v5012_v31, inf }
  0xce   :  { %v4310_v34 = vpop.f32.mrf.mxu0  ;;  %v5018_v37 = vpop.xlane.xlu1 %309 }
  0xcf   :  { %v1056_v41 = vmul.f32 2.0, %v4310_v34  ;;  %v1191_v42 = vsel %vm1181_vm1, %v5014_v33, inf  ;;  %v5028_v45 = vsub.f32 %v989_v39, %v1053_v35 }
  0xd0   :  { %v682_v38 = vpop.f32.mrf.mxu0  ;;  %1183 = vmin.xlane.f32.xlu0 %v1182_v36 }
  0xd1   :  { %v5030_v49 = vsub.f32 %v992_v40, %v1056_v41  ;;  %v1055_v51 = vmul.f32 2.0, %v682_v38  ;;  %v1188_v52 = vsel %vm1181_vm1, %v5028_v45, inf  ;;  %v998_v38 = vadd.f32 %v4999_v17, %v4973_v61 }
  0xd2   :  { %v4313_v43 = vpop.f32.mrf.mxu0  ;;  %v5026_v44 = vpop.xlane.xlu1 %315 }
  0xd3   :  { %v1058_v57 = vmul.f32 2.0, %v4313_v43  ;;  %v1197_v59 = vsel %vm1181_vm1, %v5030_v49, inf  ;;  %v5043_v63 = vsub.f32 %v991_v46, %v1055_v51 }
  0xd4   :  { %v692_v47 = vpop.f32.mrf.mxu0  ;;  %1192 = vmin.xlane.f32.xlu0 %v1191_v42 }
  0xd5   :  { %v5045_v4 = vsub.f32 %v994_v56, %v1058_v57  ;;  %v1057_v7 = vmul.f32 2.0, %v692_v47  ;;  %v1194_v55 = vsel %vm1181_vm1, %v5043_v63, inf  ;;  %v241_v47 = vpop.xlane.xlu0 %240  ;;  %v1000_v57 = vadd.f32 %v4999_v17, %v4976_v0 }
  0xd6   :  { %v4316_v50 = vpop.f32.mrf.mxu0  ;;  %v5035_v53 = vpop.xlane.xlu1 %321  ;;  %v997_v51 = vadd.f32 %v4999_v17, %v241_v47 }
  0xd7   :  { %v1203_v15 = vsel %vm1181_vm1, %v5045_v4, inf  ;;  %v1060_v20 = vmul.f32 2.0, %v4316_v50  ;;  %v5058_v23 = vsub.f32 %v993_v8, %v1057_v7 }
  0xd8   :  { %v702_v54 = vpop.f32.mrf.mxu0  ;;  %1189 = vmin.xlane.f32.xlu0 %v1188_v52 }
  0xd9   :  { %v1059_v28 = vmul.f32 2.0, %v702_v54  ;;  %v1200_v32 = vsel %vm1181_vm1, %v5058_v23, inf  ;;  %v5067_v35 = vsub.f32 %v996_v19, %v1060_v20  ;;  %v247_v8 = vpop.xlane.xlu0 %246 }
  0xda   :  { %v4319_v60 = vpop.f32.mrf.mxu0  ;;  %v5041_v62 = vpop.xlane.xlu1 %324  ;;  %v999_v19 = vadd.f32 %v4999_v17, %v247_v8 }
  0xdb   :  { %v1062_v39 = vmul.f32 2.0, %v4319_v60  ;;  %v1209_v40 = vsel %vm1181_vm1, %v5067_v35, inf  ;;  %v5079_v42 = vsub.f32 %v995_v29, %v1059_v28  ;;  %v1014_v28 = vadd.f32 %v4999_v17, %v4994_v16 }
  0xdc   :  { %v712_v1 = vpop.f32.mrf.mxu0  ;;  %1198 = vmin.xlane.f32.xlu0 %v1197_v59  ;;  %v1002_v29 = vadd.f32 %v4999_v17, %v4979_v3  ;;  %v1016_v16 = vadd.f32 %v4999_v17, %v5002_v21  ;;  %v1018_v21 = vadd.f32 %v4999_v17, %v5010_v30 }
  0xdd   :  { %v1061_v50 = vmul.f32 2.0, %v712_v1  ;;  %v1206_v61 = vsel %vm1181_vm1, %v5079_v42, inf  ;;  %v5090_v52 = vsub.f32 %v998_v38, %v1062_v39  ;;  %v253_v47 = vpop.xlane.xlu0 %252 }
  0xde   :  { %v4322_v5 = vpop.f32.mrf.mxu0  ;;  %v5050_v10 = vpop.xlane.xlu1 %327 }
  0xdf   :  { %v1064_v59 = vmul.f32 2.0, %v4322_v5  ;;  %v1215_v60 = vsel %vm1181_vm1, %v5090_v52, inf  ;;  %v5102_v2 = vsub.f32 %v997_v51, %v1061_v50 }
  0xe0   :  { %v722_v13 = vpop.f32.mrf.mxu0  ;;  %1195 = vmin.xlane.f32.xlu0 %v1194_v55 }
  0xe1   :  { %v1212_v0 = vsel %vm1181_vm1, %v5102_v2, inf  ;;  %v5113_v20 = vsub.f32 %v1000_v57, %v1064_v59 }
  0xe2   :  { %v4325_v18 = vpop.f32.mrf.mxu0  ;;  %v5056_v22 = vpop.xlane.xlu1 %330 }
  0xe3   :  { %v1221_v39 = vsel %vm1181_vm1, %v5113_v20, inf }
  0xe4   :  { %v732_v24 = vpop.f32.mrf.mxu0  ;;  %1204 = vmin.xlane.f32.xlu0 %v1203_v15  ;;  %v1063_v15 = vmul.f32 2.0, %v722_v13  ;;  %v1066_v13 = vmul.f32 2.0, %v4325_v18  ;;  %v1001_v18 = vadd.f32 %v4999_v17, %v253_v47 }
  0xe5   :  { %v1065_v3 = vmul.f32 2.0, %v732_v24 }
  0xe6   :  { %v5060_v27 = vpop.f32.mrf.mxu0  ;;  %v5065_v34 = vpop.xlane.xlu1 %333  ;;  %v5125_v50 = vsub.f32 %v999_v19, %v1063_v15  ;;  %v5140_v19 = vsub.f32 %v1002_v29, %v1066_v13 }
  0xe8   :  { %v5069_v58 = vpop.f32.mrf.mxu0  ;;  %1201 = vmin.xlane.f32.xlu0 %v1200_v32  ;;  %v1218_v8 = vsel %vm1181_vm1, %v5125_v50, inf  ;;  %v1227_v13 = vsel %vm1181_vm1, %v5140_v19, inf }
  0xea   :  { %v5071_v36 = vpop.f32.mrf.mxu0  ;;  %v5077_v41 = vpop.xlane.xlu1 %336 }
  0xec   :  { %v5081_v43 = vpop.f32.mrf.mxu0  ;;  %1210 = vmin.xlane.f32.xlu0 %v1209_v40 }
  0xee   :  { %v5083_v48 = vpop.f32.mrf.mxu0  ;;  %v5088_v46 = vpop.xlane.xlu1 %339 }
  0xf0   :  { %v5092_v54 = vpop.f32.mrf.mxu0  ;;  %1207 = vmin.xlane.f32.xlu0 %v1206_v61 }
  0xf2   :  { %v5094_v56 = vpop.f32.mrf.mxu0  ;;  %v5100_v1 = vpop.xlane.xlu1 %342 }
  0xf4   :  { %v5104_v7 = vpop.f32.mrf.mxu0  ;;  %1216 = vmin.xlane.f32.xlu0 %v1215_v60 }
  0xf6   :  { %v5106_v55 = vpop.f32.mrf.mxu0  ;;  %v5111_v5 = vpop.xlane.xlu1 %345 }
  0xf8   :  { %v5115_v25 = vpop.f32.mrf.mxu0  ;;  %1213 = vmin.xlane.f32.xlu0 %v1212_v0 }
  0xfa   :  { %v4343_v32 = vpop.f32.mrf.mxu0  ;;  %v5123_v40 = vpop.xlane.xlu1 %348 }
  0xfb   :  { %v1078_v38 = vmul.f32 2.0, %v4343_v32  ;;  %v1068_v32 = vmul.f32 2.0, %v5060_v27 }
  0xfc   :  { %v5127_v51 = vpop.f32.mrf.mxu0  ;;  %1222 = vmin.xlane.f32.xlu0 %v1221_v39 }
  0xfd   :  { %v5131_v61 = vsub.f32 %v1014_v28, %v1078_v38  ;;  %v1004_v28 = vadd.f32 %v4999_v17, %v4982_v6  ;;  %v1020_v6 = vadd.f32 %v4999_v17, %v5018_v37 }
  0xfe   :  { %v4346_v57 = vpop.f32.mrf.mxu0  ;;  %v5138_v15 = vpop.xlane.xlu1 %351 }
  0xff   :  { %7783 = vst [vmem:[#allocation8_spill] sm:$0xff] %v5131_v61  ;;  %v1080_v59 = vmul.f32 2.0, %v4346_v57  ;;  %v1263_v60 = vsel %vm1181_vm1, %v5131_v61, inf  ;;  %v259_v57 = vpop.xlane.xlu0 %258 }
 0x100   :  { %1264 = vmin.xlane.f32.xlu1 %v1263_v60  ;;  %v5142_v0 = vpop.f32.mrf.mxu0  ;;  %1219 = vmin.xlane.f32.xlu0 %v1218_v8  ;;  %v5157_v60 = vsub.f32 %v1001_v18, %v1065_v3  ;;  %v1003_v8 = vadd.f32 %v4999_v17, %v259_v57 }
 0x101   :  { %v5146_v24 = vsub.f32 %v1016_v16, %v1080_v59  ;;  %v1067_v16 = vmul.f32 2.0, %v5069_v58  ;;  %v1022_v58 = vadd.f32 %v4999_v17, %v5026_v44 }
 0x102   :  { %v4349_v38 = vpop.f32.mrf.mxu0  ;;  %v5155_v47 = vpop.xlane.xlu1 %354  ;;  %v1224_v3 = vsel %vm1181_vm1, %v5157_v60, inf }
 0x103   :  { %7784 = vst [vmem:[#allocation9_spill] sm:$0xff] %v5146_v24  ;;  %v1082_v39 = vmul.f32 2.0, %v4349_v38  ;;  %v1269_v29 = vsel %vm1181_vm1, %v5146_v24, inf }
 0x104   :  { %1270 = vmin.xlane.f32.xlu1 %v1269_v29  ;;  %v5159_v30 = vpop.f32.mrf.mxu0  ;;  %1228 = vmin.xlane.f32.xlu0 %v1227_v13  ;;  %v5173_v29 = vsub.f32 %v1004_v28, %v1068_v32  ;;  %v1070_v13 = vmul.f32 2.0, %v5071_v36 }
 0x105   :  { %v5163_v27 = vsub.f32 %v1018_v21, %v1082_v39  ;;  %v1006_v39 = vadd.f32 %v4999_v17, %v4985_v9  ;;  %v1024_v9 = vadd.f32 %v4999_v17, %v5035_v53 }
 0x106   :  { %v4352_v59 = vpop.f32.mrf.mxu0  ;;  %v5171_v18 = vpop.xlane.xlu1 %357 }
 0x107   :  { %7785 = vst [vmem:[#allocation10_spill] sm:$0xff] %v5163_v27  ;;  %v1084_v38 = vmul.f32 2.0, %v4352_v59  ;;  %v1275_v24 = vsel %vm1181_vm1, %v5163_v27, inf  ;;  %v5190_v27 = vsub.f32 %v1003_v8, %v1067_v16 }
 0x108   :  { %1276 = vmin.xlane.f32.xlu1 %v1275_v24  ;;  %v5175_v37 = vpop.f32.mrf.mxu0  ;;  %1225 = vmin.xlane.f32.xlu0 %v1224_v3  ;;  %v1233_v24 = vsel %vm1181_vm1, %v5173_v29, inf  ;;  %v265_v3 = vpop.xlane.xlu0 %264 }
 0x109   :  { %v5179_v21 = vsub.f32 %v1020_v6, %v1084_v38  ;;  %7787 = vst [vmem:[#allocation12_spill] sm:$0xff] %v5190_v27  ;;  %v1069_v6 = vmul.f32 2.0, %v5081_v43  ;;  %v1230_v16 = vsel %vm1181_vm1, %v5190_v27, inf  ;;  %v1026_v43 = vadd.f32 %v4999_v17, %v5050_v10 }
 0x10a   :  { %v4355_v57 = vpop.f32.mrf.mxu0  ;;  %v5188_v32 = vpop.xlane.xlu1 %360 }
 0x10b   :  { %7786 = vst [vmem:[#allocation11_spill] sm:$0xff] %v5179_v21  ;;  %v1086_v59 = vmul.f32 2.0, %v4355_v57  ;;  %v1281_v28 = vsel %vm1181_vm1, %v5179_v21, inf  ;;  %v1005_v57 = vadd.f32 %v4999_v17, %v265_v3  ;;  %v1072_v3 = vmul.f32 2.0, %v5083_v48 }
 0x10c   :  { %1282 = vmin.xlane.f32.xlu1 %v1281_v28  ;;  %v5192_v44 = vpop.f32.mrf.mxu0  ;;  %1234 = vmin.xlane.f32.xlu0 %v1233_v24  ;;  %v5206_v28 = vsub.f32 %v1006_v39, %v1070_v13  ;;  %v271_v24 = vpop.xlane.xlu0 %270 }
 0x10d   :  { %v5196_v36 = vsub.f32 %v1022_v58, %v1086_v59  ;;  %v1008_v59 = vadd.f32 %v4999_v17, %v4988_v11  ;;  %v1028_v11 = vadd.f32 %v4999_v17, %v5065_v34 }
 0x10e   :  { %v4358_v38 = vpop.f32.mrf.mxu0  ;;  %v5204_v8 = vpop.xlane.xlu1 %363  ;;  %7789 = vst [vmem:[#allocation14_spill] sm:$0xff] %v5206_v28 }
 0x10f   :  { %7788 = vst [vmem:[#allocation13_spill] sm:$0xff] %v5196_v36  ;;  %v1088_v21 = vmul.f32 2.0, %v4358_v38  ;;  %v1287_v61 = vsel %vm1181_vm1, %v5196_v36, inf }
 0x110   :  { %1288 = vmin.xlane.f32.xlu1 %v1287_v61  ;;  %v5208_v53 = vpop.f32.mrf.mxu0  ;;  %1231 = vmin.xlane.f32.xlu0 %v1230_v16  ;;  %v1239_v61 = vsel %vm1181_vm1, %v5206_v28, inf  ;;  %v5223_v16 = vsub.f32 %v1005_v57, %v1069_v6  ;;  %v277_v10 = vpop.xlane.xlu0 %276 }
 0x111   :  { %v5212_v58 = vsub.f32 %v1024_v9, %v1088_v21  ;;  %v1071_v9 = vmul.f32 2.0, %v5092_v54  ;;  %v1030_v54 = vadd.f32 %v4999_v17, %v5088_v46 }
 0x112   :  { %v4361_v38 = vpop.f32.mrf.mxu0  ;;  %v5221_v13 = vpop.xlane.xlu1 %366  ;;  %v1236_v57 = vsel %vm1181_vm1, %v5223_v16, inf }
 0x113   :  { %7790 = vst [vmem:[#allocation15_spill] sm:$0xff] %v5212_v58  ;;  %v1090_v36 = vmul.f32 2.0, %v4361_v38  ;;  %v1293_v39 = vsel %vm1181_vm1, %v5212_v58, inf  ;;  %v1007_v58 = vadd.f32 %v4999_v17, %v271_v24  ;;  %v1010_v24 = vadd.f32 %v4999_v17, %v4990_v12 }
 0x114   :  { %1294 = vmin.xlane.f32.xlu1 %v1293_v39  ;;  %v5225_v21 = vpop.f32.mrf.mxu0  ;;  %1240 = vmin.xlane.f32.xlu0 %v1239_v61  ;;  %v5239_v61 = vsub.f32 %v1008_v59, %v1072_v3  ;;  %v283_v27 = vpop.xlane.xlu0 %282  ;;  %v1032_v12 = vadd.f32 %v4999_v17, %v5111_v5 }
 0x115   :  { %v5229_v48 = vsub.f32 %v1026_v43, %v1090_v36  ;;  %v1074_v43 = vmul.f32 2.0, %v5094_v56 }
 0x116   :  { %v4364_v38 = vpop.f32.mrf.mxu0  ;;  %v5237_v39 = vpop.xlane.xlu1 %369  ;;  %7792 = vst [vmem:[#allocation17_spill] sm:$0xff] %v5239_v61  ;;  %v1245_v3 = vsel %vm1181_vm1, %v5239_v61, inf }
 0x117   :  { %7791 = vst [vmem:[#allocation16_spill] sm:$0xff] %v5229_v48  ;;  %v1092_v28 = vmul.f32 2.0, %v4364_v38  ;;  %v1299_v6 = vsel %vm1181_vm1, %v5229_v48, inf }
 0x118   :  { %1300 = vmin.xlane.f32.xlu1 %v1299_v6  ;;  %v5241_v34 = vpop.f32.mrf.mxu0  ;;  %1237 = vmin.xlane.f32.xlu0 %v1236_v57  ;;  %v5256_v57 = vsub.f32 %v1007_v58, %v1071_v9 }
 0x119   :  { %v5245_v36 = vsub.f32 %v1028_v11, %v1092_v28  ;;  %v289_v28 = vpop.xlane.xlu0 %288  ;;  %v1073_v11 = vmul.f32 2.0, %v5104_v7  ;;  %v1034_v7 = vadd.f32 %v4999_v17, %v5138_v15 }
 0x11a   :  { %v4367_v38 = vpop.f32.mrf.mxu0  ;;  %v5254_v6 = vpop.xlane.xlu1 %372  ;;  %7794 = vst [vmem:[#allocation19_spill] sm:$0xff] %v5256_v57  ;;  %v1242_v9 = vsel %vm1181_vm1, %v5256_v57, inf }
 0x11b   :  { %7793 = vst [vmem:[#allocation18_spill] sm:$0xff] %v5245_v36  ;;  %v1094_v48 = vmul.f32 2.0, %v4367_v38  ;;  %v1305_v59 = vsel %vm1181_vm1, %v5245_v36, inf  ;;  %v1009_v36 = vadd.f32 %v4999_v17, %v277_v10  ;;  %v1012_v10 = vadd.f32 %v4999_v17, %v4992_v14 }
 0x11c   :  { %1306 = vmin.xlane.f32.xlu1 %v1305_v59  ;;  %v5258_v46 = vpop.f32.mrf.mxu0  ;;  %1246 = vmin.xlane.f32.xlu0 %v1245_v3  ;;  %v5270_v3 = vsub.f32 %v1010_v24, %v1074_v43  ;;  %v1036_v14 = vadd.f32 %v4999_v17, %v5171_v18  ;;  %v1038_v18 = vadd.f32 %v4999_v17, %v5204_v8 }
 0x11d   :  { %v5262_v56 = vsub.f32 %v1030_v54, %v1094_v48  ;;  %v1076_v54 = vmul.f32 2.0, %v5106_v55  ;;  %v295_v15 = vpop.xlane.xlu0 %294 }
 0x11e   :  { %v4370_v38 = vpop.f32.mrf.mxu0  ;;  %v376_v59 = vpop.xlane.xlu1 %375  ;;  %7796 = vst [vmem:[#allocation21_spill] sm:$0xff] %v5270_v3  ;;  %v1251_v43 = vsel %vm1181_vm1, %v5270_v3, inf  ;;  %v1075_v3 = vmul.f32 2.0, %v5115_v25  ;;  %v1013_v25 = vadd.f32 %v4999_v17, %v289_v28 }
 0x11f   :  { %7795 = vst [vmem:[#allocation20_spill] sm:$0xff] %v5262_v56  ;;  %v1096_v61 = vmul.f32 2.0, %v4370_v38  ;;  %v1311_v58 = vsel %vm1181_vm1, %v5262_v56, inf }
 0x120   :  { %1312 = vmin.xlane.f32.xlu1 %v1311_v58  ;;  %v5272_v5 = vpop.f32.mrf.mxu0  ;;  %1243 = vmin.xlane.f32.xlu0 %v1242_v9  ;;  %v5287_v9 = vsub.f32 %v1009_v36, %v1073_v11 }
 0x121   :  { %v5276_v48 = vsub.f32 %v1032_v12, %v1096_v61 }
 0x122   :  { %v4373_v38 = vpop.f32.mrf.mxu0  ;;  %v5285_v58 = vpop.xlane.xlu1 %378  ;;  %v1248_v11 = vsel %vm1181_vm1, %v5287_v9, inf }
 0x123   :  { %7797 = vst [vmem:[#allocation22_spill] sm:$0xff] %v5276_v48  ;;  %v1098_v56 = vmul.f32 2.0, %v4373_v38  ;;  %v1317_v24 = vsel %vm1181_vm1, %v5276_v48, inf  ;;  %v1011_v38 = vadd.f32 %v4999_v17, %v283_v27  ;;  %v5296_v48 = vsub.f32 %v1012_v10, %v1076_v54 }
 0x124   :  { %1318 = vmin.xlane.f32.xlu1 %v1317_v24  ;;  %v5289_v61 = vpop.f32.mrf.mxu0  ;;  %1252 = vmin.xlane.f32.xlu0 %v1251_v43  ;;  %v1077_v54 = vmul.f32 2.0, %v5127_v51 }
 0x125   :  { %v5293_v55 = vsub.f32 %v1034_v7, %v1098_v56  ;;  %7799 = vst [vmem:[#allocation24_spill] sm:$0xff] %v5296_v48  ;;  %v301_v56 = vpop.xlane.xlu0 %300  ;;  %v1257_v10 = vsel %vm1181_vm1, %v5296_v48, inf }
 0x126   :  { %v4376_v12 = vpop.f32.mrf.mxu0  ;;  %v382_v24 = vpop.xlane.xlu1 %381 }
 0x127   :  { %7798 = vst [vmem:[#allocation23_spill] sm:$0xff] %v5293_v55  ;;  %v1100_v57 = vmul.f32 2.0, %v4376_v12  ;;  %v1323_v36 = vsel %vm1181_vm1, %v5293_v55, inf }
 0x128   :  { %1324 = vmin.xlane.f32.xlu1 %v1323_v36  ;;  %v5303_v43 = vpop.f32.mrf.mxu0  ;;  %1249 = vmin.xlane.f32.xlu0 %v1248_v11  ;;  %v5317_v11 = vsub.f32 %v1011_v38, %v1075_v3 }
 0x129   :  { %v5307_v27 = vsub.f32 %v1036_v14, %v1100_v57  ;;  %v1040_v57 = vadd.f32 %v4999_v17, %v5237_v39  ;;  %v1079_v14 = vmul.f32 2.0, %v5142_v0  ;;  %v1042_v0 = vadd.f32 %v4999_v17, %v376_v59 }
 0x12a   :  { %v4379_v7 = vpop.f32.mrf.mxu0  ;;  %v5315_v55 = vpop.xlane.xlu1 %384  ;;  %7801 = vst [vmem:[#allocation26_spill] sm:$0xff] %v5317_v11  ;;  %v1254_v3 = vsel %vm1181_vm1, %v5317_v11, inf }
 0x12b   :  { %7800 = vst [vmem:[#allocation25_spill] sm:$0xff] %v5307_v27  ;;  %v1102_v12 = vmul.f32 2.0, %v4379_v7  ;;  %v1329_v36 = vsel %vm1181_vm1, %v5307_v27, inf  ;;  %v1015_v7 = vadd.f32 %v4999_v17, %v295_v15 }
 0x12c   :  { %1330 = vmin.xlane.f32.xlu1 %v1329_v36  ;;  %v5319_v8 = vpop.f32.mrf.mxu0  ;;  %1258 = vmin.xlane.f32.xlu0 %v1257_v10  ;;  %v5331_v36 = vsub.f32 %v1013_v25, %v1077_v54  ;;  %v307_v10 = vpop.xlane.xlu0 %306 }
 0x12d   :  { %v5323_v28 = vsub.f32 %v1038_v18, %v1102_v12  ;;  %v1017_v12 = vadd.f32 %v4999_v17, %v301_v56 }
 0x12e   :  { %v4382_v51 = vpop.f32.mrf.mxu0  ;;  %v388_v38 = vpop.xlane.xlu1 %387  ;;  %7803 = vst [vmem:[#allocation28_spill] sm:$0xff] %v5331_v36 }
 0x12f   :  { %7802 = vst [vmem:[#allocation27_spill] sm:$0xff] %v5323_v28  ;;  %v1104_v48 = vmul.f32 2.0, %v4382_v51  ;;  %v1335_v27 = vsel %vm1181_vm1, %v5323_v28, inf  ;;  %v5339_v51 = vsub.f32 %v1015_v7, %v1079_v14  ;;  %v1081_v28 = vmul.f32 2.0, %v5159_v30 }
 0x130   :  { %1336 = vmin.xlane.f32.xlu1 %v1335_v27  ;;  %v5333_v39 = vpop.f32.mrf.mxu0  ;;  %1255 = vmin.xlane.f32.xlu0 %v1254_v3  ;;  %v1260_v27 = vsel %vm1181_vm1, %v5331_v36, inf  ;;  %v1019_v30 = vadd.f32 %v4999_v17, %v307_v10  ;;  %v1083_v3 = vmul.f32 2.0, %v5175_v37  ;;  %v1085_v10 = vmul.f32 2.0, %v5192_v44 }
 0x131   :  { %v5336_v18 = vsub.f32 %v1040_v57, %v1104_v48  ;;  %v1044_v48 = vadd.f32 %v4999_v17, %v382_v24  ;;  %v313_v57 = vpop.xlane.xlu0 %312  ;;  %v1266_v7 = vsel %vm1181_vm1, %v5339_v51, inf  ;;  %v5359_v36 = vsub.f32 %v1017_v12, %v1081_v28 }
 0x132   :  { %v4385_v15 = vpop.f32.mrf.mxu0  ;;  %v5346_v54 = vpop.xlane.xlu1 %390  ;;  %v1021_v37 = vadd.f32 %v4999_v17, %v313_v57 }
 0x133   :  { %7804 = vst [vmem:[#allocation29_spill] sm:$0xff] %v5336_v18  ;;  %v1106_v11 = vmul.f32 2.0, %v4385_v15  ;;  %v1341_v25 = vsel %vm1181_vm1, %v5336_v18, inf  ;;  %7806 = vst [vmem:[#allocation31_spill] sm:$0xff] %v5359_v36  ;;  %v1272_v28 = vsel %vm1181_vm1, %v5359_v36, inf }
 0x134   :  { %1342 = vmin.xlane.f32.xlu1 %v1341_v25  ;;  %v5348_v59 = vpop.f32.mrf.mxu0  ;;  %1261 = vmin.xlane.f32.xlu0 %v1260_v27 }
 0x135   :  { %v5351_v56 = vsub.f32 %v1042_v0, %v1106_v11  ;;  %v1046_v11 = vadd.f32 %v4999_v17, %v388_v38 }
 0x136   :  { %v4388_v14 = vpop.f32.mrf.mxu0  ;;  %v394_v18 = vpop.xlane.xlu1 %393 }
 0x137   :  { %7805 = vst [vmem:[#allocation30_spill] sm:$0xff] %v5351_v56  ;;  %v1108_v15 = vmul.f32 2.0, %v4388_v14  ;;  %v1347_v25 = vsel %vm1181_vm1, %v5351_v56, inf  ;;  %v1048_v44 = vadd.f32 %v4999_v17, %v394_v18 }
 0x138   :  { %1348 = vmin.xlane.f32.xlu1 %v1347_v25  ;;  %v5361_v24 = vpop.f32.mrf.mxu0  ;;  %1267 = vmin.xlane.f32.xlu0 %v1266_v7  ;;  %v319_v25 = vpop.xlane.xlu0 %318  ;;  %v5374_v7 = vsub.f32 %v1019_v30, %v1083_v3 }
 0x139   :  { %v5364_v0 = vsub.f32 %v1044_v48, %v1108_v15  ;;  %v1023_v15 = vadd.f32 %v4999_v17, %v319_v25 }
 0x13a   :  { %v4391_v27 = vpop.f32.mrf.mxu0  ;;  %v5372_v12 = vpop.xlane.xlu1 %396 }
 0x13b   :  { %7807 = vst [vmem:[#allocation32_spill] sm:$0xff] %v5364_v0  ;;  %v1110_v14 = vmul.f32 2.0, %v4391_v27  ;;  %v1353_v56 = vsel %vm1181_vm1, %v5364_v0, inf  ;;  %v5382_v27 = vsub.f32 %v1021_v37, %v1085_v10  ;;  %v1087_v0 = vmul.f32 2.0, %v5208_v53 }
 0x13c   :  { %1354 = vmin.xlane.f32.xlu1 %v1353_v56  ;;  %v5376_v38 = vpop.f32.mrf.mxu0  ;;  %1273 = vmin.xlane.f32.xlu0 %v1272_v28  ;;  %v1278_v56 = vsel %vm1181_vm1, %v5374_v7, inf  ;;  %v1025_v10 = vadd.f32 %v4999_v17, %v5041_v62 }
 0x13d   :  { %v5379_v48 = vsub.f32 %v1046_v11, %v1110_v14  ;;  %v1284_v37 = vsel %vm1181_vm1, %v5382_v27, inf  ;;  %v1089_v14 = vmul.f32 2.0, %v5225_v21 }
 0x13e   :  { %v4394_v57 = vpop.f32.mrf.mxu0  ;;  %v400_v3 = vpop.xlane.xlu1 %399 }
 0x13f   :  { %v1112_v36 = vmul.f32 2.0, %v4394_v57  ;;  %v1359_v30 = vsel %vm1181_vm1, %v5379_v48, inf  ;;  %v1050_v11 = vadd.f32 %v4999_v17, %v400_v3  ;;  %v5407_v62 = vsub.f32 %v1025_v10, %v1089_v14 }
 0x140   :  { %1360 = vmin.xlane.f32.xlu1 %v1359_v30  ;;  %v5389_v28 = vpop.f32.mrf.mxu0  ;;  %1279 = vmin.xlane.f32.xlu0 %v1278_v56  ;;  %v5401_v30 = vsub.f32 %v1023_v15, %v1087_v0  ;;  %v1091_v56 = vmul.f32 2.0, %v5241_v34  ;;  %v1029_v0 = vadd.f32 %v4999_v17, %v5077_v41  ;;  %v1179_v34 = vlaneseq }
 0x141   :  { %v5391_v18 = vsub.f32 %v1048_v44, %v1112_v36  ;;  %v1027_v44 = vadd.f32 %v4999_v17, %v5056_v22  ;;  %v1296_v22 = vsel %vm1181_vm1, %v5407_v62, inf  ;;  %v1031_v10 = vadd.f32 %v4999_v17, %v5100_v1 }
 0x142   :  { %v4397_v53 = vpop.f32.mrf.mxu0  ;;  %v1290_v3 = vsel %vm1181_vm1, %v5401_v30, inf  ;;  %v5428_v41 = vand.u32 127, %v1179_v34 }
 0x143   :  { %v1114_v25 = vmul.f32 2.0, %v4397_v53  ;;  %v1365_v57 = vsel %vm1181_vm1, %v5391_v18, inf  ;;  %v5416_v15 = vsub.f32 %v1027_v44, %v1091_v56 }
 0x144   :  { %1366 = vmin.xlane.f32.xlu1 %v1365_v57  ;;  %1285 = vmin.xlane.f32.xlu0 %v1284_v37  ;;  %v1095_v37 = vmul.f32 2.0, %v5272_v5  ;;  %v1097_v57 = vmul.f32 2.0, %v5289_v61  ;;  %v1035_v5 = vadd.f32 %v4999_v17, %v5155_v47 }
 0x145   :  { %v5403_v36 = vsub.f32 %v1050_v11, %v1114_v25  ;;  %v1093_v11 = vmul.f32 2.0, %v5258_v46  ;;  %v1302_v14 = vsel %vm1181_vm1, %v5416_v15, inf  ;;  %v1033_v46 = vadd.f32 %v4999_v17, %v5123_v40 }
 0x146   :  { %v5432_v25 = vsub.f32 %v1031_v10, %v1095_v37  ;;  %v1039_v37 = vadd.f32 %v4999_v17, %v5221_v13  ;;  %v1041_v13 = vadd.f32 %v4999_v17, %v5254_v6  ;;  %v1107_v6 = vmul.f32 2.0, %v5361_v24 }
 0x147   :  { %7808 = vst [vmem:[#allocation33_spill] sm:$0xff] %v5403_v36  ;;  %v1371_v21 = vsel %vm1181_vm1, %v5403_v36, inf  ;;  %v5423_v53 = vsub.f32 %v1029_v0, %v1093_v11  ;;  %v5440_v56 = vsub.f32 %v1033_v46, %v1097_v57 }
 0x148   :  { %1372 = vmin.xlane.f32.xlu1 %v1371_v21  ;;  %1291 = vmin.xlane.f32.xlu0 %v1290_v3  ;;  %v1099_v21 = vmul.f32 2.0, %v5303_v43  ;;  %v1314_v3 = vsel %vm1181_vm1, %v5432_v25, inf  ;;  %v1101_v43 = vmul.f32 2.0, %v5319_v8 }
 0x149   :  { %v1308_v1 = vsel %vm1181_vm1, %v5423_v53, inf }
 0x14a   :  { %v5454_v47 = vsub.f32 %v1035_v5, %v1099_v21  ;;  %v1105_v5 = vmul.f32 2.0, %v5348_v59 }
 0x14c   :  { %1297 = vmin.xlane.f32.xlu0 %v1296_v22  ;;  %v1320_v22 = vsel %vm1181_vm1, %v5440_v56, inf  ;;  %v1326_v46 = vsel %vm1181_vm1, %v5454_v47, inf }
 0x150   :  { %1303 = vmin.xlane.f32.xlu0 %v1302_v14 }
 0x154   :  { %1309 = vmin.xlane.f32.xlu0 %v1308_v1 }
 0x155   :  { %v1187_v44 = vpop.xlane.xlu0 %1186 }
 0x156   :  { %vm1375_vm2 = vcmp.eq.f32.partialorder %v5006_v26, %v1187_v44  ;;  %v1037_v26 = vadd.f32 %v4999_v17, %v5188_v32  ;;  %v1103_v32 = vmul.f32 2.0, %v5333_v39 }
 0x157   :  { %v1439_v40 = vsel %vm1375_vm2, %v5428_v41, 8 }
 0x158   :  { %v5447_v61 = vsel %vm1181_vm1, %v1439_v40, 2147483647  ;;  %1315 = vmin.xlane.f32.xlu0 %v1314_v3  ;;  %v5465_v14 = vsub.f32 %v1037_v26, %v1101_v43  ;;  %v1043_v3 = vadd.f32 %v4999_v17, %v5285_v58  ;;  %v1045_v43 = vadd.f32 %v4999_v17, %v5315_v55 }
 0x159   :  { %v5449_v0 = vpop.xlane.xlu0 %1183  ;;  %v1519_v11 = vshra.s32 %v5447_v61, 16  ;;  %v1047_v55 = vadd.f32 %v4999_v17, %v5346_v54 }
 0x15a   :  { %v1332_v39 = vsel %vm1181_vm1, %v5465_v14, inf  ;;  %vm1374_vm6 = vcmp.eq.f32.partialorder %v5012_v31, %v5449_v0 }
 0x15b   :  { %v5459_v34 = vcvt.s32.f32 %v1519_v11  ;;  %v5488_v11 = vsub.f32 %v1041_v13, %v1105_v5 }
 0x15c   :  { %1321 = vmin.xlane.f32.xlu0 %v1320_v22  ;;  %v1109_v22 = vmul.f32 2.0, %v5376_v38  ;;  %v1111_v38 = vmul.f32 2.0, %v5389_v28 }
 0x15d   :  { %1522 = vmin.xlane.f32.xlu1 %v5459_v34  ;;  %v1193_v10 = vpop.xlane.xlu0 %1192  ;;  %v1344_v24 = vsel %vm1181_vm1, %v5488_v11, inf }
 0x15e   :  { %vm1377_vm3 = vcmp.eq.f32.partialorder %v5014_v33, %v1193_v10  ;;  %v5477_v33 = vsub.f32 %v1039_v37, %v1103_v32  ;;  %v5501_v37 = vsub.f32 %v1043_v3, %v1107_v6  ;;  %v5524_v28 = vsub.f32 %v1047_v55, %v1111_v38 }
 0x15f   :  { %v1441_v8 = vsel %vm1377_vm3, %v5428_v41, 8 }
 0x160   :  { %v5472_v57 = vsel %vm1181_vm1, %v1441_v8, 2147483647  ;;  %1327 = vmin.xlane.f32.xlu0 %v1326_v46  ;;  %v1338_v26 = vsel %vm1181_vm1, %v5477_v33, inf  ;;  %v5507_v8 = vsub.f32 %v1045_v43, %v1109_v22  ;;  %v1350_v5 = vsel %vm1181_vm1, %v5501_v37, inf }
 0x161   :  { %v1190_v1 = vpop.xlane.xlu0 %1189  ;;  %v1549_v44 = vshra.s32 %v5472_v57, 16  ;;  %v1362_v43 = vsel %vm1181_vm1, %v5524_v28, inf }
 0x162   :  { %v1356_v54 = vsel %vm1181_vm1, %v5507_v8, inf  ;;  %vm1376_vm7 = vcmp.eq.f32.partialorder %v5028_v45, %v1190_v1 }
 0x163   :  { %v5482_v21 = vcvt.s32.f32 %v1549_v44  ;;  %v972_v44 = vpop.f32.mrf.mxu0  ;;  %v1440_v22 = vsel %vm1376_vm7, %v5428_v41, 8 }
 0x164   :  { %1333 = vmin.xlane.f32.xlu0 %v1332_v39  ;;  %v1049_v39 = vadd.f32 %v4999_v17, %v5372_v12  ;;  %v1113_v6 = vmul.f32 2.0, %v972_v44  ;;  %v1438_v17 = vsel %vm1374_vm6, %v5428_v41, 8  ;;  %v5553_v55 = vsel %vm1181_vm1, %v1440_v22, 2147483647 }
 0x165   :  { %1552 = vmin.xlane.f32.xlu1 %v5482_v21  ;;  %v1199_v40 = vpop.xlane.xlu0 %1198  ;;  %v5540_v31 = vsel %vm1181_vm1, %v1438_v17, 2147483647  ;;  %v1534_v44 = vshra.s32 %v5553_v55, 16 }
 0x166   :  { %vm1379_vm4 = vcmp.eq.f32.partialorder %v5030_v49, %v1199_v40 }
 0x167   :  { %v1443_v59 = vsel %vm1379_vm4, %v5428_v41, 8 }
 0x168   :  { %v5498_v10 = vsel %vm1181_vm1, %v1443_v59, 2147483647  ;;  %1339 = vmin.xlane.f32.xlu0 %v1338_v26  ;;  %v5534_v26 = vsub.f32 %v1049_v39, %v1113_v6 }
 0x169   :  { %v1196_v58 = vpop.xlane.xlu0 %1195  ;;  %v1579_v49 = vshra.s32 %v5498_v10, 16 }
 0x16a   :  { %7809 = vst [vmem:[#allocation34_spill] sm:$0xff] %v5534_v26  ;;  %vm1378_vm9 = vcmp.eq.f32.partialorder %v5043_v63, %v1196_v58  ;;  %v1368_v1 = vsel %vm1181_vm1, %v5534_v26, inf }
 0x16b   :  { %v5505_v32 = vcvt.s32.f32 %v1579_v49 }
 0x16c   :  { %1345 = vmin.xlane.f32.xlu0 %v1344_v24 }
 0x16d   :  { %1582 = vmin.xlane.f32.xlu1 %v5505_v32  ;;  %v1205_v46 = vpop.xlane.xlu0 %1204 }
 0x16e   :  { %vm1381_vm5 = vcmp.eq.f32.partialorder %v5045_v4, %v1205_v46  ;;  %v1442_v46 = vsel %vm1378_vm9, %v5428_v41, 8 }
 0x16f   :  { %v1445_v13 = vsel %vm1381_vm5, %v5428_v41, 8 }
 0x170   :  { %v5520_v40 = vsel %vm1181_vm1, %v1445_v13, 2147483647  ;;  %1351 = vmin.xlane.f32.xlu0 %v1350_v5  ;;  %v5565_v13 = vsel %vm1181_vm1, %v1442_v46, 2147483647 }
 0x171   :  { %v1202_v4 = vpop.xlane.xlu0 %1201  ;;  %v1609_v3 = vshra.s32 %v5520_v40, 16 }
 0x172   :  { %vm1380_vm10 = vcmp.eq.f32.partialorder %v5058_v23, %v1202_v4  ;;  %v5575_v4 = vcvt.s32.f32 %v1534_v44 }
 0x173   :  { %v5529_v59 = vcvt.s32.f32 %v1609_v3  ;;  %v1444_v39 = vsel %vm1380_vm10, %v5428_v41, 8  ;;  %v1564_v3 = vshra.s32 %v5565_v13, 16 }
 0x174   :  { %1357 = vmin.xlane.f32.xlu0 %v1356_v54  ;;  %v5579_v6 = vsel %vm1181_vm1, %v1444_v39, 2147483647 }
 0x175   :  { %1612 = vmin.xlane.f32.xlu1 %v5529_v59  ;;  %v1211_v12 = vpop.xlane.xlu0 %1210 }
 0x176   :  { %vm1383_vm8 = vcmp.eq.f32.partialorder %v5067_v35, %v1211_v12  ;;  %v1504_v35 = vshra.s32 %v5540_v31, 16 }
 0x177   :  { %v1447_v0 = vsel %vm1383_vm8, %v5428_v41, 8 }
 0x178   :  { %v5545_v49 = vsel %vm1181_vm1, %v1447_v0, 2147483647  ;;  %1363 = vmin.xlane.f32.xlu0 %v1362_v43  ;;  %v5561_v58 = vcvt.s32.f32 %v1504_v35  ;;  %v5588_v43 = vcvt.s32.f32 %v1564_v3  ;;  %v1594_v0 = vshra.s32 %v5579_v6, 16 }
 0x179   :  { %v1208_v45 = vpop.xlane.xlu0 %1207  ;;  %v1639_v24 = vshra.s32 %v5545_v49, 16 }
 0x17a   :  { %vm1382_vm12 = vcmp.eq.f32.partialorder %v5079_v42, %v1208_v45  ;;  %v5604_v46 = vcvt.s32.f32 %v1594_v0 }
 0x17b   :  { %v5555_v38 = vcvt.s32.f32 %v1639_v24  ;;  %v1446_v12 = vsel %vm1382_vm12, %v5428_v41, 8 }
 0x17c   :  { %1369 = vmin.xlane.f32.xlu0 %v1368_v1  ;;  %v5592_v22 = vsel %vm1181_vm1, %v1446_v12, 2147483647 }
 0x17d   :  { %1642 = vmin.xlane.f32.xlu1 %v5555_v38  ;;  %v1217_v63 = vpop.xlane.xlu0 %1216 }
 0x17e   :  { %vm1385_vm11 = vcmp.eq.f32.partialorder %v5090_v52, %v1217_v63  ;;  %v1624_v63 = vshra.s32 %v5592_v22, 16 }
 0x17f   :  { %v1449_v5 = vsel %vm1385_vm11, %v5428_v41, 8 }
 0x180   :  { %v5570_v54 = vsel %vm1181_vm1, %v1449_v5, 2147483647  ;;  %1507 = vmin.xlane.f32.xlu0 %v5561_v58 }
 0x181   :  { %v1214_v23 = vpop.xlane.xlu0 %1213  ;;  %v1669_v52 = vshra.s32 %v5570_v54, 16 }
 0x182   :  { %vm1384_vm13 = vcmp.eq.f32.partialorder %v5102_v2, %v1214_v23 }
 0x183   :  { %v5581_v17 = vcvt.s32.f32 %v1669_v52  ;;  %v1448_v1 = vsel %vm1384_vm13, %v5428_v41, 8 }
 0x184   :  { %1537 = vmin.xlane.f32.xlu0 %v5575_v4  ;;  %v5608_v44 = vsel %vm1181_vm1, %v1448_v1, 2147483647 }
 0x185   :  { %1672 = vmin.xlane.f32.xlu1 %v5581_v17  ;;  %v1223_v42 = vpop.xlane.xlu0 %1222  ;;  %7811 = vst [vmem:[#allocation36_spill] sm:$0xff] %v5608_v44  ;;  %v1654_v3 = vshra.s32 %v5608_v44, 16 }
 0x186   :  { %vm1387_vm14 = vcmp.eq.f32.partialorder %v5113_v20, %v1223_v42 }
 0x187   :  { %v1451_v45 = vsel %vm1387_vm14, %v5428_v41, 8 }
 0x188   :  { %v5597_v24 = vsel %vm1181_vm1, %v1451_v45, 2147483647  ;;  %1567 = vmin.xlane.f32.xlu0 %v5588_v43 }
 0x189   :  { %7810 = vst [vmem:[#allocation35_spill] sm:$0xff] %v5597_v24  ;;  %v5600_v2 = vpop.xlane.xlu1 %1264  ;;  %v1220_v35 = vpop.xlane.xlu0 %1219  ;;  %v1699_v20 = vshra.s32 %v5597_v24, 16 }
 0x18a   :  { %vm1386_vm15 = vcmp.eq.f32.partialorder %v5125_v50, %v1220_v35  ;;  %v5618_v50 = vcvt.s32.f32 %v1624_v63 }
 0x18b   :  { %v5610_v5 = vcvt.s32.f32 %v1699_v20  ;;  %v1450_v39 = vsel %vm1386_vm15, %v5428_v41, 8 }
 0x18c   :  { %1597 = vmin.xlane.f32.xlu0 %v5604_v46  ;;  %v5622_v12 = vsel %vm1181_vm1, %v1450_v39, 2147483647 }
 0x18d   :  { %7812 = vst [vmem:[#allocation37_spill] sm:$0xff] %v5610_v5  ;;  %v5614_v23 = vpop.xlane.xlu1 %1270  ;;  %1702 = vmin.xlane.f32.xlu1 %v5610_v5  ;;  %v1229_v52 = vpop.xlane.xlu0 %1228  ;;  %7813 = vst [vmem:[#allocation38_spill] sm:$0xff] %v5622_v12  ;;  %v1684_v20 = vshra.s32 %v5622_v12, 16 }
 0x18e   :  { %vm1389_vm2 = vcmp.eq.f32.partialorder %v5140_v19, %v1229_v52  ;;  %v5633_v19 = vcvt.s32.f32 %v1654_v3 }
 0x18f   :  { %v1453_v42 = vsel %vm1389_vm2, %v5428_v41, 8 }
 0x190   :  { %v5626_v0 = vsel %vm1181_vm1, %v1453_v42, 2147483647  ;;  %1627 = vmin.xlane.f32.xlu0 %v5618_v50  ;;  %7815 = vst [vmem:[#allocation40_spill] sm:$0xff] %v5633_v19 }
 0x191   :  { %7814 = vst [vmem:[#allocation39_spill] sm:$0xff] %v5626_v0  ;;  %v5629_v45 = vpop.xlane.xlu1 %1276  ;;  %v1226_v1 = vpop.xlane.xlu0 %1225  ;;  %v1729_v35 = vshra.s32 %v5626_v0, 16 }
 0x192   :  { %vm1388_vm3 = vcmp.eq.f32.partialorder %v5157_v60, %v1226_v1  ;;  %v5647_v60 = vcvt.s32.f32 %v1684_v20 }
 0x193   :  { %v1452_v63 = vsel %vm1388_vm3, %v5428_v41, 8  ;;  %v5637_v39 = vcvt.s32.f32 %v1729_v35 }
 0x194   :  { %v5640_v52 = vsel %vm1181_vm1, %v1452_v63, 2147483647  ;;  %1657 = vmin.xlane.f32.xlu0 %v5633_v19  ;;  %7818 = vst [vmem:[#allocation43_spill] sm:$0xff] %v5647_v60 }
 0x195   :  { %7816 = vst [vmem:[#allocation41_spill] sm:$0xff] %v5637_v39  ;;  %7817 = vst [vmem:[#allocation42_spill] sm:$0xff] %v5640_v52  ;;  %v5643_v42 = vpop.xlane.xlu1 %1282  ;;  %1732 = vmin.xlane.f32.xlu1 %v5637_v39  ;;  %v1235_v0 = vpop.xlane.xlu0 %1234  ;;  %v1714_v3 = vshra.s32 %v5640_v52, 16  ;;  %v7820_v39 = vld [vmem:[#allocation12_spill] sm:$0xff] }
 0x196   :  { %vm1391_vm4 = vcmp.eq.f32.partialorder %v5173_v29, %v1235_v0 }
 0x197   :  { %v1455_v1 = vsel %vm1391_vm4, %v5428_v41, 8  ;;  %v5659_v36 = vcvt.s32.f32 %v1714_v3 }
 0x198   :  { %v5652_v35 = vsel %vm1181_vm1, %v1455_v1, 2147483647  ;;  %1687 = vmin.xlane.f32.xlu0 %v5647_v60  ;;  %v7824_v60 = vld [vmem:[#allocation14_spill] sm:$0xff] }
 0x199   :  { %7819 = vst [vmem:[#allocation44_spill] sm:$0xff] %v5652_v35  ;;  %v5655_v63 = vpop.xlane.xlu1 %1288  ;;  %v1232_v12 = vpop.xlane.xlu0 %1231  ;;  %v1759_v5 = vshra.s32 %v5652_v35, 16  ;;  %7821 = vst [vmem:[#allocation12_spill] sm:$0xff] %v5659_v36 }
 0x19a   :  { %vm1390_vm5 = vcmp.eq.f32.partialorder %v7820_v39, %v1232_v12 }
 0x19b   :  { %v1454_v29 = vsel %vm1390_vm5, %v5428_v41, 8  ;;  %v5662_v0 = vcvt.s32.f32 %v1759_v5 }
 0x19c   :  { %v5665_v20 = vsel %vm1181_vm1, %v1454_v29, 2147483647  ;;  %1717 = vmin.xlane.f32.xlu0 %v5659_v36 }
 0x19d   :  { %7822 = vst [vmem:[#allocation45_spill] sm:$0xff] %v5662_v0  ;;  %7823 = vst [vmem:[#allocation46_spill] sm:$0xff] %v5665_v20  ;;  %v5668_v1 = vpop.xlane.xlu1 %1294  ;;  %1762 = vmin.xlane.f32.xlu1 %v5662_v0  ;;  %v1241_v52 = vpop.xlane.xlu0 %1240  ;;  %v1744_v35 = vshra.s32 %v5665_v20, 16 }
 0x19e   :  { %vm1393_vm6 = vcmp.eq.f32.partialorder %v7824_v60, %v1241_v52 }
 0x19f   :  { %v1457_v12 = vsel %vm1393_vm6, %v5428_v41, 8  ;;  %v5674_v39 = vcvt.s32.f32 %v1744_v35 }
 0x1a0   :  { %v5677_v5 = vsel %vm1181_vm1, %v1457_v12, 2147483647 }
 0x1a1   :  { %7825 = vst [vmem:[#allocation14_spill] sm:$0xff] %v5674_v39  ;;  %7826 = vst [vmem:[#allocation47_spill] sm:$0xff] %v5677_v5  ;;  %v5679_v3 = vpop.xlane.xlu1 %1300  ;;  %1747 = vmin.xlane.f32.xlu0 %v5674_v39  ;;  %v1238_v29 = vpop.xlane.xlu0 %1237  ;;  %v1789_v36 = vshra.s32 %v5677_v5, 16  ;;  %v7829_v39 = vld [vmem:[#allocation17_spill] sm:$0xff] }
 0x1a2   :  { %vm1392_vm7 = vcmp.eq.f32.partialorder %v5223_v16, %v1238_v29 }
 0x1a3   :  { %v1456_v20 = vsel %vm1392_vm7, %v5428_v41, 8  ;;  %v5685_v0 = vcvt.s32.f32 %v1789_v36 }
 0x1a4   :  { %v5688_v52 = vsel %vm1181_vm1, %v1456_v20, 2147483647 }
 0x1a5   :  { %7827 = vst [vmem:[#allocation48_spill] sm:$0xff] %v5685_v0  ;;  %7828 = vst [vmem:[#allocation49_spill] sm:$0xff] %v5688_v52  ;;  %v5690_v60 = vpop.xlane.xlu1 %1306  ;;  %1792 = vmin.xlane.f32.xlu1 %v5685_v0  ;;  %v1247_v35 = vpop.xlane.xlu0 %1246  ;;  %v1774_v12 = vshra.s32 %v5688_v52, 16  ;;  %v7832_v0 = vld [vmem:[#allocation19_spill] sm:$0xff] }
 0x1a6   :  { %vm1395_vm8 = vcmp.eq.f32.partialorder %v7829_v39, %v1247_v35 }
 0x1a7   :  { %v1459_v5 = vsel %vm1395_vm8, %v5428_v41, 8  ;;  %v5696_v24 = vcvt.s32.f32 %v1774_v12 }
 0x1a8   :  { %v5699_v16 = vsel %vm1181_vm1, %v1459_v5, 2147483647 }
 0x1a9   :  { %7830 = vst [vmem:[#allocation17_spill] sm:$0xff] %v5696_v24  ;;  %7831 = vst [vmem:[#allocation50_spill] sm:$0xff] %v5699_v16  ;;  %v5701_v36 = vpop.xlane.xlu1 %1312  ;;  %1777 = vmin.xlane.f32.xlu0 %v5696_v24  ;;  %v1244_v20 = vpop.xlane.xlu0 %1243  ;;  %v1819_v29 = vshra.s32 %v5699_v16, 16  ;;  %v7835_v24 = vld [vmem:[#allocation21_spill] sm:$0xff] }
 0x1aa   :  { %vm1394_vm9 = vcmp.eq.f32.partialorder %v7832_v0, %v1244_v20 }
 0x1ab   :  { %v1458_v52 = vsel %vm1394_vm9, %v5428_v41, 8  ;;  %v5707_v19 = vcvt.s32.f32 %v1819_v29  ;;  %v7838_v29 = vld [vmem:[#allocation8_spill] sm:$0xff] }
 0x1ac   :  { %v5710_v39 = vsel %vm1181_vm1, %v1458_v52, 2147483647  ;;  %vm1401_vm11 = vcmp.eq.f32.partialorder %v7838_v29, %v5600_v2  ;;  %v7841_v2 = vld [vmem:[#allocation9_spill] sm:$0xff]  ;;  %v7842_v29 = vld [vmem:[#allocation24_spill] sm:$0xff] }
 0x1ad   :  { %7833 = vst [vmem:[#allocation19_spill] sm:$0xff] %v5707_v19  ;;  %7834 = vst [vmem:[#allocation51_spill] sm:$0xff] %v5710_v39  ;;  %v5712_v35 = vpop.xlane.xlu1 %1318  ;;  %1822 = vmin.xlane.f32.xlu1 %v5707_v19  ;;  %v1253_v5 = vpop.xlane.xlu0 %1252  ;;  %v1804_v12 = vshra.s32 %v5710_v39, 16  ;;  %vm1403_vm13 = vcmp.eq.f32.partialorder %v7841_v2, %v5614_v23 }
 0x1ae   :  { %vm1397_vm10 = vcmp.eq.f32.partialorder %v7835_v24, %v1253_v5 }
 0x1af   :  { %v1461_v16 = vsel %vm1397_vm10, %v5428_v41, 8  ;;  %v5718_v26 = vcvt.s32.f32 %v1804_v12 }
 0x1b0   :  { %v5721_v0 = vsel %vm1181_vm1, %v1461_v16, 2147483647  ;;  %v1465_v16 = vsel %vm1401_vm11, %v5428_v41, 8 }
 0x1b1   :  { %7836 = vst [vmem:[#allocation21_spill] sm:$0xff] %v5718_v26  ;;  %7837 = vst [vmem:[#allocation52_spill] sm:$0xff] %v5721_v0  ;;  %1807 = vmin.xlane.f32.xlu0 %v5718_v26  ;;  %v1250_v52 = vpop.xlane.xlu0 %1249  ;;  %v1849_v20 = vshra.s32 %v5721_v0, 16  ;;  %v5727_v19 = vpop.xlane.xlu1 %1324 }
 0x1b2   :  { %vm1396_vm12 = vcmp.eq.f32.partialorder %v5287_v9, %v1250_v52 }
 0x1b3   :  { %v1460_v24 = vsel %vm1396_vm12, %v5428_v41, 8  ;;  %v5731_v5 = vcvt.s32.f32 %v1849_v20  ;;  %v5746_v20 = vsel %vm1181_vm1, %v1465_v16, 2147483647 }
 0x1b4   :  { %v5734_v12 = vsel %vm1181_vm1, %v1460_v24, 2147483647  ;;  %7844 = vst [vmem:[#allocation24_spill] sm:$0xff] %v5746_v20 }
 0x1b5   :  { %7839 = vst [vmem:[#allocation8_spill] sm:$0xff] %v5731_v5  ;;  %7840 = vst [vmem:[#allocation53_spill] sm:$0xff] %v5734_v12  ;;  %1852 = vmin.xlane.f32.xlu1 %v5731_v5  ;;  %v1259_v26 = vpop.xlane.xlu0 %1258  ;;  %v1834_v0 = vshra.s32 %v5734_v12, 16  ;;  %v5748_v24 = vpop.xlane.xlu1 %1330  ;;  %v1467_v5 = vsel %vm1403_vm13, %v5428_v41, 8 }
 0x1b6   :  { %vm1399_vm14 = vcmp.eq.f32.partialorder %v7842_v29, %v1259_v26  ;;  %v7846_v26 = vld [vmem:[#allocation10_spill] sm:$0xff]  ;;  %v1909_v29 = vshra.s32 %v5746_v20, 16 }
 0x1b7   :  { %v1463_v9 = vsel %vm1399_vm14, %v5428_v41, 8  ;;  %v5743_v52 = vcvt.s32.f32 %v1834_v0  ;;  %vm1405_vm15 = vcmp.eq.f32.partialorder %v7846_v26, %v5629_v45  ;;  %v7847_v0 = vld [vmem:[#allocation26_spill] sm:$0xff]  ;;  %v7851_v26 = vld [vmem:[#allocation28_spill] sm:$0xff] }
 0x1b8   :  { %v5751_v39 = vsel %vm1181_vm1, %v1463_v9, 2147483647  ;;  %v5764_v9 = vsel %vm1181_vm1, %v1467_v5, 2147483647 }
 0x1b9   :  { %7843 = vst [vmem:[#allocation9_spill] sm:$0xff] %v5743_v52  ;;  %7845 = vst [vmem:[#allocation54_spill] sm:$0xff] %v5751_v39  ;;  %1837 = vmin.xlane.f32.xlu0 %v5743_v52  ;;  %v1256_v12 = vpop.xlane.xlu0 %1255  ;;  %v1879_v23 = vshra.s32 %v5751_v39, 16  ;;  %v1469_v52 = vsel %vm1405_vm15, %v5428_v41, 8  ;;  %v1939_v20 = vshra.s32 %v5764_v9, 16 }
 0x1ba   :  { %vm1398_vm2 = vcmp.eq.f32.partialorder %v7847_v0, %v1256_v12  ;;  %v7850_v12 = vld [vmem:[#allocation11_spill] sm:$0xff]  ;;  %v5778_v0 = vcvt.s32.f32 %v1909_v29 }
 0x1bb   :  { %v1462_v16 = vsel %vm1398_vm2, %v5428_v41, 8  ;;  %v5760_v2 = vcvt.s32.f32 %v1879_v23  ;;  %vm1407_vm3 = vcmp.eq.f32.partialorder %v7850_v12, %v5643_v42  ;;  %v5774_v23 = vpop.xlane.xlu1 %1336  ;;  %v5797_v12 = vcvt.s32.f32 %v1939_v20 }
 0x1bc   :  { %v5767_v44 = vsel %vm1181_vm1, %v1462_v16, 2147483647  ;;  %7852 = vst [vmem:[#allocation11_spill] sm:$0xff] %v5778_v0  ;;  %v1471_v42 = vsel %vm1407_vm3, %v5428_v41, 8 }
 0x1bd   :  { %7848 = vst [vmem:[#allocation10_spill] sm:$0xff] %v5760_v2  ;;  %7849 = vst [vmem:[#allocation26_spill] sm:$0xff] %v5767_v44  ;;  %1882 = vmin.xlane.f32.xlu1 %v5760_v2  ;;  %v1262_v39 = vpop.xlane.xlu0 %1261  ;;  %v1864_v45 = vshra.s32 %v5767_v44, 16  ;;  %v5784_v2 = vsel %vm1181_vm1, %v1469_v52, 2147483647 }
 0x1be   :  { %vm1400_vm4 = vcmp.eq.f32.partialorder %v7851_v26, %v1262_v39  ;;  %7854 = vst [vmem:[#allocation55_spill] sm:$0xff] %v5784_v2 }
 0x1bf   :  { %v1464_v5 = vsel %vm1400_vm4, %v5428_v41, 8  ;;  %v5780_v16 = vcvt.s32.f32 %v1864_v45  ;;  %v7856_v45 = vld [vmem:[#allocation13_spill] sm:$0xff] }
 0x1c0   :  { %v5787_v44 = vsel %vm1181_vm1, %v1464_v5, 2147483647  ;;  %vm1409_vm5 = vcmp.eq.f32.partialorder %v7856_v45, %v5655_v63  ;;  %7857 = vst [vmem:[#allocation13_spill] sm:$0xff] %v5797_v12  ;;  %v1969_v5 = vshra.s32 %v5784_v2, 16 }
 0x1c1   :  { %7853 = vst [vmem:[#allocation28_spill] sm:$0xff] %v5780_v16  ;;  %7855 = vst [vmem:[#allocation56_spill] sm:$0xff] %v5787_v44  ;;  %1912 = vmin.xlane.f32.xlu1 %v5778_v0  ;;  %1867 = vmin.xlane.f32.xlu0 %v5780_v16  ;;  %v1268_v39 = vpop.xlane.xlu0 %1267  ;;  %v1894_v29 = vshra.s32 %v5787_v44, 16  ;;  %v5803_v0 = vsel %vm1181_vm1, %v1471_v42, 2147483647  ;;  %v5805_v16 = vpop.xlane.xlu1 %1342  ;;  %v1473_v63 = vsel %vm1409_vm5, %v5428_v41, 8 }
 0x1c2   :  { %vm1402_vm6 = vcmp.eq.f32.partialorder %v5339_v51, %v1268_v39  ;;  %v7860_v39 = vld [vmem:[#allocation15_spill] sm:$0xff]  ;;  %v5818_v45 = vcvt.s32.f32 %v1969_v5  ;;  %v1999_v2 = vshra.s32 %v5803_v0, 16 }
 0x1c3   :  { %v1466_v52 = vsel %vm1402_vm6, %v5428_v41, 8  ;;  %v5799_v26 = vcvt.s32.f32 %v1894_v29  ;;  %vm1411_vm7 = vcmp.eq.f32.partialorder %v7860_v39, %v5668_v1  ;;  %v7861_v29 = vld [vmem:[#allocation31_spill] sm:$0xff] }
 0x1c4   :  { %v5808_v44 = vsel %vm1181_vm1, %v1466_v52, 2147483647 }
 0x1c5   :  { %7858 = vst [vmem:[#allocation57_spill] sm:$0xff] %v5799_v26  ;;  %7859 = vst [vmem:[#allocation58_spill] sm:$0xff] %v5808_v44  ;;  %1942 = vmin.xlane.f32.xlu1 %v5797_v12  ;;  %1897 = vmin.xlane.f32.xlu0 %v5799_v26  ;;  %v1274_v51 = vpop.xlane.xlu0 %1273  ;;  %v1924_v20 = vshra.s32 %v5808_v44, 16  ;;  %v5824_v12 = vsel %vm1181_vm1, %v1473_v63, 2147483647  ;;  %v1475_v44 = vsel %vm1411_vm7, %v5428_v41, 8  ;;  %v5837_v63 = vcvt.s32.f32 %v1999_v2 }
 0x1c6   :  { %vm1404_vm8 = vcmp.eq.f32.partialorder %v7861_v29, %v1274_v51  ;;  %7863 = vst [vmem:[#allocation31_spill] sm:$0xff] %v5824_v12  ;;  %v5833_v51 = vpop.xlane.xlu1 %1348  ;;  %v2029_v29 = vshra.s32 %v5824_v12, 16  ;;  %v7867_v2 = vld [vmem:[#allocation16_spill] sm:$0xff] }
 0x1c7   :  { %v1468_v42 = vsel %vm1404_vm8, %v5428_v41, 8  ;;  %v5820_v52 = vcvt.s32.f32 %v1924_v20  ;;  %vm1413_vm10 = vcmp.eq.f32.partialorder %v7867_v2, %v5679_v3 }
 0x1c8   :  { %v5827_v26 = vsel %vm1181_vm1, %v1468_v42, 2147483647  ;;  %v5843_v42 = vsel %vm1181_vm1, %v1475_v44, 2147483647 }
 0x1c9   :  { %7862 = vst [vmem:[#allocation15_spill] sm:$0xff] %v5820_v52  ;;  %7864 = vst [vmem:[#allocation59_spill] sm:$0xff] %v5827_v26  ;;  %1972 = vmin.xlane.f32.xlu1 %v5818_v45  ;;  %1927 = vmin.xlane.f32.xlu0 %v5820_v52  ;;  %v1280_v1 = vpop.xlane.xlu0 %1279  ;;  %v1954_v5 = vshra.s32 %v5827_v26, 16 }
 0x1ca   :  { %vm1406_vm9 = vcmp.eq.f32.partialorder %v5374_v7, %v1280_v1  ;;  %v5860_v12 = vpop.xlane.xlu1 %1354 }
 0x1cb   :  { %v1470_v20 = vsel %vm1406_vm9, %v5428_v41, 8  ;;  %v5839_v39 = vcvt.s32.f32 %v1954_v5  ;;  %v5855_v5 = vcvt.s32.f32 %v2029_v29 }
 0x1cc   :  { %v5846_v52 = vsel %vm1181_vm1, %v1470_v20, 2147483647  ;;  %v2059_v20 = vshra.s32 %v5843_v42, 16 }
 0x1cd   :  { %7865 = vst [vmem:[#allocation60_spill] sm:$0xff] %v5839_v39  ;;  %7866 = vst [vmem:[#allocation61_spill] sm:$0xff] %v5846_v52  ;;  %2002 = vmin.xlane.f32.xlu1 %v5837_v63  ;;  %1957 = vmin.xlane.f32.xlu0 %v5839_v39  ;;  %v1286_v26 = vpop.xlane.xlu0 %1285  ;;  %v1984_v7 = vshra.s32 %v5846_v52, 16  ;;  %v1477_v52 = vsel %vm1413_vm10, %v5428_v41, 8 }
 0x1ce   :  { %vm1408_vm11 = vcmp.eq.f32.partialorder %v5382_v27, %v1286_v26  ;;  %v5871_v29 = vcvt.s32.f32 %v2059_v20  ;;  %v5876_v2 = vsel %vm1181_vm1, %v1477_v52, 2147483647  ;;  %v5886_v20 = vpop.xlane.xlu1 %1360 }
 0x1cf   :  { %v1472_v1 = vsel %vm1408_vm11, %v5428_v41, 8  ;;  %v5857_v44 = vcvt.s32.f32 %v1984_v7  ;;  %7872 = vst [vmem:[#allocation65_spill] sm:$0xff] %v5876_v2 }
 0x1d0   :  { %v5863_v39 = vsel %vm1181_vm1, %v1472_v1, 2147483647  ;;  %7870 = vst [vmem:[#allocation63_spill] sm:$0xff] %v5871_v29 }
 0x1d1   :  { %7868 = vst [vmem:[#allocation16_spill] sm:$0xff] %v5857_v44  ;;  %7869 = vst [vmem:[#allocation62_spill] sm:$0xff] %v5863_v39  ;;  %2032 = vmin.xlane.f32.xlu1 %v5855_v5  ;;  %1987 = vmin.xlane.f32.xlu0 %v5857_v44  ;;  %v1292_v27 = vpop.xlane.xlu0 %1291  ;;  %v2014_v3 = vshra.s32 %v5863_v39, 16 }
 0x1d2   :  { %vm1410_vm12 = vcmp.eq.f32.partialorder %v5401_v30, %v1292_v27  ;;  %v7874_v30 = vld [vmem:[#allocation18_spill] sm:$0xff] }
 0x1d3   :  { %v1474_v26 = vsel %vm1410_vm12, %v5428_v41, 8  ;;  %v5873_v7 = vcvt.s32.f32 %v2014_v3  ;;  %vm1415_vm13 = vcmp.eq.f32.partialorder %v7874_v30, %v5690_v60  ;;  %v2089_v3 = vshra.s32 %v5876_v2, 16  ;;  %v7879_v2 = vld [vmem:[#allocation20_spill] sm:$0xff] }
 0x1d4   :  { %v5879_v1 = vsel %vm1181_vm1, %v1474_v26, 2147483647  ;;  %vm1417_vm2 = vcmp.eq.f32.partialorder %v7879_v2, %v5701_v36 }
 0x1d5   :  { %7871 = vst [vmem:[#allocation64_spill] sm:$0xff] %v5873_v7  ;;  %7873 = vst [vmem:[#allocation66_spill] sm:$0xff] %v5879_v1  ;;  %2062 = vmin.xlane.f32.xlu1 %v5871_v29  ;;  %2017 = vmin.xlane.f32.xlu0 %v5873_v7  ;;  %v1298_v44 = vpop.xlane.xlu0 %1297  ;;  %v2044_v39 = vshra.s32 %v5879_v1, 16  ;;  %v1479_v7 = vsel %vm1415_vm13, %v5428_v41, 8  ;;  %v5899_v60 = vcvt.s32.f32 %v2089_v3 }
 0x1d6   :  { %vm1412_vm14 = vcmp.eq.f32.partialorder %v5407_v62, %v1298_v44  ;;  %v5903_v44 = vsel %vm1181_vm1, %v1479_v7, 2147483647  ;;  %v1481_v7 = vsel %vm1417_vm2, %v5428_v41, 8 }
 0x1d7   :  { %v1476_v52 = vsel %vm1412_vm14, %v5428_v41, 8  ;;  %v5890_v27 = vcvt.s32.f32 %v2044_v39  ;;  %7877 = vst [vmem:[#allocation68_spill] sm:$0xff] %v5899_v60  ;;  %7878 = vst [vmem:[#allocation69_spill] sm:$0xff] %v5903_v44  ;;  %v5905_v39 = vpop.xlane.xlu1 %1366  ;;  %v5927_v2 = vsel %vm1181_vm1, %v1481_v7, 2147483647 }
 0x1d8   :  { %v5894_v26 = vsel %vm1181_vm1, %v1476_v52, 2147483647 }
 0x1d9   :  { %7875 = vst [vmem:[#allocation18_spill] sm:$0xff] %v5890_v27  ;;  %7876 = vst [vmem:[#allocation67_spill] sm:$0xff] %v5894_v26  ;;  %2047 = vmin.xlane.f32.xlu1 %v5890_v27  ;;  %v1304_v1 = vpop.xlane.xlu0 %1303  ;;  %v2074_v62 = vshra.s32 %v5894_v26, 16 }
 0x1da   :  { %vm1414_vm15 = vcmp.eq.f32.partialorder %v5416_v15, %v1304_v1  ;;  %v2119_v15 = vshra.s32 %v5903_v44, 16 }
 0x1db   :  { %v1478_v30 = vsel %vm1414_vm15, %v5428_v41, 8  ;;  %v5911_v27 = vcvt.s32.f32 %v2074_v62  ;;  %v5919_v26 = vpop.xlane.xlu1 %1372 }
 0x1dc   :  { %v5915_v1 = vsel %vm1181_vm1, %v1478_v30, 2147483647  ;;  %v5923_v29 = vcvt.s32.f32 %v2119_v15 }
 0x1dd   :  { %2092 = vmin.xlane.f32.xlu1 %v5899_v60  ;;  %v1310_v52 = vpop.xlane.xlu0 %1309  ;;  %7880 = vst [vmem:[#allocation20_spill] sm:$0xff] %v5911_v27  ;;  %7881 = vst [vmem:[#allocation70_spill] sm:$0xff] %v5915_v1  ;;  %v1518_v60 = vand.u32 65535, %v5447_v61  ;;  %v2104_v36 = vshra.s32 %v5915_v1, 16 }
 0x1de   :  { %vm1416_vm3 = vcmp.eq.f32.partialorder %v5423_v53, %v1310_v52  ;;  %v2149_v52 = vshra.s32 %v5927_v2, 16 }
 0x1df   :  { %v1480_v62 = vsel %vm1416_vm3, %v5428_v41, 8  ;;  %v1520_v53 = vcvt.s32.f32 %v1518_v60  ;;  %v5937_v61 = vcvt.s32.f32 %v2104_v36 }
 0x1e0   :  { %v5941_v15 = vsel %vm1181_vm1, %v1480_v62, 2147483647 }
 0x1e1   :  { %2077 = vmin.xlane.f32.xlu1 %v5911_v27  ;;  %v1316_v3 = vpop.xlane.xlu0 %1315  ;;  %v7882_v27 = vld [vmem:[#allocation22_spill] sm:$0xff]  ;;  %7884 = vst [vmem:[#allocation71_spill] sm:$0xff] %v5941_v15 }
 0x1e2   :  { %vm1419_vm4 = vcmp.eq.f32.partialorder %v7882_v27, %v5712_v35  ;;  %7883 = vst [vmem:[#allocation22_spill] sm:$0xff] %v5937_v61  ;;  %vm1418_vm6 = vcmp.eq.f32.partialorder %v5432_v25, %v1316_v3  ;;  %v5946_v27 = vcvt.s32.f32 %v2149_v52 }
 0x1e3   :  { %v1483_v1 = vsel %vm1419_vm4, %v5428_v41, 8  ;;  %v1482_v36 = vsel %vm1418_vm6, %v5428_v41, 8 }
 0x1e4   :  { %v5950_v60 = vsel %vm1181_vm1, %v1483_v1, 2147483647  ;;  %v5960_v25 = vsel %vm1181_vm1, %v1482_v36, 2147483647 }
 0x1e5   :  { %2122 = vmin.xlane.f32.xlu1 %v5923_v29  ;;  %v1322_v30 = vpop.xlane.xlu0 %1321  ;;  %7887 = vst [vmem:[#allocation72_spill] sm:$0xff] %v5960_v25 }
 0x1e6   :  { %v5933_v44 = vpop.xlane.xlu1 %1522  ;;  %vm1420_vm8 = vcmp.eq.f32.partialorder %v5440_v56, %v1322_v30 }
 0x1e7   :  { %vm1524_vm5 = vcmp.eq.f32.partialorder %v5459_v34, %v5933_v44  ;;  %v2134_v34 = vshra.s32 %v5941_v15, 16  ;;  %v2164_v15 = vshra.s32 %v5960_v25, 16 }
 0x1e8   :  { %v1525_v7 = vsel %vm1524_vm5, %v1520_v53, inf  ;;  %v7885_v53 = vld [vmem:[#allocation23_spill] sm:$0xff] }
 0x1e9   :  { %1526 = vmin.xlane.f32.xlu0 %v1525_v7  ;;  %2107 = vmin.xlane.f32.xlu1 %v5937_v61  ;;  %v1328_v35 = vpop.xlane.xlu0 %1327  ;;  %vm1421_vm7 = vcmp.eq.f32.partialorder %v7885_v53, %v5727_v19  ;;  %v5956_v7 = vcvt.s32.f32 %v2134_v34  ;;  %v2179_v61 = vshra.s32 %v5950_v60, 16  ;;  %v1484_v34 = vsel %vm1420_vm8, %v5428_v41, 8  ;;  %v7889_v53 = vld [vmem:[#allocation25_spill] sm:$0xff] }
 0x1ea   :  { %v1485_v3 = vsel %vm1421_vm7, %v5428_v41, 8  ;;  %vm1423_vm9 = vcmp.eq.f32.partialorder %v7889_v53, %v5748_v24  ;;  %v5981_v30 = vsel %vm1181_vm1, %v1484_v34, 2147483647  ;;  %vm1422_vm10 = vcmp.eq.f32.partialorder %v5454_v47, %v1328_v35  ;;  %v7894_v53 = vld [vmem:[#allocation27_spill] sm:$0xff] }
 0x1eb   :  { %7886 = vst [vmem:[#allocation23_spill] sm:$0xff] %v5956_v7  ;;  %v5965_v52 = vcvt.s32.f32 %v2179_v61  ;;  %v5969_v19 = vsel %vm1181_vm1, %v1485_v3, 2147483647  ;;  %7891 = vst [vmem:[#allocation74_spill] sm:$0xff] %v5981_v30  ;;  %v1487_v61 = vsel %vm1423_vm9, %v5428_v41, 8  ;;  %vm1425_vm11 = vcmp.eq.f32.partialorder %v7894_v53, %v5774_v23 }
 0x1ec   :  { %v2209_v56 = vshra.s32 %v5969_v19, 16  ;;  %v5992_v24 = vsel %vm1181_vm1, %v1487_v61, 2147483647  ;;  %v1503_v53 = vand.u32 65535, %v5540_v31  ;;  %v1548_v31 = vand.u32 65535, %v5472_v57 }
 0x1ed   :  { %2152 = vmin.xlane.f32.xlu1 %v5946_v27  ;;  %v1334_v62 = vpop.xlane.xlu0 %1333  ;;  %7888 = vst [vmem:[#allocation73_spill] sm:$0xff] %v5965_v52  ;;  %7893 = vst [vmem:[#allocation76_spill] sm:$0xff] %v5992_v24  ;;  %v2239_v47 = vshra.s32 %v5992_v24, 16 }
 0x1ee   :  { %v5988_v25 = vcvt.s32.f32 %v2209_v56  ;;  %v1489_v56 = vsel %vm1425_vm11, %v5428_v41, 8  ;;  %vm1424_vm12 = vcmp.eq.f32.partialorder %v5465_v14, %v1334_v62  ;;  %vm1433_vm11 = vcmp.eq.f32.partialorder %v5379_v48, %v5886_v20 }
 0x1ef   :  { %v6015_v23 = vsel %vm1181_vm1, %v1489_v56, 2147483647  ;;  %v6031_v56 = vpop.xlane.xlu1 %1552  ;;  %v1638_v48 = vand.u32 65535, %v5545_v49 }
 0x1f0   :  { %7892 = vst [vmem:[#allocation75_spill] sm:$0xff] %v5988_v25  ;;  %v2269_v14 = vshra.s32 %v6015_v23, 16  ;;  %vm1554_vm2 = vcmp.eq.f32.partialorder %v5482_v21, %v6031_v56 }
 0x1f1   :  { %2137 = vmin.xlane.f32.xlu1 %v5956_v7  ;;  %v1340_v1 = vpop.xlane.xlu0 %1339  ;;  %v5977_v7 = vcvt.s32.f32 %v2164_v15  ;;  %v1486_v15 = vsel %vm1422_vm10, %v5428_v41, 8  ;;  %v1640_v49 = vcvt.s32.f32 %v1638_v48 }
 0x1f2   :  { %v6004_v35 = vsel %vm1181_vm1, %v1486_v15, 2147483647  ;;  %vm1426_vm14 = vcmp.eq.f32.partialorder %v5477_v33, %v1340_v1  ;;  %v1550_v33 = vcvt.s32.f32 %v1548_v31  ;;  %v7899_v1 = vld [vmem:[#allocation30_spill] sm:$0xff] }
 0x1f3   :  { %7890 = vst [vmem:[#allocation25_spill] sm:$0xff] %v5977_v7  ;;  %7896 = vst [vmem:[#allocation77_spill] sm:$0xff] %v6004_v35  ;;  %vm1429_vm3 = vcmp.eq.f32.partialorder %v7899_v1, %v5833_v51  ;;  %v1578_v51 = vand.u32 65535, %v5498_v10 }
 0x1f4   :  { %v1493_v21 = vsel %vm1429_vm3, %v5428_v41, 8 }
 0x1f5   :  { %2182 = vmin.xlane.f32.xlu1 %v5965_v52  ;;  %v5973_v36 = vpop.xlane.xlu0 %1345  ;;  %v2194_v52 = vshra.s32 %v5981_v30, 16  ;;  %v6011_v30 = vcvt.s32.f32 %v2239_v47  ;;  %v6074_v1 = vsel %vm1181_vm1, %v1493_v21, 2147483647  ;;  %v1580_v10 = vcvt.s32.f32 %v1578_v51 }
 0x1f6   :  { %v6064_v31 = vpop.xlane.xlu1 %1582  ;;  %vm1428_vm5 = vcmp.eq.f32.partialorder %v5488_v11, %v5973_v36  ;;  %v1563_v11 = vand.u32 65535, %v5565_v13  ;;  %v7900_v36 = vld [vmem:[#allocation32_spill] sm:$0xff]  ;;  %v2329_v21 = vshra.s32 %v6074_v1, 16 }
 0x1f7   :  { %7897 = vst [vmem:[#allocation78_spill] sm:$0xff] %v6011_v30  ;;  %vm1584_vm6 = vcmp.eq.f32.partialorder %v5505_v32, %v6064_v31  ;;  %vm1431_vm7 = vcmp.eq.f32.partialorder %v7900_v36, %v5860_v12  ;;  %v1608_v12 = vand.u32 65535, %v5520_v40 }
 0x1f8   :  { %v1495_v32 = vsel %vm1431_vm7, %v5428_v41, 8  ;;  %v1565_v13 = vcvt.s32.f32 %v1563_v11 }
 0x1f9   :  { %2167 = vmin.xlane.f32.xlu1 %v5977_v7  ;;  %v5985_v3 = vpop.xlane.xlu0 %1351  ;;  %v6000_v7 = vcvt.s32.f32 %v2194_v52  ;;  %v1488_v52 = vsel %vm1424_vm12, %v5428_v41, 8  ;;  %v1610_v40 = vcvt.s32.f32 %v1608_v12 }
 0x1fa   :  { %v6028_v62 = vsel %vm1181_vm1, %v1488_v52, 2147483647  ;;  %vm1430_vm9 = vcmp.eq.f32.partialorder %v5501_v37, %v5985_v3  ;;  %v1593_v37 = vand.u32 65535, %v5579_v6 }
 0x1fb   :  { %7895 = vst [vmem:[#allocation27_spill] sm:$0xff] %v6000_v7 }
 0x1fc   :  { %v1595_v6 = vcvt.s32.f32 %v1593_v37 }
 0x1fd   :  { %2212 = vmin.xlane.f32.xlu1 %v5988_v25  ;;  %v5996_v34 = vpop.xlane.xlu0 %1357  ;;  %v2224_v25 = vshra.s32 %v6004_v35, 16 }
 0x1fe   :  { %v6094_v51 = vpop.xlane.xlu1 %1612 }
 0x1ff   :  { %v6024_v24 = vcvt.s32.f32 %v2224_v25  ;;  %v2254_v25 = vshra.s32 %v6028_v62, 16  ;;  %vm1614_vm10 = vcmp.eq.f32.partialorder %v5529_v59, %v6094_v51  ;;  %v1497_v59 = vsel %vm1433_vm11, %v5428_v41, 8 }
 0x200   :  { %v1615_v3 = vsel %vm1614_vm10, %v1610_v40, inf }
 0x201   :  { %2197 = vmin.xlane.f32.xlu1 %v6000_v7  ;;  %v6008_v61 = vpop.xlane.xlu0 %1363  ;;  %v7898_v7 = vld [vmem:[#allocation29_spill] sm:$0xff] }
 0x202   :  { %vm1427_vm13 = vcmp.eq.f32.partialorder %v7898_v7, %v5805_v16  ;;  %v6040_v7 = vcvt.s32.f32 %v2269_v14  ;;  %v6055_v14 = vcvt.s32.f32 %v2254_v25  ;;  %vm1434_vm3 = vcmp.eq.f32.partialorder %v5524_v28, %v6008_v61  ;;  %v7904_v28 = vld [vmem:[#allocation36_spill] sm:$0xff] }
 0x203   :  { %v1491_v47 = vsel %vm1427_vm13, %v5428_v41, 8  ;;  %vm1432_vm13 = vcmp.eq.f32.partialorder %v5507_v8, %v5996_v34  ;;  %v1623_v8 = vand.u32 65535, %v5592_v22  ;;  %v1653_v61 = vand.u32 65535, %v7904_v28 }
 0x204   :  { %v6044_v52 = vsel %vm1181_vm1, %v1491_v47, 2147483647 }
 0x205   :  { %2242 = vmin.xlane.f32.xlu1 %v6011_v30  ;;  %v6019_v15 = vpop.xlane.xlu0 %1369  ;;  %v1505_v30 = vcvt.s32.f32 %v1503_v53  ;;  %v1490_v53 = vsel %vm1426_vm14, %v5428_v41, 8  ;;  %v2299_v47 = vshra.s32 %v6044_v52, 16  ;;  %v1625_v22 = vcvt.s32.f32 %v1623_v8 }
 0x209   :  { %2227 = vmin.xlane.f32.xlu1 %v6024_v24  ;;  %v6034_v35 = vpop.xlane.xlu0 %1507 }
 0x20a   :  { %vm1509_vm15 = vcmp.eq.f32.partialorder %v5561_v58, %v6034_v35  ;;  %v1533_v58 = vand.u32 65535, %v5553_v55 }
 0x20b   :  { %v1510_v16 = vsel %vm1509_vm15, %v1505_v30, inf  ;;  %v1555_v30 = vsel %vm1554_vm2, %v1550_v33, inf  ;;  %v6070_v33 = vcvt.s32.f32 %v2299_v47  ;;  %vm1435_vm15 = vcmp.eq.f32.partialorder %v5391_v18, %v5905_v39 }
 0x20c   :  { %1511 = vmin.xlane.f32.xlu0 %v1510_v16  ;;  %v6059_v16 = vsel %vm1181_vm1, %v1490_v53, 2147483647  ;;  %v1535_v55 = vcvt.s32.f32 %v1533_v58  ;;  %v1668_v18 = vand.u32 65535, %v5570_v54 }
 0x20d   :  { %2272 = vmin.xlane.f32.xlu1 %v6040_v7  ;;  %v6050_v57 = vpop.xlane.xlu0 %1537  ;;  %v2284_v53 = vshra.s32 %v6059_v16, 16 }
 0x20e   :  { %vm1539_vm4 = vcmp.eq.f32.partialorder %v5575_v4, %v6050_v57  ;;  %v1492_v4 = vsel %vm1428_vm5, %v5428_v41, 8  ;;  %v1670_v54 = vcvt.s32.f32 %v1668_v18  ;;  %v7911_v18 = vld [vmem:[#allocation33_spill] sm:$0xff] }
 0x20f   :  { %v1540_v25 = vsel %vm1539_vm4, %v1535_v55, inf  ;;  %v6085_v47 = vcvt.s32.f32 %v2284_v53  ;;  %v6089_v55 = vsel %vm1181_vm1, %v1492_v4, 2147483647  ;;  %v6100_v53 = vcvt.s32.f32 %v2329_v21 }
 0x210   :  { %1556 = vmin.xlane.f32.xlu0 %v1555_v30  ;;  %v1585_v30 = vsel %vm1584_vm6, %v1580_v10, inf  ;;  %v2314_v4 = vshra.s32 %v6089_v55, 16  ;;  %v6104_v10 = vsel %vm1181_vm1, %v1495_v32, 2147483647  ;;  %v6124_v32 = vpop.xlane.xlu1 %1642  ;;  %vm1437_vm7 = vcmp.eq.f32.partialorder %v7911_v18, %v5919_v26 }
 0x211   :  { %2257 = vmin.xlane.f32.xlu1 %v6055_v14  ;;  %v6079_v58 = vpop.xlane.xlu0 %1567  ;;  %vm1644_vm14 = vcmp.eq.f32.partialorder %v5555_v38, %v6124_v32  ;;  %v1499_v38 = vsel %vm1435_vm15, %v5428_v41, 8 }
 0x212   :  { %vm1569_vm8 = vcmp.eq.f32.partialorder %v5588_v43, %v6079_v58  ;;  %v1494_v43 = vsel %vm1430_vm9, %v5428_v41, 8  ;;  %v6115_v36 = vcvt.s32.f32 %v2314_v4  ;;  %v1645_v34 = vsel %vm1644_vm14, %v1640_v49, inf }
 0x213   :  { %v6119_v21 = vsel %vm1181_vm1, %v1494_v43, 2147483647 }
 0x214   :  { %1541 = vmin.xlane.f32.xlu0 %v1540_v25  ;;  %v1570_v25 = vsel %vm1569_vm8, %v1565_v13, inf  ;;  %v2344_v12 = vshra.s32 %v6119_v21, 16 }
 0x215   :  { %2302 = vmin.xlane.f32.xlu1 %v6070_v33  ;;  %v6109_v11 = vpop.xlane.xlu0 %1597 }
 0x216   :  { %vm1599_vm12 = vcmp.eq.f32.partialorder %v5604_v46, %v6109_v11  ;;  %v1496_v46 = vsel %vm1432_vm13, %v5428_v41, 8  ;;  %v6145_v43 = vcvt.s32.f32 %v2344_v12 }
 0x217   :  { %v1600_v20 = vsel %vm1599_vm12, %v1595_v6, inf  ;;  %v6149_v37 = vsel %vm1181_vm1, %v1496_v46, 2147483647  ;;  %v6164_v6 = vsel %vm1181_vm1, %v1499_v38, 2147483647  ;;  %v1655_v38 = vcvt.s32.f32 %v1653_v61  ;;  %v7916_v61 = vld [vmem:[#allocation37_spill] sm:$0xff] }
 0x218   :  { %1586 = vmin.xlane.f32.xlu0 %v1585_v30  ;;  %v2359_v30 = vshra.s32 %v6104_v10, 16  ;;  %7902 = vst [vmem:[#allocation30_spill] sm:$0xff] %v6164_v6  ;;  %v2419_v8 = vshra.s32 %v6164_v6, 16 }
 0x219   :  { %2287 = vmin.xlane.f32.xlu1 %v6085_v47  ;;  %v6139_v4 = vpop.xlane.xlu0 %1627 }
 0x21a   :  { %v6130_v13 = vcvt.s32.f32 %v2359_v30  ;;  %vm1629_vm2 = vcmp.eq.f32.partialorder %v5618_v50, %v6139_v4  ;;  %v1498_v50 = vsel %vm1434_vm3, %v5428_v41, 8 }
 0x21b   :  { %v1630_v39 = vsel %vm1629_vm2, %v1625_v22, inf }
 0x21c   :  { %1571 = vmin.xlane.f32.xlu0 %v1570_v25  ;;  %v6134_v25 = vsel %vm1181_vm1, %v1497_v59, 2147483647  ;;  %v2374_v59 = vshra.s32 %v6149_v37, 16 }
 0x21d   :  { %2332 = vmin.xlane.f32.xlu1 %v6100_v53  ;;  %v2389_v40 = vshra.s32 %v6134_v25, 16  ;;  %v6169_v48 = vpop.xlane.xlu0 %1657 }
 0x21e   :  { %7903 = vst [vmem:[#allocation32_spill] sm:$0xff] %v6169_v48  ;;  %v6177_v49 = vcvt.s32.f32 %v2374_v59 }
 0x21f   :  { %v6160_v30 = vcvt.s32.f32 %v2389_v40 }
 0x220   :  { %1616 = vmin.xlane.f32.xlu0 %v1615_v3  ;;  %v6154_v3 = vpop.xlane.xlu1 %1672 }
 0x221   :  { %2317 = vmin.xlane.f32.xlu1 %v6115_v36  ;;  %7901 = vst [vmem:[#allocation29_spill] sm:$0xff] %v6160_v30  ;;  %vm1674_vm4 = vcmp.eq.f32.partialorder %v5581_v17, %v6154_v3  ;;  %v6181_v17 = vsel %vm1181_vm1, %v1498_v50, 2147483647 }
 0x222   :  { %v1675_v46 = vsel %vm1674_vm4, %v1670_v54, inf  ;;  %7908 = vst [vmem:[#allocation79_spill] sm:$0xff] %v6181_v17  ;;  %v6192_v54 = vcvt.s32.f32 %v2419_v8  ;;  %v2404_v50 = vshra.s32 %v6181_v17, 16 }
 0x224   :  { %1601 = vmin.xlane.f32.xlu0 %v1600_v20  ;;  %v7905_v20 = vld [vmem:[#allocation34_spill] sm:$0xff]  ;;  %v6175_v12 = vpop.xlane.xlu1 %1702  ;;  %v6207_v18 = vcvt.s32.f32 %v2404_v50 }
 0x225   :  { %2362 = vmin.xlane.f32.xlu1 %v6130_v13  ;;  %vm1436_vm5 = vcmp.eq.f32.partialorder %v7905_v20, %v6019_v15  ;;  %7906 = vst [vmem:[#allocation36_spill] sm:$0xff] %v6175_v12  ;;  %7907 = vst [vmem:[#allocation34_spill] sm:$0xff] %v6177_v49  ;;  %v7910_v15 = vld [vmem:[#allocation35_spill] sm:$0xff]  ;;  %v6198_v20 = vpop.xlane.xlu0 %1687  ;;  %vm1704_vm8 = vcmp.eq.f32.partialorder %v7916_v61, %v6175_v12 }
 0x226   :  { %v1500_v40 = vsel %vm1436_vm5, %v5428_v41, 8  ;;  %v1698_v22 = vand.u32 65535, %v7910_v15  ;;  %7913 = vst [vmem:[#allocation35_spill] sm:$0xff] %v6192_v54  ;;  %7915 = vst [vmem:[#allocation80_spill] sm:$0xff] %v6198_v20 }
 0x227   :  { %v6196_v28 = vsel %vm1181_vm1, %v1500_v40, 2147483647 }
 0x228   :  { %1646 = vmin.xlane.f32.xlu0 %v1645_v34  ;;  %v7909_v34 = vld [vmem:[#allocation40_spill] sm:$0xff]  ;;  %7914 = vst [vmem:[#allocation33_spill] sm:$0xff] %v6196_v28  ;;  %v1700_v26 = vcvt.s32.f32 %v1698_v22  ;;  %v2434_v40 = vshra.s32 %v6196_v28, 16  ;;  %v7922_v22 = vld [vmem:[#allocation39_spill] sm:$0xff] }
 0x229   :  { %2347 = vmin.xlane.f32.xlu1 %v6145_v43  ;;  %vm1659_vm6 = vcmp.eq.f32.partialorder %v7909_v34, %v6169_v48  ;;  %v7917_v34 = vld [vmem:[#allocation38_spill] sm:$0xff] }
 0x22a   :  { %v1660_v59 = vsel %vm1659_vm6, %v1655_v38, inf  ;;  %v1683_v38 = vand.u32 65535, %v7917_v34  ;;  %v1705_v15 = vsel %vm1704_vm8, %v1700_v26, inf  ;;  %7919 = vst [vmem:[#allocation38_spill] sm:$0xff] %v6207_v18  ;;  %v6217_v34 = vpop.xlane.xlu0 %1717  ;;  %v6221_v26 = vcvt.s32.f32 %v2434_v40  ;;  %v7931_v40 = vld [vmem:[#allocation12_spill] sm:$0xff] }
 0x22b   :  { %vm1719_vm11 = vcmp.eq.f32.partialorder %v7931_v40, %v6217_v34 }
 0x22c   :  { %1631 = vmin.xlane.f32.xlu0 %v1630_v39  ;;  %v6190_v39 = vpop.xlane.xlu1 %1732  ;;  %v1685_v61 = vcvt.s32.f32 %v1683_v38  ;;  %7925 = vst [vmem:[#allocation82_spill] sm:$0xff] %v6221_v26 }
 0x22d   :  { %2392 = vmin.xlane.f32.xlu1 %v6160_v30  ;;  %7912 = vst [vmem:[#allocation40_spill] sm:$0xff] %v6190_v39  ;;  %v7945_v30 = vld [vmem:[#allocation13_spill] sm:$0xff] }
 0x230   :  { %1676 = vmin.xlane.f32.xlu0 %v1675_v46  ;;  %v1501_v46 = vsel %vm1437_vm7, %v5428_v41, 8  ;;  %v6205_v8 = vpop.xlane.xlu1 %1762 }
 0x231   :  { %2377 = vmin.xlane.f32.xlu1 %v6177_v49  ;;  %7918 = vst [vmem:[#allocation37_spill] sm:$0xff] %v6205_v8  ;;  %v6211_v17 = vsel %vm1181_vm1, %v1501_v46, 2147483647  ;;  %v7926_v46 = vld [vmem:[#allocation41_spill] sm:$0xff]  ;;  %v6232_v49 = vpop.xlane.xlu0 %1747 }
 0x232   :  { %7920 = vst [vmem:[#allocation81_spill] sm:$0xff] %v6211_v17  ;;  %v2449_v28 = vshra.s32 %v6211_v17, 16  ;;  %vm1734_vm10 = vcmp.eq.f32.partialorder %v7926_v46, %v6190_v39  ;;  %7930 = vst [vmem:[#allocation83_spill] sm:$0xff] %v6232_v49  ;;  %v7936_v17 = vld [vmem:[#allocation46_spill] sm:$0xff] }
 0x234   :  { %1661 = vmin.xlane.f32.xlu0 %v1660_v59  ;;  %v7921_v59 = vld [vmem:[#allocation43_spill] sm:$0xff]  ;;  %v6219_v12 = vpop.xlane.xlu1 %1792 }
 0x235   :  { %2422 = vmin.xlane.f32.xlu1 %v6192_v54  ;;  %vm1689_vm9 = vcmp.eq.f32.partialorder %v7921_v59, %v6198_v20  ;;  %v1728_v54 = vand.u32 65535, %v7922_v22  ;;  %7923 = vst [vmem:[#allocation43_spill] sm:$0xff] %v6217_v34  ;;  %7924 = vst [vmem:[#allocation39_spill] sm:$0xff] %v6219_v12  ;;  %v7927_v59 = vld [vmem:[#allocation42_spill] sm:$0xff]  ;;  %v6230_v20 = vcvt.s32.f32 %v2449_v28  ;;  %v7935_v28 = vld [vmem:[#allocation45_spill] sm:$0xff] }
 0x236   :  { %v1690_v50 = vsel %vm1689_vm9, %v1685_v61, inf  ;;  %v1713_v38 = vand.u32 65535, %v7927_v59  ;;  %v6240_v59 = vpop.xlane.xlu0 %1777  ;;  %vm1764_vm12 = vcmp.eq.f32.partialorder %v7935_v28, %v6205_v8  ;;  %v7943_v8 = vld [vmem:[#allocation49_spill] sm:$0xff] }
 0x237   :  { %7929 = vst [vmem:[#allocation42_spill] sm:$0xff] %v6230_v20 }
 0x238   :  { %1706 = vmin.xlane.f32.xlu0 %v1705_v15  ;;  %v1730_v15 = vcvt.s32.f32 %v1728_v54  ;;  %v1715_v61 = vcvt.s32.f32 %v1713_v38  ;;  %v7938_v38 = vld [vmem:[#allocation14_spill] sm:$0xff] }
 0x239   :  { %2407 = vmin.xlane.f32.xlu1 %v6207_v18  ;;  %v6228_v18 = vpop.xlane.xlu1 %1822  ;;  %vm1749_vm13 = vcmp.eq.f32.partialorder %v7938_v38, %v6232_v49 }
 0x23a   :  { %7928 = vst [vmem:[#allocation41_spill] sm:$0xff] %v6228_v18  ;;  %v1735_v22 = vsel %vm1734_vm10, %v1730_v15, inf  ;;  %v1720_v54 = vsel %vm1719_vm11, %v1715_v61, inf  ;;  %v6247_v34 = vpop.xlane.xlu0 %1807  ;;  %v7939_v61 = vld [vmem:[#allocation47_spill] sm:$0xff] }
 0x23c   :  { %1691 = vmin.xlane.f32.xlu0 %v1690_v50  ;;  %v7932_v50 = vld [vmem:[#allocation44_spill] sm:$0xff] }
 0x23d   :  { %2437 = vmin.xlane.f32.xlu1 %v6221_v26  ;;  %v1758_v46 = vand.u32 65535, %v7932_v50  ;;  %7934 = vst [vmem:[#allocation44_spill] sm:$0xff] %v6240_v59 }
 0x23e   :  { %v6238_v26 = vpop.xlane.xlu1 %1852 }
 0x23f   :  { %7933 = vst [vmem:[#allocation12_spill] sm:$0xff] %v6238_v26  ;;  %v1760_v15 = vcvt.s32.f32 %v1758_v46 }
 0x240   :  { %1736 = vmin.xlane.f32.xlu0 %v1735_v22  ;;  %v1743_v22 = vand.u32 65535, %v7936_v17  ;;  %v7942_v17 = vld [vmem:[#allocation48_spill] sm:$0xff] }
 0x241   :  { %2452 = vmin.xlane.f32.xlu1 %v6230_v20  ;;  %v1765_v40 = vsel %vm1764_vm12, %v1760_v15, inf  ;;  %v1788_v20 = vand.u32 65535, %v7939_v61  ;;  %vm1794_vm14 = vcmp.eq.f32.partialorder %v7942_v17, %v6219_v12  ;;  %v7947_v17 = vld [vmem:[#allocation50_spill] sm:$0xff] }
 0x242   :  { %v1745_v50 = vcvt.s32.f32 %v1743_v22  ;;  %v6255_v46 = vpop.xlane.xlu0 %1837  ;;  %v7944_v22 = vld [vmem:[#allocation55_spill] sm:$0xff] }
 0x243   :  { %7941 = vst [vmem:[#allocation14_spill] sm:$0xff] %v6255_v46  ;;  %v1790_v15 = vcvt.s32.f32 %v1788_v20  ;;  %v1968_v49 = vand.u32 65535, %v7944_v22  ;;  %v1998_v22 = vand.u32 65535, %v5803_v0 }
 0x244   :  { %1721 = vmin.xlane.f32.xlu0 %v1720_v54  ;;  %v1938_v54 = vand.u32 65535, %v5764_v9  ;;  %v1750_v28 = vsel %vm1749_vm13, %v1745_v50, inf }
 0x245   :  { %v1795_v61 = vsel %vm1794_vm14, %v1790_v15, inf }
 0x246   :  { %v6245_v39 = vpop.xlane.xlu1 %1882  ;;  %v1940_v38 = vcvt.s32.f32 %v1938_v54  ;;  %v1970_v54 = vcvt.s32.f32 %v1968_v49  ;;  %v2000_v49 = vcvt.s32.f32 %v1998_v22  ;;  %v2058_v22 = vand.u32 65535, %v5843_v42  ;;  %v7956_v42 = vld [vmem:[#allocation63_spill] sm:$0xff] }
 0x247   :  { %7937 = vst [vmem:[#allocation45_spill] sm:$0xff] %v6245_v39 }
 0x248   :  { %1766 = vmin.xlane.f32.xlu0 %v1765_v40  ;;  %v1773_v40 = vand.u32 65535, %v7943_v8  ;;  %v1818_v8 = vand.u32 65535, %v7947_v17 }
 0x24a   :  { %v6252_v48 = vpop.xlane.xlu1 %1912  ;;  %v6265_v9 = vpop.xlane.xlu0 %1867  ;;  %v1775_v20 = vcvt.s32.f32 %v1773_v40 }
 0x24b   :  { %7940 = vst [vmem:[#allocation46_spill] sm:$0xff] %v6252_v48 }
 0x24c   :  { %1751 = vmin.xlane.f32.xlu0 %v1750_v28  ;;  %v7946_v28 = vld [vmem:[#allocation17_spill] sm:$0xff] }
 0x24d   :  { %vm1779_vm2 = vcmp.eq.f32.partialorder %v7946_v28, %v6240_v59  ;;  %v7950_v59 = vld [vmem:[#allocation31_spill] sm:$0xff] }
 0x24e   :  { %v6260_v6 = vpop.xlane.xlu1 %1942  ;;  %v1780_v15 = vsel %vm1779_vm2, %v1775_v20, inf  ;;  %v6278_v28 = vpop.xlane.xlu0 %1897  ;;  %v2028_v0 = vand.u32 65535, %v7950_v59 }
 0x24f   :  { %vm1944_vm15 = vcmp.eq.f32.partialorder %v7945_v30, %v6260_v6 }
 0x250   :  { %1796 = vmin.xlane.f32.xlu0 %v1795_v61  ;;  %v1945_v50 = vsel %vm1944_vm15, %v1940_v38, inf  ;;  %v7948_v38 = vld [vmem:[#allocation19_spill] sm:$0xff]  ;;  %v1820_v61 = vcvt.s32.f32 %v1818_v8 }
 0x251   :  { %1946 = vmin.xlane.f32.xlu1 %v1945_v50  ;;  %vm1824_vm4 = vcmp.eq.f32.partialorder %v7948_v38, %v6228_v18  ;;  %v7949_v50 = vld [vmem:[#allocation51_spill] sm:$0xff] }
 0x252   :  { %v6270_v12 = vpop.xlane.xlu1 %1972  ;;  %v1803_v40 = vand.u32 65535, %v7949_v50  ;;  %v1825_v20 = vsel %vm1824_vm4, %v1820_v61, inf  ;;  %v2030_v50 = vcvt.s32.f32 %v2028_v0  ;;  %v6293_v59 = vpop.xlane.xlu0 %1927  ;;  %v7953_v61 = vld [vmem:[#allocation8_spill] sm:$0xff]  ;;  %v2060_v0 = vcvt.s32.f32 %v2058_v22 }
 0x253   :  { %vm1974_vm3 = vcmp.eq.f32.partialorder %v5818_v45, %v6270_v12  ;;  %vm1854_vm8 = vcmp.eq.f32.partialorder %v7953_v61, %v6238_v26  ;;  %v7960_v61 = vld [vmem:[#allocation65_spill] sm:$0xff] }
 0x254   :  { %1781 = vmin.xlane.f32.xlu0 %v1780_v15  ;;  %v1975_v30 = vsel %vm1974_vm3, %v1970_v54, inf  ;;  %v7951_v54 = vld [vmem:[#allocation21_spill] sm:$0xff]  ;;  %v1805_v8 = vcvt.s32.f32 %v1803_v40  ;;  %v7952_v15 = vld [vmem:[#allocation52_spill] sm:$0xff]  ;;  %vm3295_vm3 = vcmask 7168  }
 0x255   :  { %1976 = vmin.xlane.f32.xlu1 %v1975_v30  ;;  %vm1809_vm6 = vcmp.eq.f32.partialorder %v7951_v54, %v6247_v34  ;;  %v1848_v30 = vand.u32 65535, %v7952_v15  ;;  %v7958_v15 = vld [vmem:[#allocation54_spill] sm:$0xff] }
 0x256   :  { %v6280_v17 = vpop.xlane.xlu1 %2002  ;;  %v1810_v18 = vsel %vm1809_vm6, %v1805_v8, inf  ;;  %v7957_v8 = vld [vmem:[#allocation9_spill] sm:$0xff] }
 0x257   :  { %vm2004_vm5 = vcmp.eq.f32.partialorder %v5837_v63, %v6280_v17  ;;  %v1850_v40 = vcvt.s32.f32 %v1848_v30  ;;  %vm1839_vm10 = vcmp.eq.f32.partialorder %v7957_v8, %v6255_v46  ;;  %v7964_v8 = vld [vmem:[#allocation68_spill] sm:$0xff] }
 0x258   :  { %1826 = vmin.xlane.f32.xlu0 %v1825_v20  ;;  %v2005_v45 = vsel %vm2004_vm5, %v2000_v49, inf  ;;  %v7954_v49 = vld [vmem:[#allocation53_spill] sm:$0xff] }
 0x259   :  { %2006 = vmin.xlane.f32.xlu1 %v2005_v45  ;;  %v1833_v20 = vand.u32 65535, %v7954_v49  ;;  %v1855_v54 = vsel %vm1854_vm8, %v1850_v40, inf  ;;  %v2088_v49 = vand.u32 65535, %v7960_v61  ;;  %v7961_v40 = vld [vmem:[#allocation10_spill] sm:$0xff] }
 0x25a   :  { %v6288_v38 = vpop.xlane.xlu1 %2032  ;;  %vm1884_vm11 = vcmp.eq.f32.partialorder %v7961_v40, %v6245_v39 }
 0x25b   :  { %vm2034_vm7 = vcmp.eq.f32.partialorder %v5855_v5, %v6288_v38 }
 0x25c   :  { %1811 = vmin.xlane.f32.xlu0 %v1810_v18  ;;  %v2035_v63 = vsel %vm2034_vm7, %v2030_v50, inf  ;;  %v1835_v18 = vcvt.s32.f32 %v1833_v20  ;;  %v1878_v50 = vand.u32 65535, %v7958_v15 }
 0x25d   :  { %2036 = vmin.xlane.f32.xlu1 %v2035_v63  ;;  %v6305_v63 = vpop.xlane.xlu0 %1957 }
 0x25e   :  { %v6298_v45 = vpop.xlane.xlu1 %2062  ;;  %v1840_v22 = vsel %vm1839_vm10, %v1835_v18, inf  ;;  %v7965_v18 = vld [vmem:[#allocation28_spill] sm:$0xff] }
 0x25f   :  { %7955 = vst [vmem:[#allocation47_spill] sm:$0xff] %v6298_v45  ;;  %vm2064_vm9 = vcmp.eq.f32.partialorder %v7956_v42, %v6298_v45  ;;  %vm1869_vm13 = vcmp.eq.f32.partialorder %v7965_v18, %v6265_v9 }
 0x260   :  { %1856 = vmin.xlane.f32.xlu0 %v1855_v54  ;;  %v2065_v5 = vsel %vm2064_vm9, %v2060_v0, inf  ;;  %v1880_v54 = vcvt.s32.f32 %v1878_v50  ;;  %v7962_v0 = vld [vmem:[#allocation26_spill] sm:$0xff] }
 0x261   :  { %2066 = vmin.xlane.f32.xlu1 %v2065_v5  ;;  %v1863_v42 = vand.u32 65535, %v7962_v0  ;;  %v2090_v5 = vcvt.s32.f32 %v2088_v49  ;;  %v6317_v15 = vpop.xlane.xlu0 %1987  ;;  %v7967_v0 = vld [vmem:[#allocation69_spill] sm:$0xff] }
 0x262   :  { %v6307_v30 = vpop.xlane.xlu1 %2047  ;;  %v1885_v20 = vsel %vm1884_vm11, %v1880_v54, inf  ;;  %v2118_v39 = vand.u32 65535, %v7967_v0  ;;  %v7968_v54 = vld [vmem:[#allocation11_spill] sm:$0xff]  ;;  %v7971_v0 = vld [vmem:[#allocation58_spill] sm:$0xff] }
 0x263   :  { %7959 = vst [vmem:[#allocation48_spill] sm:$0xff] %v6307_v30  ;;  %v1865_v61 = vcvt.s32.f32 %v1863_v42  ;;  %vm1914_vm14 = vcmp.eq.f32.partialorder %v7968_v54, %v6252_v48  ;;  %v1529_v42 = vcvt.f32.s32 %v5933_v44 }
 0x264   :  { %1841 = vmin.xlane.f32.xlu0 %v1840_v22  ;;  %v7966_v22 = vld [vmem:[#allocation24_spill] sm:$0xff] }
 0x265   :  { %v1908_v50 = vand.u32 65535, %v7966_v22  ;;  %v1870_v49 = vsel %vm1869_vm13, %v1865_v61, inf  ;;  %v7970_v22 = vld [vmem:[#allocation57_spill] sm:$0xff]  ;;  %v1530_v48 = vshll.u32 %v1529_v42, 16 }
 0x266   :  { %v6313_v45 = vpop.xlane.xlu1 %2092  ;;  %vm1899_vm2 = vcmp.eq.f32.partialorder %v7970_v22, %v6278_v28 }
 0x267   :  { %7963 = vst [vmem:[#allocation49_spill] sm:$0xff] %v6313_v45  ;;  %vm2094_vm12 = vcmp.eq.f32.partialorder %v7964_v8, %v6313_v45  ;;  %v1910_v8 = vcvt.s32.f32 %v1908_v50  ;;  %v7969_v45 = vld [vmem:[#allocation56_spill] sm:$0xff] }
 0x268   :  { %1886 = vmin.xlane.f32.xlu0 %v1885_v20  ;;  %v2095_v46 = vsel %vm2094_vm12, %v2090_v5, inf  ;;  %v1893_v20 = vand.u32 65535, %v7969_v45  ;;  %v6328_v5 = vpop.xlane.xlu0 %2017  ;;  %v1923_v45 = vand.u32 65535, %v7971_v0 }
 0x269   :  { %2096 = vmin.xlane.f32.xlu1 %v2095_v46  ;;  %v2120_v46 = vcvt.s32.f32 %v2118_v39  ;;  %v1915_v18 = vsel %vm1914_vm14, %v1910_v8, inf  ;;  %v2148_v39 = vand.u32 65535, %v5927_v2 }
 0x26a   :  { %v6322_v40 = vpop.xlane.xlu1 %2077  ;;  %v1895_v50 = vcvt.s32.f32 %v1893_v20 }
 0x26b   :  { %v2150_v0 = vcvt.s32.f32 %v2148_v39 }
 0x26c   :  { %1871 = vmin.xlane.f32.xlu0 %v1870_v49  ;;  %v1900_v8 = vsel %vm1899_vm2, %v1895_v50, inf }
 0x26e   :  { %v6330_v26 = vpop.xlane.xlu1 %2122 }
 0x26f   :  { %vm2124_vm15 = vcmp.eq.f32.partialorder %v5923_v29, %v6330_v26  ;;  %v7972_v29 = vld [vmem:[#allocation15_spill] sm:$0xff] }
 0x270   :  { %1916 = vmin.xlane.f32.xlu0 %v1915_v18  ;;  %v2125_v61 = vsel %vm2124_vm15, %v2120_v46, inf  ;;  %vm1929_vm4 = vcmp.eq.f32.partialorder %v7972_v29, %v6293_v59  ;;  %v1925_v18 = vcvt.s32.f32 %v1923_v45  ;;  %v7975_v45 = vld [vmem:[#allocation61_spill] sm:$0xff]  ;;  %v7977_v29 = vld [vmem:[#allocation16_spill] sm:$0xff] }
 0x271   :  { %2126 = vmin.xlane.f32.xlu1 %v2125_v61  ;;  %v7973_v61 = vld [vmem:[#allocation59_spill] sm:$0xff]  ;;  %vm1989_vm7 = vcmp.eq.f32.partialorder %v7977_v29, %v6317_v15 }
 0x272   :  { %v6338_v49 = vpop.xlane.xlu1 %2107  ;;  %v1527_v54 = vpop.xlane.xlu0 %1526  ;;  %v1953_v20 = vand.u32 65535, %v7973_v61  ;;  %v1930_v2 = vsel %vm1929_vm4, %v1925_v18, inf }
 0x273   :  { %v1528_v44 = vcvt.f32.s32 %v1527_v54  ;;  %v1983_v54 = vand.u32 65535, %v7975_v45  ;;  %v7981_v45 = vld [vmem:[#allocation64_spill] sm:$0xff] }
 0x274   :  { %1901 = vmin.xlane.f32.xlu0 %v1900_v8  ;;  %v1955_v50 = vcvt.s32.f32 %v1953_v20  ;;  %v7980_v20 = vld [vmem:[#allocation73_spill] sm:$0xff]  ;;  %vm2019_vm9 = vcmp.eq.f32.partialorder %v7981_v45, %v6328_v5 }
 0x275   :  { %v6343_v46 = vadd.s32 %v1530_v48, %v1528_v44  ;;  %v7974_v48 = vld [vmem:[#allocation60_spill] sm:$0xff]  ;;  %v2178_v44 = vand.u32 65535, %v5950_v60  ;;  %v1985_v18 = vcvt.s32.f32 %v1983_v54  ;;  %v2208_v54 = vand.u32 65535, %v5969_v19 }
 0x276   :  { %v6346_v22 = vpop.xlane.xlu1 %2152  ;;  %vm1959_vm6 = vcmp.eq.f32.partialorder %v7974_v48, %v6305_v63 }
 0x277   :  { %3297 = vst.msk [vmem:[%s7656_s4 + $0x8] sm:$0xff] %vm3295_vm3, %v6343_v46  ;;  %vm2154_vm5 = vcmp.eq.f32.partialorder %v5946_v27, %v6346_v22  ;;  %v1960_v8 = vsel %vm1959_vm6, %v1955_v50, inf  ;;  %v7978_v27 = vld [vmem:[#allocation62_spill] sm:$0xff]  ;;  %v1990_v48 = vsel %vm1989_vm7, %v1985_v18, inf  ;;  %vm2463_vm4 = vcmp.eq.s32.totalorder %v5428_v41, %v6343_v46 }
 0x278   :  { %1931 = vmin.xlane.f32.xlu0 %v1930_v2  ;;  %v2155_v42 = vsel %vm2154_vm5, %v2150_v0, inf  ;;  %v2013_v61 = vand.u32 65535, %v7978_v27  ;;  %v2180_v2 = vcvt.s32.f32 %v2178_v44  ;;  %v7982_v50 = vld [vmem:[#allocation66_spill] sm:$0xff]  ;;  %v2298_v46 = vand.u32 65535, %v6044_v52 }
 0x279   :  { %2156 = vmin.xlane.f32.xlu1 %v2155_v42  ;;  %v7983_v44 = vld [vmem:[#allocation18_spill] sm:$0xff] }
 0x27a   :  { %v6358_v39 = vpop.xlane.xlu1 %2137  ;;  %v2015_v60 = vcvt.s32.f32 %v2013_v61  ;;  %vm2049_vm10 = vcmp.eq.f32.partialorder %v7983_v44, %v6307_v30  ;;  %v7986_v61 = vld [vmem:[#allocation75_spill] sm:$0xff] }
 0x27b   :  { %7976 = vst [vmem:[#allocation55_spill] sm:$0xff] %v6358_v39 }
 0x27c   :  { %1961 = vmin.xlane.f32.xlu0 %v1960_v8  ;;  %v2043_v8 = vand.u32 65535, %v7982_v50  ;;  %v2020_v27 = vsel %vm2019_vm9, %v2015_v60, inf  ;;  %v7987_v50 = vld [vmem:[#allocation20_spill] sm:$0xff]  ;;  %v7988_v60 = vld [vmem:[#allocation70_spill] sm:$0xff] }
 0x27d   :  { %vm2079_vm12 = vcmp.eq.f32.partialorder %v7987_v50, %v6322_v40 }
 0x27e   :  { %v6364_v0 = vpop.xlane.xlu1 %2182  ;;  %v2045_v18 = vcvt.s32.f32 %v2043_v8  ;;  %v7989_v8 = vld [vmem:[#allocation76_spill] sm:$0xff] }
 0x27f   :  { %7979 = vst [vmem:[#allocation13_spill] sm:$0xff] %v6364_v0  ;;  %vm2184_vm8 = vcmp.eq.f32.partialorder %v7980_v20, %v6364_v0  ;;  %v7984_v20 = vld [vmem:[#allocation67_spill] sm:$0xff]  ;;  %v2210_v0 = vcvt.s32.f32 %v2208_v54  ;;  %v7990_v54 = vld [vmem:[#allocation22_spill] sm:$0xff] }
 0x280   :  { %1991 = vmin.xlane.f32.xlu0 %v1990_v48  ;;  %v2185_v42 = vsel %vm2184_vm8, %v2180_v2, inf  ;;  %v2073_v48 = vand.u32 65535, %v7984_v20  ;;  %v2050_v45 = vsel %vm2049_vm10, %v2045_v18, inf  ;;  %v2238_v20 = vand.u32 65535, %v7989_v8 }
 0x281   :  { %2186 = vmin.xlane.f32.xlu1 %v2185_v42  ;;  %vm2109_vm13 = vcmp.eq.f32.partialorder %v7990_v54, %v6338_v49  ;;  %v1514_v54 = vcvt.f32.s32 %v6034_v35 }
 0x282   :  { %v6371_v29 = vpop.xlane.xlu1 %2167  ;;  %v2075_v19 = vcvt.s32.f32 %v2073_v48  ;;  %v7993_v48 = vld [vmem:[#allocation78_spill] sm:$0xff] }
 0x284   :  { %2021 = vmin.xlane.f32.xlu0 %v2020_v27  ;;  %v2103_v27 = vand.u32 65535, %v7988_v60  ;;  %v2080_v30 = vsel %vm2079_vm12, %v2075_v19, inf  ;;  %v7994_v60 = vld [vmem:[#allocation23_spill] sm:$0xff]  ;;  %v7995_v19 = vld [vmem:[#allocation72_spill] sm:$0xff] }
 0x285   :  { %vm2139_vm15 = vcmp.eq.f32.partialorder %v7994_v60, %v6358_v39  ;;  %v2163_v8 = vand.u32 65535, %v7995_v19  ;;  %v1515_v39 = vshll.u32 %v1514_v54, 16  ;;  %v4607_v54 = vmov 0.0  }
 0x286   :  { %v6377_v2 = vpop.xlane.xlu1 %2212  ;;  %v2105_v18 = vcvt.s32.f32 %v2103_v27  ;;  %v2268_v27 = vand.u32 65535, %v6015_v23 }
 0x287   :  { %7985 = vst [vmem:[#allocation17_spill] sm:$0xff] %v6377_v2  ;;  %vm2214_vm11 = vcmp.eq.f32.partialorder %v7986_v61, %v6377_v2  ;;  %v7991_v61 = vld [vmem:[#allocation71_spill] sm:$0xff]  ;;  %v2240_v2 = vcvt.s32.f32 %v2238_v20 }
 0x288   :  { %2051 = vmin.xlane.f32.xlu0 %v2050_v45  ;;  %v2215_v42 = vsel %vm2214_vm11, %v2210_v0, inf  ;;  %v2133_v45 = vand.u32 65535, %v7991_v61  ;;  %v2110_v50 = vsel %vm2109_vm13, %v2105_v18, inf  ;;  %v7996_v18 = vld [vmem:[#allocation25_spill] sm:$0xff]  ;;  %v2270_v60 = vcvt.s32.f32 %v2268_v27 }
 0x289   :  { %2216 = vmin.xlane.f32.xlu1 %v2215_v42  ;;  %vm2169_vm2 = vcmp.eq.f32.partialorder %v7996_v18, %v6371_v29  ;;  %v7999_v18 = vld [vmem:[#allocation77_spill] sm:$0xff] }
 0x28a   :  { %v6384_v44 = vpop.xlane.xlu1 %2197 }
 0x28c   :  { %2081 = vmin.xlane.f32.xlu0 %v2080_v30  ;;  %v2135_v30 = vcvt.s32.f32 %v2133_v45 }
 0x28e   :  { %v6390_v0 = vpop.xlane.xlu1 %2242  ;;  %v2140_v20 = vsel %vm2139_vm15, %v2135_v30, inf }
 0x28f   :  { %7992 = vst [vmem:[#allocation50_spill] sm:$0xff] %v6390_v0  ;;  %vm2244_vm14 = vcmp.eq.f32.partialorder %v7993_v48, %v6390_v0  ;;  %v2165_v48 = vcvt.s32.f32 %v2163_v8 }
 0x290   :  { %2111 = vmin.xlane.f32.xlu0 %v2110_v50  ;;  %v2245_v42 = vsel %vm2244_vm14, %v2240_v2, inf  ;;  %v1559_v2 = vcvt.f32.s32 %v6031_v56  ;;  %v7998_v56 = vld [vmem:[#allocation27_spill] sm:$0xff] }
 0x291   :  { %2246 = vmin.xlane.f32.xlu1 %v2245_v42  ;;  %v7997_v42 = vld [vmem:[#allocation74_spill] sm:$0xff]  ;;  %v2170_v35 = vsel %vm2169_vm2, %v2165_v48, inf  ;;  %vm2199_vm6 = vcmp.eq.f32.partialorder %v7998_v56, %v6384_v44  ;;  %v2253_v56 = vand.u32 65535, %v6028_v62 }
 0x292   :  { %v6399_v61 = vpop.xlane.xlu1 %2227  ;;  %v2193_v45 = vand.u32 65535, %v7997_v42  ;;  %v1560_v48 = vshll.u32 %v1559_v2, 16  ;;  %v1544_v42 = vcvt.f32.s32 %v6050_v57 }
 0x293   :  { %vm2229_vm8 = vcmp.eq.f32.partialorder %v6024_v24, %v6399_v61 }
 0x294   :  { %2141 = vmin.xlane.f32.xlu0 %v2140_v20  ;;  %v2195_v27 = vcvt.s32.f32 %v2193_v45  ;;  %v4043_v20 = vsel %vm2463_vm4, 1.0, %v4607_v54 }
 0x295   :  { %v1512_v50 = vpop.xlane.xlu0 %1511  ;;  %v3755_v57 = vsel %vm1181_vm1, %v4043_v20, 0.0 }
 0x296   :  { %v1513_v19 = vcvt.f32.s32 %v1512_v50  ;;  %v6405_v0 = vpop.xlane.xlu1 %2272  ;;  %v2223_v50 = vand.u32 65535, %v7999_v18 }
 0x297   :  { %vm2274_vm5 = vcmp.eq.f32.partialorder %v6040_v7, %v6405_v0 }
 0x298   :  { %2171 = vmin.xlane.f32.xlu0 %v2170_v35  ;;  %v2275_v23 = vsel %vm2274_vm5, %v2270_v60, inf  ;;  %v1516_v30 = vadd.s32 %v1515_v39, %v1513_v19  ;;  %v2200_v39 = vsel %vm2199_vm6, %v2195_v27, inf }
 0x299   :  { %2276 = vmin.xlane.f32.xlu1 %v2275_v23  ;;  %v1557_v8 = vpop.xlane.xlu0 %1556  ;;  %v2225_v23 = vcvt.s32.f32 %v2223_v50 }
 0x29a   :  { %v1558_v7 = vcvt.f32.s32 %v1557_v8  ;;  %v6417_v35 = vpop.xlane.xlu1 %2257  ;;  %vm2462_vm7 = vcmp.eq.s32.totalorder %v5428_v41, %v1516_v30  ;;  %3296 = vst.msk [vmem:[%s7656_s4] sm:$0xff] %vm3295_vm3, %v1516_v30  ;;  %v1589_v30 = vcvt.f32.s32 %v6064_v31  ;;  %v1545_v8 = vshll.u32 %v1544_v42, 16 }
 0x29b   :  { %v4042_v60 = vsel %vm2462_vm7, 1.0, %v4607_v54  ;;  %v2230_v24 = vsel %vm2229_vm8, %v2225_v23, inf  ;;  %vm2259_vm10 = vcmp.eq.f32.partialorder %v6055_v14, %v6417_v35  ;;  %v2255_v31 = vcvt.s32.f32 %v2253_v56 }
 0x29c   :  { %v1561_v45 = vadd.s32 %v1560_v48, %v1558_v7  ;;  %2201 = vmin.xlane.f32.xlu0 %v2200_v39  ;;  %4400 = vmatprep.mubr.msk.f32.mxu1 %vm1181_vm1, %v4042_v60  ;;  %v3754_v52 = vsel %vm1181_vm1, %v4042_v60, 0.0  ;;  %v2300_v48 = vcvt.s32.f32 %v2298_v46  ;;  %v2283_v42 = vand.u32 65535, %v6059_v16 }
 0x29d   :  { %v3756_v2 = vadd.f32 %v3755_v57, %v3754_v52  ;;  %v1542_v19 = vpop.xlane.xlu0 %1541  ;;  %4401 = vmatmul.mubr.msk.f32.vlgmr.msra.gmra.mxu1 %vm1181_vm1, %v4043_v20  ;;  %v2328_v7 = vand.u32 65535, %v6074_v1  ;;  %v1590_v46 = vshll.u32 %v1589_v30, 16  ;;  %v1574_v39 = vcvt.f32.s32 %v6079_v58 }
 0x29e   :  { %3299 = vst.msk [vmem:[%s7656_s4 + $0x18] sm:$0xff] %vm3295_vm3, %v1561_v45  ;;  %v1543_v27 = vcvt.f32.s32 %v1542_v19  ;;  %v6437_v18 = vpop.xlane.xlu1 %2302  ;;  %vm2465_vm11 = vcmp.eq.s32.totalorder %v5428_v41, %v1561_v45  ;;  %v2260_v14 = vsel %vm2259_vm10, %v2255_v31, inf  ;;  %v2285_v19 = vcvt.s32.f32 %v2283_v42 }
 0x29f   :  { %vm2304_vm9 = vcmp.eq.f32.partialorder %v6070_v33, %v6437_v18  ;;  %v4045_v16 = vsel %vm2465_vm11, 1.0, %v4607_v54  ;;  %v2330_v23 = vcvt.s32.f32 %v2328_v7  ;;  %v2313_v56 = vand.u32 65535, %v6089_v55 }
 0x2a0   :  { %v1546_v20 = vadd.s32 %v1545_v8, %v1543_v27  ;;  %2231 = vmin.xlane.f32.xlu0 %v2230_v24  ;;  %v2305_v50 = vsel %vm2304_vm9, %v2300_v48, inf  ;;  %v1619_v30 = vcvt.f32.s32 %v6094_v51  ;;  %v1575_v8 = vshll.u32 %v1574_v39, 16 }
 0x2a1   :  { %2306 = vmin.xlane.f32.xlu1 %v2305_v50  ;;  %v1587_v62 = vpop.xlane.xlu0 %1586  ;;  %v3759_v48 = vsel %vm1181_vm1, %v4045_v16, 0.0  ;;  %v2315_v50 = vcvt.s32.f32 %v2313_v56  ;;  %v1604_v42 = vcvt.f32.s32 %v6109_v11  ;;  %v1634_v56 = vcvt.f32.s32 %v6139_v4 }
 0x2a2   :  { %3298 = vst.msk [vmem:[%s7656_s4 + $0x10] sm:$0xff] %vm3295_vm3, %v1546_v20  ;;  %v1588_v33 = vcvt.f32.s32 %v1587_v62  ;;  %v6451_v60 = vpop.xlane.xlu1 %2287  ;;  %vm2464_vm12 = vcmp.eq.s32.totalorder %v5428_v41, %v1546_v20  ;;  %v2358_v62 = vand.u32 65535, %v6104_v10  ;;  %v1620_v31 = vshll.u32 %v1619_v30, 16 }
 0x2a3   :  { %v4044_v45 = vsel %vm2464_vm12, 1.0, %v4607_v54  ;;  %vm2289_vm13 = vcmp.eq.f32.partialorder %v6085_v47, %v6451_v60 }
 0x2a4   :  { %v1591_v52 = vadd.s32 %v1590_v46, %v1588_v33  ;;  %2261 = vmin.xlane.f32.xlu0 %v2260_v14  ;;  %4403 = vmatprep.mubr.msk.f32.mxu1 %vm1181_vm1, %v4044_v45  ;;  %v3757_v1 = vsel %vm1181_vm1, %v4044_v45, 0.0  ;;  %v2290_v24 = vsel %vm2289_vm13, %v2285_v19, inf  ;;  %v2343_v14 = vand.u32 65535, %v6119_v21 }
 0x2a5   :  { %v3758_v58 = vadd.f32 %v3757_v1, %v3756_v2  ;;  %v1572_v57 = vpop.xlane.xlu0 %1571  ;;  %4404 = vmatmul.mubr.msk.f32.gmra.mxu1 %vm1181_vm1, %v4045_v16  ;;  %v1649_v45 = vcvt.f32.s32 %v6124_v32  ;;  %v1605_v16 = vshll.u32 %v1604_v42, 16  ;;  %v2360_v1 = vcvt.s32.f32 %v2358_v62  ;;  %v8000_v62 = vld [vmem:[#allocation29_spill] sm:$0xff] }
 0x2a6   :  { %3301 = vst.msk [vmem:[%s7656_s4 + $0x28] sm:$0xff] %vm3295_vm3, %v1591_v52  ;;  %v1573_v27 = vcvt.f32.s32 %v1572_v57  ;;  %v6468_v47 = vpop.xlane.xlu1 %2332  ;;  %vm2467_vm15 = vcmp.eq.s32.totalorder %v5428_v41, %v1591_v52  ;;  %v2345_v21 = vcvt.s32.f32 %v2343_v14  ;;  %v2388_v32 = vand.u32 65535, %v6134_v25 }
 0x2a7   :  { %v6470_v2 = vadd.f32 %v3759_v48, %v3758_v58  ;;  %vm2334_vm14 = vcmp.eq.f32.partialorder %v6100_v53, %v6468_v47  ;;  %v6492_v39 = vsel %vm2467_vm15, 1.0, %v4607_v54 }
 0x2a8   :  { %v1576_v55 = vadd.s32 %v1575_v8, %v1573_v27  ;;  %2291 = vmin.xlane.f32.xlu0 %v2290_v24  ;;  %v2335_v51 = vsel %vm2334_vm14, %v2330_v23, inf  ;;  %v1650_v23 = vshll.u32 %v1649_v45, 16  ;;  %v2373_v24 = vand.u32 65535, %v6149_v37 }
 0x2a9   :  { %2336 = vmin.xlane.f32.xlu1 %v2335_v51  ;;  %v1617_v20 = vpop.xlane.xlu0 %1616  ;;  %v1635_v51 = vshll.u32 %v1634_v56, 16  ;;  %v8005_v56 = vld [vmem:[#allocation36_spill] sm:$0xff] }
 0x2aa   :  { %3300 = vst.msk [vmem:[%s7656_s4 + $0x20] sm:$0xff] %vm3295_vm3, %v1576_v55  ;;  %v1618_v7 = vcvt.f32.s32 %v1617_v20  ;;  %v6481_v53 = vpop.xlane.xlu1 %2317  ;;  %vm2466_vm2 = vcmp.eq.s32.totalorder %v5428_v41, %v1576_v55  ;;  %v1679_v55 = vcvt.f32.s32 %v6154_v3  ;;  %v2375_v37 = vcvt.s32.f32 %v2373_v24  ;;  %v8001_v3 = vld [vmem:[#allocation30_spill] sm:$0xff] }
 0x2ab   :  { %v6485_v46 = vsel %vm2466_vm2, 1.0, %v4607_v54  ;;  %vm2319_vm4 = vcmp.eq.f32.partialorder %v6115_v36, %v6481_v53 }
 0x2ac   :  { %v1621_v10 = vadd.s32 %v1620_v31, %v1618_v7  ;;  %4406 = vmatprep.mubr.msk.f32.mxu1 %vm1181_vm1, %v6485_v46  ;;  %v2320_v11 = vsel %vm2319_vm4, %v2315_v50, inf  ;;  %v2390_v50 = vcvt.s32.f32 %v2388_v32  ;;  %v8004_v32 = vld [vmem:[#allocation79_spill] sm:$0xff] }
 0x2ad   :  { %2321 = vmin.xlane.f32.xlu0 %v2320_v11  ;;  %v1602_v33 = vpop.xlane.xlu0 %1601  ;;  %4407 = vmatmul.mubr.msk.f32.gmra.mxu1 %vm1181_vm1, %v6492_v39  ;;  %v1680_v11 = vshll.u32 %v1679_v55, 16  ;;  %v8006_v55 = vld [vmem:[#allocation35_spill] sm:$0xff] }
 0x2ae   :  { %3303 = vst.msk [vmem:[%s7656_s4 + $0x38] sm:$0xff] %vm3295_vm3, %v1621_v10  ;;  %v1603_v36 = vcvt.f32.s32 %v1602_v33  ;;  %v6502_v52 = vpop.xlane.xlu1 %2362  ;;  %vm2469_vm6 = vcmp.eq.s32.totalorder %v5428_v41, %v1621_v10  ;;  %v2418_v10 = vand.u32 65535, %v8001_v3  ;;  %v8002_v33 = vld [vmem:[#allocation32_spill] sm:$0xff] }
 0x2af   :  { %vm2364_vm5 = vcmp.eq.f32.partialorder %v6130_v13, %v6502_v52  ;;  %v6524_v27 = vsel %vm2469_vm6, 1.0, %v4607_v54  ;;  %v1664_v14 = vcvt.f32.s32 %v8002_v33  ;;  %v8008_v3 = vld [vmem:[#allocation80_spill] sm:$0xff] }
 0x2b0   :  { %v1606_v58 = vadd.s32 %v1605_v16, %v1603_v36  ;;  %v2365_v57 = vsel %vm2364_vm5, %v2360_v1, inf  ;;  %v8003_v1 = vld [vmem:[#allocation34_spill] sm:$0xff]  ;;  %v2420_v24 = vcvt.s32.f32 %v2418_v10 }
 0x2b1   :  { %2366 = vmin.xlane.f32.xlu1 %v2365_v57  ;;  %v1647_v19 = vpop.xlane.xlu0 %1646 }
 0x2b2   :  { %3302 = vst.msk [vmem:[%s7656_s4 + $0x30] sm:$0xff] %vm3295_vm3, %v1606_v58  ;;  %v1648_v30 = vcvt.f32.s32 %v1647_v19  ;;  %v6513_v8 = vpop.xlane.xlu1 %2347  ;;  %vm2468_vm7 = vcmp.eq.s32.totalorder %v5428_v41, %v1606_v58 }
 0x2b3   :  { %v6517_v13 = vsel %vm2468_vm7, 1.0, %v4607_v54  ;;  %vm2349_vm8 = vcmp.eq.f32.partialorder %v6145_v43, %v6513_v8 }
 0x2b4   :  { %v1651_v25 = vadd.s32 %v1650_v23, %v1648_v30  ;;  %4409 = vmatprep.mubr.msk.f32.mxu1 %vm1181_vm1, %v6517_v13  ;;  %v2350_v4 = vsel %vm2349_vm8, %v2345_v21, inf  ;;  %v2403_v23 = vand.u32 65535, %v8004_v32  ;;  %v1709_v30 = vcvt.f32.s32 %v8005_v56  ;;  %v8011_v56 = vld [vmem:[#allocation81_spill] sm:$0xff] }
 0x2b5   :  { %2351 = vmin.xlane.f32.xlu0 %v2350_v4  ;;  %v1632_v48 = vpop.xlane.xlu0 %1631  ;;  %4410 = vmatmul.mubr.msk.f32.gmra.mxu1 %vm1181_vm1, %v6524_v27 }
 0x2b6   :  { %3305 = vst.msk [vmem:[%s7656_s4 + $0x48] sm:$0xff] %vm3295_vm3, %v1651_v25  ;;  %v1633_v43 = vcvt.f32.s32 %v1632_v48  ;;  %v6534_v20 = vpop.xlane.xlu1 %2392  ;;  %vm2471_vm10 = vcmp.eq.s32.totalorder %v5428_v41, %v1651_v25  ;;  %v1665_v25 = vshll.u32 %v1664_v14, 16 }
 0x2b7   :  { %vm2394_vm9 = vcmp.eq.f32.partialorder %v8000_v62, %v6534_v20  ;;  %v6556_v19 = vsel %vm2471_vm10, 1.0, %v4607_v54 }
 0x2b8   :  { %v1636_v31 = vadd.s32 %v1635_v51, %v1633_v43  ;;  %v2395_v42 = vsel %vm2394_vm9, %v2390_v50, inf  ;;  %v3761_v51 = vsel %vm1181_vm1, %v6485_v46, 0.0 }
 0x2b9   :  { %2396 = vmin.xlane.f32.xlu1 %v2395_v42  ;;  %v1677_v7 = vpop.xlane.xlu0 %1676  ;;  %v8007_v42 = vld [vmem:[#allocation33_spill] sm:$0xff]  ;;  %v3762_v46 = vadd.f32 %v3761_v51, %v6470_v2 }
 0x2ba   :  { %3304 = vst.msk [vmem:[%s7656_s4 + $0x40] sm:$0xff] %vm3295_vm3, %v1636_v31  ;;  %v1678_v45 = vcvt.f32.s32 %v1677_v7  ;;  %v6545_v16 = vpop.xlane.xlu1 %2377  ;;  %vm2470_vm11 = vcmp.eq.s32.totalorder %v5428_v41, %v1636_v31  ;;  %v2405_v31 = vcvt.s32.f32 %v2403_v23  ;;  %v2433_v7 = vand.u32 65535, %v8007_v42 }
 0x2bb   :  { %v6549_v36 = vsel %vm2470_vm11, 1.0, %v4607_v54  ;;  %vm2379_vm12 = vcmp.eq.f32.partialorder %v8003_v1, %v6545_v16 }
 0x2bc   :  { %v1681_v58 = vadd.s32 %v1680_v11, %v1678_v45  ;;  %4412 = vmatprep.mubr.msk.f32.mxu1 %vm1181_vm1, %v6549_v36  ;;  %v2380_v57 = vsel %vm2379_vm12, %v2375_v37, inf  ;;  %v1710_v37 = vshll.u32 %v1709_v30, 16  ;;  %v1694_v11 = vcvt.f32.s32 %v8008_v3  ;;  %v8009_v45 = vld [vmem:[#allocation38_spill] sm:$0xff] }
 0x2bd   :  { %2381 = vmin.xlane.f32.xlu0 %v2380_v57  ;;  %v1662_v21 = vpop.xlane.xlu0 %1661  ;;  %4413 = vmatmul.mubr.msk.f32.gmra.mxu1 %vm1181_vm1, %v6556_v19  ;;  %v2435_v2 = vcvt.s32.f32 %v2433_v7  ;;  %v2448_v30 = vand.u32 65535, %v8011_v56 }
 0x2be   :  { %3307 = vst.msk [vmem:[%s7656_s4 + $0x58] sm:$0xff] %vm3295_vm3, %v1681_v58  ;;  %v1663_v4 = vcvt.f32.s32 %v1662_v21  ;;  %v6566_v48 = vpop.xlane.xlu1 %2422  ;;  %vm2473_vm14 = vcmp.eq.s32.totalorder %v5428_v41, %v1681_v58  ;;  %v8010_v21 = vld [vmem:[#allocation40_spill] sm:$0xff] }
 0x2bf   :  { %vm2424_vm13 = vcmp.eq.f32.partialorder %v8006_v55, %v6566_v48  ;;  %v6588_v57 = vsel %vm2473_vm14, 1.0, %v4607_v54  ;;  %v1739_v32 = vcvt.f32.s32 %v8010_v21  ;;  %v2450_v7 = vcvt.s32.f32 %v2448_v30 }
 0x2c0   :  { %v1666_v43 = vadd.s32 %v1665_v25, %v1663_v4  ;;  %v2425_v50 = vsel %vm2424_vm13, %v2420_v24, inf  ;;  %v1695_v25 = vshll.u32 %v1694_v11, 16  ;;  %v3763_v4 = vsel %vm1181_vm1, %v6492_v39, 0.0 }
 0x2c1   :  { %2426 = vmin.xlane.f32.xlu1 %v2425_v50  ;;  %v1707_v62 = vpop.xlane.xlu0 %1706  ;;  %v3765_v24 = vsel %vm1181_vm1, %v6517_v13, 0.0  ;;  %v8012_v50 = vld [vmem:[#allocation82_spill] sm:$0xff]  ;;  %v1740_v13 = vshll.u32 %v1739_v32, 16  ;;  %vm76_vm14 = vcmask 57344  }
 0x2c2   :  { %3306 = vst.msk [vmem:[%s7656_s4 + $0x50] sm:$0xff] %vm3295_vm3, %v1666_v43  ;;  %v1708_v10 = vcvt.f32.s32 %v1707_v62  ;;  %v6579_v33 = vpop.xlane.xlu1 %2407  ;;  %vm2472_vm15 = vcmp.eq.s32.totalorder %v5428_v41, %v1666_v43  ;;  %v3764_v43 = vadd.f32 %v3763_v4, %v3762_v46  ;;  %v3767_v46 = vsel %vm1181_vm1, %v6524_v27, 0.0 }
 0x2c3   :  { %v4052_v14 = vsel %vm2472_vm15, 1.0, %v4607_v54  ;;  %vm2409_vm2 = vcmp.eq.f32.partialorder %v8009_v45, %v6579_v33  ;;  %77 = vst.msk [vmem:[#allocation4] sm:$0x1] %vm76_vm14, %v4607_v54 }
 0x2c4   :  { %v1711_v1 = vadd.s32 %v1710_v37, %v1708_v10  ;;  %4415 = vmatprep.mubr.msk.f32.mxu1 %vm1181_vm1, %v4052_v14  ;;  %v2410_v58 = vsel %vm2409_vm2, %v2405_v31, inf  ;;  %v3766_v42 = vadd.f32 %v3765_v24, %v3764_v43  ;;  %v8013_v37 = vld [vmem:[#allocation43_spill] sm:$0xff] }
 0x2c5   :  { %2411 = vmin.xlane.f32.xlu0 %v2410_v58  ;;  %v1692_v23 = vpop.xlane.xlu0 %1691  ;;  %4416 = vmatmul.mubr.msk.f32.gmra.mxu1 %vm1181_vm1, %v6588_v57  ;;  %v1724_v3 = vcvt.f32.s32 %v8013_v37  ;;  %v3769_v58 = vsel %vm1181_vm1, %v6549_v36, 0.0  ;;  %v8016_v43 = vld [vmem:[#allocation83_spill] sm:$0xff] }
 0x2c6   :  { %3309 = vst.msk [vmem:[%s7656_s4 + $0x68] sm:$0xff] %vm3295_vm3, %v1711_v1  ;;  %v1693_v55 = vcvt.f32.s32 %v1692_v23  ;;  %v6602_v51 = vpop.xlane.xlu1 %2437  ;;  %vm2475_vm5 = vcmp.eq.s32.totalorder %v5428_v41, %v1711_v1  ;;  %v8014_v1 = vld [vmem:[#allocation42_spill] sm:$0xff]  ;;  %v3768_v30 = vadd.f32 %v3767_v46, %v3766_v42  ;;  %v3773_v42 = vsel %vm1181_vm1, %v4052_v14, 0.0  ;;  %v8017_v46 = vld [vmem:[#allocation39_spill] sm:$0xff] }
 0x2c7   :  { %vm2439_vm4 = vcmp.eq.f32.partialorder %v8012_v50, %v6602_v51  ;;  %v4055_v23 = vsel %vm2475_vm5, 1.0, %v4607_v54  ;;  %v1725_v27 = vshll.u32 %v1724_v3, 16  ;;  %v1754_v50 = vcvt.f32.s32 %v8016_v43 }
 0x2c8   :  { %v1696_v62 = vadd.s32 %v1695_v25, %v1693_v55  ;;  %v2440_v31 = vsel %vm2439_vm4, %v2435_v2, inf  ;;  %v8015_v2 = vld [vmem:[#allocation37_spill] sm:$0xff]  ;;  %v3770_v4 = vadd.f32 %v3769_v58, %v3768_v30  ;;  %v1949_v58 = vcvt.f32.s32 %v6260_v6  ;;  %v8018_v30 = vld [vmem:[#allocation44_spill] sm:$0xff] }
 0x2c9   :  { %2441 = vmin.xlane.f32.xlu0 %v2440_v31  ;;  %v1737_v39 = vpop.xlane.xlu0 %1736  ;;  %v1769_v56 = vcvt.f32.s32 %v8015_v2  ;;  %v3771_v31 = vsel %vm1181_vm1, %v6556_v19, 0.0  ;;  %v1755_v14 = vshll.u32 %v1754_v50, 16 }
 0x2ca   :  { %3308 = vst.msk [vmem:[%s7656_s4 + $0x60] sm:$0xff] %vm3295_vm3, %v1696_v62  ;;  %v1738_v11 = vcvt.f32.s32 %v1737_v39  ;;  %v6612_v10 = vpop.xlane.xlu1 %2452  ;;  %vm2474_vm6 = vcmp.eq.s32.totalorder %v5428_v41, %v1696_v62  ;;  %v1950_v6 = vshll.u32 %v1949_v58, 16 }
 0x2cb   :  { %v4054_v45 = vsel %vm2474_vm6, 1.0, %v4607_v54  ;;  %vm2454_vm7 = vcmp.eq.f32.partialorder %v8014_v1, %v6612_v10  ;;  %v1770_v55 = vshll.u32 %v1769_v56, 16  ;;  %v1799_v1 = vcvt.f32.s32 %v8017_v46 }
 0x2cc   :  { %v1741_v21 = vadd.s32 %v1740_v13, %v1738_v11  ;;  %4418 = vmatprep.mubr.msk.f32.mxu1 %vm1181_vm1, %v4054_v45  ;;  %v2455_v32 = vsel %vm2454_vm7, %v2450_v7, inf  ;;  %v3772_v7 = vadd.f32 %v3771_v31, %v3770_v4  ;;  %v3777_v2 = vsel %vm1181_vm1, %v4054_v45, 0.0 }
 0x2cd   :  { %2456 = vmin.xlane.f32.xlu1 %v2455_v32  ;;  %v1722_v25 = vpop.xlane.xlu0 %1721  ;;  %4419 = vmatmul.mubr.msk.f32.gmra.mxu1 %vm1181_vm1, %v4055_v23  ;;  %v3775_v32 = vsel %vm1181_vm1, %v6588_v57, 0.0  ;;  %v1800_v4 = vshll.u32 %v1799_v1, 16  ;;  %v1979_v57 = vcvt.f32.s32 %v6270_v12  ;;  %v3779_v12 = vsel %vm1181_vm1, %v4055_v23, 0.0 }
 0x2ce   :  { %3311 = vst.msk [vmem:[%s7656_s4 + $0x78] sm:$0xff] %vm3295_vm3, %v1741_v21  ;;  %v1723_v36 = vcvt.f32.s32 %v1722_v25  ;;  %vm2477_vm8 = vcmp.eq.s32.totalorder %v5428_v41, %v1741_v21  ;;  %v3774_v11 = vadd.f32 %v3773_v42, %v3772_v7  ;;  %v1784_v25 = vcvt.f32.s32 %v8018_v30 }
 0x2cf   :  { %v4057_v3 = vsel %vm2477_vm8, 1.0, %v4607_v54  ;;  %v1980_v58 = vshll.u32 %v1979_v57, 16  ;;  %v1814_v30 = vcvt.f32.s32 %v6247_v34 }
 0x2d0   :  { %v1726_v24 = vadd.s32 %v1725_v27, %v1723_v36  ;;  %v3776_v27 = vadd.f32 %v3775_v32, %v3774_v11  ;;  %v1785_v42 = vshll.u32 %v1784_v25, 16 }
 0x2d1   :  { %v1767_v62 = vpop.xlane.xlu0 %1766 }
 0x2d2   :  { %3310 = vst.msk [vmem:[%s7656_s4 + $0x70] sm:$0xff] %vm3295_vm3, %v1726_v24  ;;  %v1768_v39 = vcvt.f32.s32 %v1767_v62  ;;  %vm2476_vm9 = vcmp.eq.s32.totalorder %v5428_v41, %v1726_v24  ;;  %v3778_v45 = vadd.f32 %v3777_v2, %v3776_v27 }
 0x2d3   :  { %v4056_v13 = vsel %vm2476_vm9, 1.0, %v4607_v54 }
 0x2d4   :  { %v1771_v37 = vadd.s32 %v1770_v55, %v1768_v39  ;;  %4421 = vmatprep.mubr.msk.f32.mxu1 %vm1181_vm1, %v4056_v13  ;;  %v8019_v39 = vld [vmem:[#allocation41_spill] sm:$0xff] }
 0x2d5   :  { %v1752_v19 = vpop.xlane.xlu0 %1751  ;;  %4422 = vmatmul.mubr.msk.f32.gmra.mxu1 %vm1181_vm1, %v4057_v3  ;;  %v1829_v7 = vcvt.f32.s32 %v8019_v39  ;;  %v1815_v39 = vshll.u32 %v1814_v30, 16 }
 0x2d6   :  { %3313 = vst.msk [vmem:[%s7656_s4 + $0x88] sm:$0xff] %vm3295_vm3, %v1771_v37  ;;  %v1753_v21 = vcvt.f32.s32 %v1752_v19  ;;  %vm2479_vm10 = vcmp.eq.s32.totalorder %v5428_v41, %v1771_v37  ;;  %v2009_v19 = vcvt.f32.s32 %v6280_v17 }
 0x2d7   :  { %v4059_v31 = vsel %vm2479_vm10, 1.0, %v4607_v54  ;;  %v1830_v23 = vshll.u32 %v1829_v7, 16 }
 0x2d8   :  { %v1756_v56 = vadd.s32 %v1755_v14, %v1753_v21  ;;  %v3781_v14 = vsel %vm1181_vm1, %v4056_v13, 0.0  ;;  %v3780_v21 = vadd.f32 %v3779_v12, %v3778_v45  ;;  %v2010_v25 = vshll.u32 %v2009_v19, 16  ;;  %v8021_v19 = vld [vmem:[#allocation47_spill] sm:$0xff] }
 0x2d9   :  { %v1797_v36 = vpop.xlane.xlu0 %1796  ;;  %v2069_v12 = vcvt.f32.s32 %v8021_v19 }
 0x2da   :  { %3312 = vst.msk [vmem:[%s7656_s4 + $0x80] sm:$0xff] %vm3295_vm3, %v1756_v56  ;;  %v1798_v24 = vcvt.f32.s32 %v1797_v36  ;;  %v1947_v55 = vpop.xlane.xlu1 %1946  ;;  %vm2478_vm11 = vcmp.eq.s32.totalorder %v5428_v41, %v1756_v56  ;;  %v3782_v2 = vadd.f32 %v3781_v14, %v3780_v21  ;;  %v8022_v21 = vld [vmem:[#allocation14_spill] sm:$0xff] }
 0x2db   :  { %v1948_v43 = vcvt.f32.s32 %v1947_v55  ;;  %v4058_v50 = vsel %vm2478_vm11, 1.0, %v4607_v54 }
 0x2dc   :  { %v1801_v62 = vadd.s32 %v1800_v4, %v1798_v24  ;;  %4424 = vmatprep.mubr.msk.f32.mxu1 %vm1181_vm1, %v4058_v50  ;;  %v2039_v4 = vcvt.f32.s32 %v6288_v38  ;;  %v3785_v55 = vsel %vm1181_vm1, %v4058_v50, 0.0  ;;  %v8020_v38 = vld [vmem:[#allocation12_spill] sm:$0xff] }
 0x2dd   :  { %v6665_v37 = vadd.s32 %v1950_v6, %v1948_v43  ;;  %v1782_v11 = vpop.xlane.xlu0 %1781  ;;  %4425 = vmatmul.mubr.msk.f32.gmra.mxu1 %vm1181_vm1, %v4059_v31  ;;  %v3783_v6 = vsel %vm1181_vm1, %v4057_v3, 0.0  ;;  %v1859_v43 = vcvt.f32.s32 %v8020_v38 }
 0x2de   :  { %3315 = vst.msk [vmem:[%s7656_s4 + $0x98] sm:$0xff] %vm3295_vm3, %v1801_v62  ;;  %v1783_v46 = vcvt.f32.s32 %v1782_v11  ;;  %v1977_v1 = vpop.xlane.xlu1 %1976  ;;  %vm2481_vm12 = vcmp.eq.s32.totalorder %v5428_v41, %v1801_v62  ;;  %v3784_v3 = vadd.f32 %v3783_v6, %v3782_v2  ;;  %v2040_v11 = vshll.u32 %v2039_v4, 16 }
 0x2df   :  { %3325 = vst.msk [vmem:[%s7656_s4 + $0xe8] sm:$0xff] %vm3295_vm3, %v6665_v37  ;;  %v1978_v17 = vcvt.f32.s32 %v1977_v1  ;;  %v4061_v45 = vsel %vm2481_vm12, 1.0, %v4607_v54  ;;  %v3787_v2 = vsel %vm1181_vm1, %v4059_v31, 0.0  ;;  %vm2491_vm10 = vcmp.eq.s32.totalorder %v5428_v41, %v6665_v37 }
 0x2e0   :  { %v1786_v32 = vadd.s32 %v1785_v42, %v1783_v46  ;;  %v3786_v14 = vadd.f32 %v3785_v55, %v3784_v3 }
 0x2e1   :  { %v6680_v13 = vadd.s32 %v1980_v58, %v1978_v17  ;;  %v1827_v56 = vpop.xlane.xlu0 %1826  ;;  %v1860_v58 = vshll.u32 %v1859_v43, 16  ;;  %v1844_v17 = vcvt.f32.s32 %v8022_v21  ;;  %v8023_v43 = vld [vmem:[#allocation45_spill] sm:$0xff] }
 0x2e2   :  { %3314 = vst.msk [vmem:[%s7656_s4 + $0x90] sm:$0xff] %vm3295_vm3, %v1786_v32  ;;  %v1828_v27 = vcvt.f32.s32 %v1827_v56  ;;  %v2007_v36 = vpop.xlane.xlu1 %2006  ;;  %vm2480_vm13 = vcmp.eq.s32.totalorder %v5428_v41, %v1786_v32  ;;  %v1889_v3 = vcvt.f32.s32 %v8023_v43 }
 0x2e3   :  { %3327 = vst.msk [vmem:[%s7656_s4 + $0xf8] sm:$0xff] %vm3295_vm3, %v6680_v13  ;;  %v2008_v34 = vcvt.f32.s32 %v2007_v36  ;;  %v4060_v24 = vsel %vm2480_vm13, 1.0, %v4607_v54  ;;  %v3788_v36 = vadd.f32 %v3787_v2, %v3786_v14  ;;  %v1845_v38 = vshll.u32 %v1844_v17, 16 }
 0x2e4   :  { %v1831_v57 = vadd.s32 %v1830_v23, %v1828_v27  ;;  %4427 = vmatprep.mubr.msk.f32.mxu1 %vm1181_vm1, %v4060_v24  ;;  %v3789_v56 = vsel %vm1181_vm1, %v4060_v24, 0.0  ;;  %v2070_v27 = vshll.u32 %v2069_v12, 16  ;;  %vm2493_vm12 = vcmp.eq.s32.totalorder %v5428_v41, %v6680_v13 }
 0x2e5   :  { %v6701_v62 = vadd.s32 %v2010_v25, %v2008_v34  ;;  %v1812_v42 = vpop.xlane.xlu0 %1811  ;;  %4428 = vmatmul.mubr.msk.f32.gmra.mxu1 %vm1181_vm1, %v4061_v45  ;;  %v3790_v24 = vadd.f32 %v3789_v56, %v3788_v36 }
 0x2e6   :  { %3317 = vst.msk [vmem:[%s7656_s4 + $0xa8] sm:$0xff] %vm3295_vm3, %v1831_v57  ;;  %v1813_v50 = vcvt.f32.s32 %v1812_v42  ;;  %v2037_v7 = vpop.xlane.xlu1 %2036  ;;  %vm2483_vm15 = vcmp.eq.s32.totalorder %v5428_v41, %v1831_v57 }
 0x2e7   :  { %3329 = vst.msk [vmem:[%s7656_s4 + $0x108] sm:$0xff] %vm3295_vm3, %v6701_v62  ;;  %v2038_v46 = vcvt.f32.s32 %v2037_v7  ;;  %v4063_v34 = vsel %vm2483_vm15, 1.0, %v4607_v54  ;;  %v3791_v7 = vsel %vm1181_vm1, %v4061_v45, 0.0  ;;  %vm2495_vm15 = vcmp.eq.s32.totalorder %v5428_v41, %v6701_v62 }
 0x2e8   :  { %v1816_v1 = vadd.s32 %v1815_v39, %v1813_v50  ;;  %v8024_v39 = vld [vmem:[#allocation49_spill] sm:$0xff]  ;;  %v3792_v12 = vadd.f32 %v3791_v7, %v3790_v24 }
 0x2e9   :  { %v6717_v32 = vadd.s32 %v2040_v11, %v2038_v46  ;;  %v1857_v23 = vpop.xlane.xlu0 %1856  ;;  %v2099_v50 = vcvt.f32.s32 %v8024_v39  ;;  %v1890_v46 = vshll.u32 %v1889_v3, 16  ;;  %v1904_v39 = vcvt.f32.s32 %v6278_v28 }
 0x2ea   :  { %3316 = vst.msk [vmem:[%s7656_s4 + $0xa0] sm:$0xff] %vm3295_vm3, %v1816_v1  ;;  %v1858_v30 = vcvt.f32.s32 %v1857_v23  ;;  %v2067_v25 = vpop.xlane.xlu1 %2066  ;;  %vm2482_vm2 = vcmp.eq.s32.totalorder %v5428_v41, %v1816_v1  ;;  %v1874_v1 = vcvt.f32.s32 %v6265_v9  ;;  %v8025_v9 = vld [vmem:[#allocation46_spill] sm:$0xff] }
 0x2eb   :  { %3331 = vst.msk [vmem:[%s7656_s4 + $0x118] sm:$0xff] %vm3295_vm3, %v6717_v32  ;;  %v2068_v31 = vcvt.f32.s32 %v2067_v25  ;;  %v4062_v4 = vsel %vm2482_vm2, 1.0, %v4607_v54  ;;  %v2100_v45 = vshll.u32 %v2099_v50, 16  ;;  %v1919_v25 = vcvt.f32.s32 %v8025_v9 }
 0x2ec   :  { %v1861_v6 = vadd.s32 %v1860_v58, %v1858_v30  ;;  %4430 = vmatprep.mubr.msk.f32.mxu1 %vm1181_vm1, %v4062_v4  ;;  %v3793_v11 = vsel %vm1181_vm1, %v4062_v4, 0.0  ;;  %v3795_v4 = vsel %vm1181_vm1, %v4063_v34, 0.0  ;;  %v1964_v9 = vcvt.f32.s32 %v6305_v63 }
 0x2ed   :  { %v6735_v55 = vadd.s32 %v2070_v27, %v2068_v31  ;;  %v1842_v57 = vpop.xlane.xlu0 %1841  ;;  %4431 = vmatmul.mubr.msk.f32.gmra.mxu1 %vm1181_vm1, %v4063_v34  ;;  %v3794_v17 = vadd.f32 %v3793_v11, %v3792_v12  ;;  %v1875_v31 = vshll.u32 %v1874_v1, 16  ;;  %v1934_v1 = vcvt.f32.s32 %v6293_v59 }
 0x2ee   :  { %3319 = vst.msk [vmem:[%s7656_s4 + $0xb8] sm:$0xff] %vm3295_vm3, %v1861_v6  ;;  %v1843_v42 = vcvt.f32.s32 %v1842_v57  ;;  %vm2485_vm4 = vcmp.eq.s32.totalorder %v5428_v41, %v1861_v6  ;;  %v2129_v57 = vcvt.f32.s32 %v6330_v26 }
 0x2ef   :  { %3333 = vst.msk [vmem:[%s7656_s4 + $0x128] sm:$0xff] %vm3295_vm3, %v6735_v55  ;;  %v4065_v30 = vsel %vm2485_vm4, 1.0, %v4607_v54  ;;  %vm2497_vm4 = vcmp.eq.s32.totalorder %v5428_v41, %v6717_v32 }
 0x2f0   :  { %v1846_v19 = vadd.s32 %v1845_v38, %v1843_v42  ;;  %v3796_v38 = vadd.f32 %v3795_v4, %v3794_v17  ;;  %v1920_v42 = vshll.u32 %v1919_v25, 16  ;;  %v2130_v7 = vshll.u32 %v2129_v57, 16 }
 0x2f1   :  { %v1887_v14 = vpop.xlane.xlu0 %1886  ;;  %v3799_v12 = vsel %vm1181_vm1, %v4065_v30, 0.0  ;;  %v1905_v17 = vshll.u32 %v1904_v39, 16 }
 0x2f2   :  { %3318 = vst.msk [vmem:[%s7656_s4 + $0xb0] sm:$0xff] %vm3295_vm3, %v1846_v19  ;;  %v1888_v58 = vcvt.f32.s32 %v1887_v14  ;;  %v2097_v21 = vpop.xlane.xlu1 %2096  ;;  %vm2484_vm5 = vcmp.eq.s32.totalorder %v5428_v41, %v1846_v19 }
 0x2f3   :  { %v2098_v23 = vcvt.f32.s32 %v2097_v21  ;;  %v4064_v2 = vsel %vm2484_vm5, 1.0, %v4607_v54 }
 0x2f4   :  { %v1891_v56 = vadd.s32 %v1890_v46, %v1888_v58  ;;  %4433 = vmatprep.mubr.msk.f32.mxu1 %vm1181_vm1, %v4064_v2  ;;  %v3797_v6 = vsel %vm1181_vm1, %v4064_v2, 0.0 }
 0x2f5   :  { %v6762_v27 = vadd.s32 %v2100_v45, %v2098_v23  ;;  %v1872_v36 = vpop.xlane.xlu0 %1871  ;;  %4434 = vmatmul.mubr.msk.f32.gmra.mxu1 %vm1181_vm1, %v4065_v30  ;;  %v3798_v3 = vadd.f32 %v3797_v6, %v3796_v38  ;;  %v2159_v23 = vcvt.f32.s32 %v6346_v22  ;;  %v1935_v30 = vshll.u32 %v1934_v1, 16 }
 0x2f6   :  { %3321 = vst.msk [vmem:[%s7656_s4 + $0xc8] sm:$0xff] %vm3295_vm3, %v1891_v56  ;;  %v1873_v24 = vcvt.f32.s32 %v1872_v36  ;;  %vm2487_vm6 = vcmp.eq.s32.totalorder %v5428_v41, %v1891_v56  ;;  %v2024_v1 = vcvt.f32.s32 %v6328_v5 }
 0x2f7   :  { %3335 = vst.msk [vmem:[%s7656_s4 + $0x138] sm:$0xff] %vm3295_vm3, %v6762_v27  ;;  %v4067_v46 = vsel %vm2487_vm6, 1.0, %v4607_v54  ;;  %v3800_v58 = vadd.f32 %v3799_v12, %v3798_v3  ;;  %v2160_v25 = vshll.u32 %v2159_v23, 16  ;;  %v1965_v3 = vshll.u32 %v1964_v9, 16 }
 0x2f8   :  { %v1876_v43 = vadd.s32 %v1875_v31, %v1873_v24  ;;  %v3803_v36 = vsel %vm1181_vm1, %v4067_v46, 0.0  ;;  %v4071_v12 = vsel %vm2491_vm10, 1.0, %v4607_v54  ;;  %vm2499_vm6 = vcmp.eq.s32.totalorder %v5428_v41, %v6735_v55 }
 0x2f9   :  { %v1917_v34 = vpop.xlane.xlu0 %1916 }
 0x2fa   :  { %3320 = vst.msk [vmem:[%s7656_s4 + $0xc0] sm:$0xff] %vm3295_vm3, %v1876_v43  ;;  %v1918_v26 = vcvt.f32.s32 %v1917_v34  ;;  %v2127_v50 = vpop.xlane.xlu1 %2126  ;;  %vm2486_vm7 = vcmp.eq.s32.totalorder %v5428_v41, %v1876_v43  ;;  %v1994_v34 = vcvt.f32.s32 %v6317_v15 }
 0x2fb   :  { %v2128_v11 = vcvt.f32.s32 %v2127_v50  ;;  %v4066_v19 = vsel %vm2486_vm7, 1.0, %v4607_v54  ;;  %v8026_v50 = vld [vmem:[#allocation13_spill] sm:$0xff] }
 0x2fc   :  { %v1921_v14 = vadd.s32 %v1920_v42, %v1918_v26  ;;  %4436 = vmatprep.mubr.msk.f32.mxu1 %vm1181_vm1, %v4066_v19  ;;  %v3801_v28 = vsel %vm1181_vm1, %v4066_v19, 0.0 }
 0x2fd   :  { %v6790_v21 = vadd.s32 %v2130_v7, %v2128_v11  ;;  %v1902_v45 = vpop.xlane.xlu0 %1901  ;;  %4437 = vmatmul.mubr.msk.f32.gmra.mxu1 %vm1181_vm1, %v4067_v46  ;;  %v3802_v59 = vadd.f32 %v3801_v28, %v3800_v58  ;;  %v2189_v7 = vcvt.f32.s32 %v8026_v50  ;;  %v1995_v46 = vshll.u32 %v1994_v34, 16 }
 0x2fe   :  { %3323 = vst.msk [vmem:[%s7656_s4 + $0xd8] sm:$0xff] %vm3295_vm3, %v1921_v14  ;;  %v1903_v2 = vcvt.f32.s32 %v1902_v45  ;;  %vm2489_vm8 = vcmp.eq.s32.totalorder %v5428_v41, %v1921_v14  ;;  %v4075_v34 = vsel %vm2495_vm15, 1.0, %v4607_v54 }
 0x2ff   :  { %3337 = vst.msk [vmem:[%s7656_s4 + $0x148] sm:$0xff] %vm3295_vm3, %v6790_v21  ;;  %v3804_v6 = vadd.f32 %v3803_v36, %v3802_v59  ;;  %v4069_v38 = vsel %vm2489_vm8, 1.0, %v4607_v54  ;;  %v8027_v36 = vld [vmem:[#allocation48_spill] sm:$0xff]  ;;  %vm2501_vm8 = vcmp.eq.s32.totalorder %v5428_v41, %v6762_v27  ;;  %vm2503_vm10 = vcmp.eq.s32.totalorder %v5428_v41, %v6790_v21 }
 0x300   :  { %v1906_v56 = vadd.s32 %v1905_v17, %v1903_v2  ;;  %v3807_v19 = vsel %vm1181_vm1, %v4069_v38, 0.0  ;;  %v2190_v17 = vshll.u32 %v2189_v7, 16  ;;  %v3811_v2 = vsel %vm1181_vm1, %v4071_v12, 0.0 }
 0x301   :  { %v1932_v22 = vpop.xlane.xlu0 %1931  ;;  %v2084_v7 = vcvt.f32.s32 %v6322_v40 }
 0x302   :  { %3322 = vst.msk [vmem:[%s7656_s4 + $0xd0] sm:$0xff] %vm3295_vm3, %v1906_v56  ;;  %v1933_v31 = vcvt.f32.s32 %v1932_v22  ;;  %v2157_v4 = vpop.xlane.xlu1 %2156  ;;  %vm2488_vm9 = vcmp.eq.s32.totalorder %v5428_v41, %v1906_v56 }
 0x303   :  { %v2158_v24 = vcvt.f32.s32 %v2157_v4  ;;  %v4068_v57 = vsel %vm2488_vm9, 1.0, %v4607_v54 }
 0x304   :  { %v1936_v63 = vadd.s32 %v1935_v30, %v1933_v31  ;;  %4439 = vmatprep.mubr.msk.f32.mxu1 %vm1181_vm1, %v4068_v57  ;;  %v3805_v43 = vsel %vm1181_vm1, %v4068_v57, 0.0  ;;  %v4073_v30 = vsel %vm2493_vm12, 1.0, %v4607_v54  ;;  %v2054_v31 = vcvt.f32.s32 %v8027_v36  ;;  %v8028_v57 = vld [vmem:[#allocation17_spill] sm:$0xff] }
 0x305   :  { %v6818_v42 = vadd.s32 %v2160_v25, %v2158_v24  ;;  %v3806_v39 = vadd.f32 %v3805_v43, %v3804_v6  ;;  %v1962_v26 = vpop.xlane.xlu0 %1961  ;;  %4440 = vmatmul.mubr.msk.f32.gmra.mxu1 %vm1181_vm1, %v4069_v38  ;;  %v2025_v25 = vshll.u32 %v2024_v1, 16  ;;  %v2219_v38 = vcvt.f32.s32 %v8028_v57 }
 0x306   :  { %3324 = vst.msk [vmem:[%s7656_s4 + $0xe0] sm:$0xff] %vm3295_vm3, %v1936_v63  ;;  %v1963_v11 = vcvt.f32.s32 %v1962_v26  ;;  %vm2490_vm11 = vcmp.eq.s32.totalorder %v5428_v41, %v1936_v63  ;;  %v3815_v43 = vsel %vm1181_vm1, %v4073_v30, 0.0  ;;  %v2055_v50 = vshll.u32 %v2054_v31, 16  ;;  %v8030_v31 = vld [vmem:[#allocation55_spill] sm:$0xff] }
 0x307   :  { %3339 = vst.msk [vmem:[%s7656_s4 + $0x158] sm:$0xff] %vm3295_vm3, %v6818_v42  ;;  %v3808_v15 = vadd.f32 %v3807_v19, %v3806_v39  ;;  %v4070_v37 = vsel %vm2490_vm11, 1.0, %v4607_v54  ;;  %vm2505_vm12 = vcmp.eq.s32.totalorder %v5428_v41, %v6818_v42 }
 0x308   :  { %v1966_v14 = vadd.s32 %v1965_v3, %v1963_v11  ;;  %4442 = vmatprep.mubr.msk.f32.mxu1 %vm1181_vm1, %v4070_v37  ;;  %v3809_v28 = vsel %vm1181_vm1, %v4070_v37, 0.0 }
 0x309   :  { %v3810_v58 = vadd.f32 %v3809_v28, %v3808_v15  ;;  %v1992_v45 = vpop.xlane.xlu0 %1991  ;;  %4443 = vmatmul.mubr.msk.f32.gmra.mxu1 %vm1181_vm1, %v4071_v12  ;;  %v2220_v15 = vshll.u32 %v2219_v38, 16  ;;  %v3819_v12 = vsel %vm1181_vm1, %v4075_v34, 0.0 }
 0x30a   :  { %3326 = vst.msk [vmem:[%s7656_s4 + $0xf0] sm:$0xff] %vm3295_vm3, %v1966_v14  ;;  %v1993_v23 = vcvt.f32.s32 %v1992_v45  ;;  %v2187_v59 = vpop.xlane.xlu1 %2186  ;;  %vm2492_vm13 = vcmp.eq.s32.totalorder %v5428_v41, %v1966_v14  ;;  %v2085_v45 = vshll.u32 %v2084_v7, 16 }
 0x30b   :  { %v3812_v13 = vadd.f32 %v3811_v2, %v3810_v58  ;;  %v2188_v56 = vcvt.f32.s32 %v2187_v59  ;;  %v4072_v5 = vsel %vm2492_vm13, 1.0, %v4607_v54 }
 0x30c   :  { %v1996_v9 = vadd.s32 %v1995_v46, %v1993_v23  ;;  %4445 = vmatprep.mubr.msk.f32.mxu1 %vm1181_vm1, %v4072_v5  ;;  %v3813_v22 = vsel %vm1181_vm1, %v4072_v5, 0.0  ;;  %v4077_v46 = vsel %vm2497_vm4, 1.0, %v4607_v54 }
 0x30d   :  { %v6854_v4 = vadd.s32 %v2190_v17, %v2188_v56  ;;  %v3814_v6 = vadd.f32 %v3813_v22, %v3812_v13  ;;  %v2022_v24 = vpop.xlane.xlu0 %2021  ;;  %4446 = vmatmul.mubr.msk.f32.gmra.mxu1 %vm1181_vm1, %v4073_v30  ;;  %v2114_v17 = vcvt.f32.s32 %v6338_v49  ;;  %v8029_v13 = vld [vmem:[#allocation50_spill] sm:$0xff]  ;;  %v3823_v30 = vsel %vm1181_vm1, %v4077_v46, 0.0 }
 0x30e   :  { %3328 = vst.msk [vmem:[%s7656_s4 + $0x100] sm:$0xff] %vm3295_vm3, %v1996_v9  ;;  %v2023_v63 = vcvt.f32.s32 %v2022_v24  ;;  %vm2494_vm2 = vcmp.eq.s32.totalorder %v5428_v41, %v1996_v9  ;;  %v2249_v56 = vcvt.f32.s32 %v8029_v13  ;;  %v4079_v9 = vsel %vm2499_vm6, 1.0, %v4607_v54 }
 0x30f   :  { %3341 = vst.msk [vmem:[%s7656_s4 + $0x168] sm:$0xff] %vm3295_vm3, %v6854_v4  ;;  %v3816_v62 = vadd.f32 %v3815_v43, %v3814_v6  ;;  %v4074_v3 = vsel %vm2494_vm2, 1.0, %v4607_v54  ;;  %v2115_v36 = vshll.u32 %v2114_v17, 16  ;;  %v2144_v6 = vcvt.f32.s32 %v8030_v31 }
 0x310   :  { %v2026_v39 = vadd.s32 %v2025_v25, %v2023_v63  ;;  %4448 = vmatprep.mubr.msk.f32.mxu1 %vm1181_vm1, %v4074_v3  ;;  %v3817_v26 = vsel %vm1181_vm1, %v4074_v3, 0.0  ;;  %v2250_v38 = vshll.u32 %v2249_v56, 16  ;;  %v3827_v43 = vsel %vm1181_vm1, %v4079_v9, 0.0 }
 0x311   :  { %v3818_v11 = vadd.f32 %v3817_v26, %v3816_v62  ;;  %v2052_v19 = vpop.xlane.xlu0 %2051  ;;  %4449 = vmatmul.mubr.msk.f32.gmra.mxu1 %vm1181_vm1, %v4075_v34  ;;  %v2145_v7 = vshll.u32 %v2144_v6, 16  ;;  %vm2507_vm15 = vcmp.eq.s32.totalorder %v5428_v41, %v6854_v4  ;;  %v2309_v31 = vcvt.f32.s32 %v6437_v18 }
 0x312   :  { %3330 = vst.msk [vmem:[%s7656_s4 + $0x110] sm:$0xff] %vm3295_vm3, %v2026_v39  ;;  %v2053_v37 = vcvt.f32.s32 %v2052_v19  ;;  %v2217_v14 = vpop.xlane.xlu1 %2216  ;;  %vm2496_vm5 = vcmp.eq.s32.totalorder %v5428_v41, %v2026_v39  ;;  %v4081_v39 = vsel %vm2501_vm8, 1.0, %v4607_v54  ;;  %v4087_v18 = vsel %vm2507_vm15, 1.0, %v4607_v54 }
 0x313   :  { %v3820_v32 = vadd.f32 %v3819_v12, %v3818_v11  ;;  %v2218_v28 = vcvt.f32.s32 %v2217_v14  ;;  %v4076_v40 = vsel %vm2496_vm5, 1.0, %v4607_v54  ;;  %v2174_v11 = vcvt.f32.s32 %v6371_v29 }
 0x314   :  { %v2056_v1 = vadd.s32 %v2055_v50, %v2053_v37  ;;  %4451 = vmatprep.mubr.msk.f32.mxu1 %vm1181_vm1, %v4076_v40  ;;  %v3821_v58 = vsel %vm1181_vm1, %v4076_v40, 0.0  ;;  %v2279_v12 = vcvt.f32.s32 %v6405_v0  ;;  %v4083_v0 = vsel %vm2503_vm10, 1.0, %v4607_v54 }
 0x315   :  { %v6890_v23 = vadd.s32 %v2220_v15, %v2218_v28  ;;  %v3822_v2 = vadd.f32 %v3821_v58, %v3820_v32  ;;  %v2082_v59 = vpop.xlane.xlu0 %2081  ;;  %4452 = vmatmul.mubr.msk.f32.gmra.mxu1 %vm1181_vm1, %v4077_v46  ;;  %v3831_v32 = vsel %vm1181_vm1, %v4081_v39, 0.0  ;;  %v2175_v46 = vshll.u32 %v2174_v11, 16 }
 0x316   :  { %3332 = vst.msk [vmem:[%s7656_s4 + $0x120] sm:$0xff] %vm3295_vm3, %v2056_v1  ;;  %v2083_v5 = vcvt.f32.s32 %v2082_v59  ;;  %vm2498_vm7 = vcmp.eq.s32.totalorder %v5428_v41, %v2056_v1  ;;  %v2204_v1 = vcvt.f32.s32 %v6384_v44  ;;  %v2280_v17 = vshll.u32 %v2279_v12, 16 }
 0x317   :  { %3343 = vst.msk [vmem:[%s7656_s4 + $0x178] sm:$0xff] %vm3295_vm3, %v6890_v23  ;;  %v3824_v49 = vadd.f32 %v3823_v30, %v3822_v2  ;;  %v4078_v55 = vsel %vm2498_vm7, 1.0, %v4607_v54  ;;  %v3835_v59 = vsel %vm1181_vm1, %v4083_v0, 0.0  ;;  %vm2509_vm4 = vcmp.eq.s32.totalorder %v5428_v41, %v6890_v23 }
 0x318   :  { %v2086_v22 = vadd.s32 %v2085_v45, %v2083_v5  ;;  %4454 = vmatprep.mubr.msk.f32.mxu1 %vm1181_vm1, %v4078_v55  ;;  %v3825_v25 = vsel %vm1181_vm1, %v4078_v55, 0.0  ;;  %v4085_v5 = vsel %vm2505_vm12, 1.0, %v4607_v54  ;;  %v2205_v55 = vshll.u32 %v2204_v1, 16 }
 0x319   :  { %v3826_v24 = vadd.f32 %v3825_v25, %v3824_v49  ;;  %v2112_v57 = vpop.xlane.xlu0 %2111  ;;  %4455 = vmatmul.mubr.msk.f32.gmra.mxu1 %vm1181_vm1, %v4079_v9  ;;  %v2234_v9 = vcvt.f32.s32 %v6399_v61 }
 0x31a   :  { %3334 = vst.msk [vmem:[%s7656_s4 + $0x130] sm:$0xff] %vm3295_vm3, %v2086_v22  ;;  %v2113_v63 = vcvt.f32.s32 %v2112_v57  ;;  %v2247_v62 = vpop.xlane.xlu1 %2246  ;;  %vm2500_vm9 = vcmp.eq.s32.totalorder %v5428_v41, %v2086_v22 }
 0x31b   :  { %v3828_v27 = vadd.f32 %v3827_v43, %v3826_v24  ;;  %v2248_v3 = vcvt.f32.s32 %v2247_v62  ;;  %v4080_v34 = vsel %vm2500_vm9, 1.0, %v4607_v54  ;;  %v3839_v24 = vsel %vm1181_vm1, %v4085_v5, 0.0 }
 0x31c   :  { %v2116_v26 = vadd.s32 %v2115_v36, %v2113_v63  ;;  %4457 = vmatprep.mubr.msk.f32.mxu1 %vm1181_vm1, %v4080_v34  ;;  %v3829_v50 = vsel %vm1181_vm1, %v4080_v34, 0.0  ;;  %v2235_v63 = vshll.u32 %v2234_v9, 16  ;;  %v2264_v43 = vcvt.f32.s32 %v6417_v35 }
 0x31d   :  { %v6926_v19 = vadd.s32 %v2250_v38, %v2248_v3  ;;  %v3830_v15 = vadd.f32 %v3829_v50, %v3828_v27  ;;  %v2142_v37 = vpop.xlane.xlu0 %2141  ;;  %4458 = vmatmul.mubr.msk.f32.gmra.mxu1 %vm1181_vm1, %v4081_v39  ;;  %v2310_v3 = vshll.u32 %v2309_v31, 16  ;;  %v3843_v39 = vsel %vm1181_vm1, %v4087_v18, 0.0 }
 0x31e   :  { %3336 = vst.msk [vmem:[%s7656_s4 + $0x140] sm:$0xff] %vm3295_vm3, %v2116_v26  ;;  %v2143_v14 = vcvt.f32.s32 %v2142_v37  ;;  %vm2502_vm11 = vcmp.eq.s32.totalorder %v5428_v41, %v2116_v26  ;;  %v2294_v37 = vcvt.f32.s32 %v6451_v60 }
 0x31f   :  { %3345 = vst.msk [vmem:[%s7656_s4 + $0x188] sm:$0xff] %vm3295_vm3, %v6926_v19  ;;  %v3832_v29 = vadd.f32 %v3831_v32, %v3830_v15  ;;  %v4082_v21 = vsel %vm2502_vm11, 1.0, %v4607_v54  ;;  %vm2511_vm6 = vcmp.eq.s32.totalorder %v5428_v41, %v6926_v19  ;;  %v2339_v19 = vcvt.f32.s32 %v6468_v47 }
 0x320   :  { %v2146_v28 = vadd.s32 %v2145_v7, %v2143_v14  ;;  %4460 = vmatprep.mubr.msk.f32.mxu1 %vm1181_vm1, %v4082_v21  ;;  %v3833_v40 = vsel %vm1181_vm1, %v4082_v21, 0.0  ;;  %v4089_v7 = vsel %vm2509_vm4, 1.0, %v4607_v54  ;;  %v2324_v47 = vcvt.f32.s32 %v6481_v53 }
 0x321   :  { %v3834_v58 = vadd.f32 %v3833_v40, %v3832_v29  ;;  %v2172_v45 = vpop.xlane.xlu0 %2171  ;;  %4461 = vmatmul.mubr.msk.f32.gmra.mxu1 %vm1181_vm1, %v4083_v0  ;;  %v2265_v29 = vshll.u32 %v2264_v43, 16  ;;  %v3847_v0 = vsel %vm1181_vm1, %v4089_v7, 0.0  ;;  %v4091_v40 = vsel %vm2511_vm6, 1.0, %v4607_v54 }
 0x322   :  { %3338 = vst.msk [vmem:[%s7656_s4 + $0x150] sm:$0xff] %vm3295_vm3, %v2146_v28  ;;  %v2173_v2 = vcvt.f32.s32 %v2172_v45  ;;  %v2277_v13 = vpop.xlane.xlu1 %2276  ;;  %vm2504_vm13 = vcmp.eq.s32.totalorder %v5428_v41, %v2146_v28 }
 0x323   :  { %v3836_v42 = vadd.f32 %v3835_v59, %v3834_v58  ;;  %v2278_v56 = vcvt.f32.s32 %v2277_v13  ;;  %v4084_v44 = vsel %vm2504_vm13, 1.0, %v4607_v54  ;;  %v2295_v58 = vshll.u32 %v2294_v37, 16 }
 0x324   :  { %v2176_v30 = vadd.s32 %v2175_v46, %v2173_v2  ;;  %4463 = vmatprep.mubr.msk.f32.mxu1 %vm1181_vm1, %v4084_v44  ;;  %v3837_v49 = vsel %vm1181_vm1, %v4084_v44, 0.0  ;;  %v3851_v59 = vsel %vm1181_vm1, %v4091_v40, 0.0 }
 0x325   :  { %v6962_v22 = vadd.s32 %v2280_v17, %v2278_v56  ;;  %v3838_v25 = vadd.f32 %v3837_v49, %v3836_v42  ;;  %v2202_v36 = vpop.xlane.xlu0 %2201  ;;  %4464 = vmatmul.mubr.msk.f32.gmra.mxu1 %vm1181_vm1, %v4085_v5  ;;  %v2340_v42 = vshll.u32 %v2339_v19, 16  ;;  %v2429_v19 = vcvt.f32.s32 %v6566_v48 }
 0x326   :  { %3340 = vst.msk [vmem:[%s7656_s4 + $0x160] sm:$0xff] %vm3295_vm3, %v2176_v30  ;;  %v2203_v6 = vcvt.f32.s32 %v2202_v36  ;;  %vm2506_vm2 = vcmp.eq.s32.totalorder %v5428_v41, %v2176_v30  ;;  %v2369_v36 = vcvt.f32.s32 %v6502_v52 }
 0x327   :  { %3347 = vst.msk [vmem:[%s7656_s4 + $0x198] sm:$0xff] %vm3295_vm3, %v6962_v22  ;;  %v3840_v61 = vadd.f32 %v3839_v24, %v3838_v25  ;;  %v4086_v4 = vsel %vm2506_vm2, 1.0, %v4607_v54  ;;  %vm2513_vm8 = vcmp.eq.s32.totalorder %v5428_v41, %v6962_v22  ;;  %v2325_v22 = vshll.u32 %v2324_v47, 16 }
 0x328   :  { %v2206_v57 = vadd.s32 %v2205_v55, %v2203_v6  ;;  %4466 = vmatprep.mubr.msk.f32.mxu1 %vm1181_vm1, %v4086_v4  ;;  %v3841_v38 = vsel %vm1181_vm1, %v4086_v4, 0.0  ;;  %v4093_v49 = vsel %vm2513_vm8, 1.0, %v4607_v54  ;;  %v2414_v47 = vcvt.f32.s32 %v6579_v33 }
 0x329   :  { %v3842_v62 = vadd.f32 %v3841_v38, %v3840_v61  ;;  %v2232_v27 = vpop.xlane.xlu0 %2231  ;;  %4467 = vmatmul.mubr.msk.f32.gmra.mxu1 %vm1181_vm1, %v4087_v18  ;;  %v3855_v31 = vsel %vm1181_vm1, %v4093_v49, 0.0  ;;  %v2370_v38 = vshll.u32 %v2369_v36, 16  ;;  %v2444_v33 = vcvt.f32.s32 %v6602_v51 }
 0x32a   :  { %3342 = vst.msk [vmem:[%s7656_s4 + $0x170] sm:$0xff] %vm3295_vm3, %v2206_v57  ;;  %v2233_v34 = vcvt.f32.s32 %v2232_v27  ;;  %v2307_v26 = vpop.xlane.xlu1 %2306  ;;  %vm2508_vm5 = vcmp.eq.s32.totalorder %v5428_v41, %v2206_v57 }
 0x32b   :  { %v3844_v23 = vadd.f32 %v3843_v39, %v3842_v62  ;;  %v2308_v50 = vcvt.f32.s32 %v2307_v26  ;;  %v4088_v35 = vsel %vm2508_vm5, 1.0, %v4607_v54  ;;  %v2399_v26 = vcvt.f32.s32 %v6534_v20 }
 0x32c   :  { %v2236_v11 = vadd.s32 %v2235_v63, %v2233_v34  ;;  %4469 = vmatprep.mubr.msk.f32.mxu1 %vm1181_vm1, %v4088_v35  ;;  %v3845_v15 = vsel %vm1181_vm1, %v4088_v35, 0.0  ;;  %v2354_v63 = vcvt.f32.s32 %v6513_v8 }
 0x32d   :  { %v2311_v12 = vadd.s32 %v2310_v3, %v2308_v50  ;;  %v3846_v14 = vadd.f32 %v3845_v15, %v3844_v23  ;;  %v2262_v32 = vpop.xlane.xlu0 %2261  ;;  %4470 = vmatmul.mubr.msk.f32.gmra.mxu1 %vm1181_vm1, %v4089_v7  ;;  %v2384_v15 = vcvt.f32.s32 %v6545_v16 }
 0x32e   :  { %3344 = vst.msk [vmem:[%s7656_s4 + $0x180] sm:$0xff] %vm3295_vm3, %v2236_v11  ;;  %v2263_v21 = vcvt.f32.s32 %v2262_v32  ;;  %vm2510_vm7 = vcmp.eq.s32.totalorder %v5428_v41, %v2236_v11  ;;  %v2355_v8 = vshll.u32 %v2354_v63, 16 }
 0x32f   :  { %3349 = vst.msk [vmem:[%s7656_s4 + $0x1a8] sm:$0xff] %vm3295_vm3, %v2311_v12  ;;  %v3848_v60 = vadd.f32 %v3847_v0, %v3846_v14  ;;  %v4090_v28 = vsel %vm2510_vm7, 1.0, %v4607_v54  ;;  %vm2515_vm10 = vcmp.eq.s32.totalorder %v5428_v41, %v2311_v12  ;;  %v2400_v12 = vshll.u32 %v2399_v26, 16  ;;  %v4499_v26 = vld [vmem:[%s7652_s0 + $0x8] sm:$0xff] }
 0x330   :  { %v2266_v46 = vadd.s32 %v2265_v29, %v2263_v21  ;;  %4472 = vmatprep.mubr.msk.f32.mxu1 %vm1181_vm1, %v4090_v28  ;;  %v3849_v1 = vsel %vm1181_vm1, %v4090_v28, 0.0  ;;  %v4095_v4 = vsel %vm2515_vm10, 1.0, %v4607_v54  ;;  %v2385_v21 = vshll.u32 %v2384_v15, 16 }
 0x331   :  { %v3850_v45 = vadd.f32 %v3849_v1, %v3848_v60  ;;  %v2292_v17 = vpop.xlane.xlu0 %2291  ;;  %4473 = vmatmul.mubr.msk.f32.gmra.mxu1 %vm1181_vm1, %v4091_v40  ;;  %v3859_v23 = vsel %vm1181_vm1, %v4095_v4, 0.0 }
 0x332   :  { %3346 = vst.msk [vmem:[%s7656_s4 + $0x190] sm:$0xff] %vm3295_vm3, %v2266_v46  ;;  %v2293_v2 = vcvt.f32.s32 %v2292_v17  ;;  %v2337_v13 = vpop.xlane.xlu1 %2336  ;;  %vm2512_vm9 = vcmp.eq.s32.totalorder %v5428_v41, %v2266_v46  ;;  %v2430_v17 = vshll.u32 %v2429_v19, 16 }
 0x333   :  { %v3852_v56 = vadd.f32 %v3851_v59, %v3850_v45  ;;  %v2338_v44 = vcvt.f32.s32 %v2337_v13  ;;  %v4092_v5 = vsel %vm2512_vm9, 1.0, %v4607_v54 }
 0x334   :  { %v2296_v30 = vadd.s32 %v2295_v58, %v2293_v2  ;;  %4475 = vmatprep.mubr.msk.f32.mxu1 %vm1181_vm1, %v4092_v5  ;;  %v3853_v53 = vsel %vm1181_vm1, %v4092_v5, 0.0 }
 0x335   :  { %v2341_v55 = vadd.s32 %v2340_v42, %v2338_v44  ;;  %v3854_v9 = vadd.f32 %v3853_v53, %v3852_v56  ;;  %4476 = vmatmul.mubr.msk.f32.gmra.mxu1 %vm1181_vm1, %v4093_v49 }
 0x336   :  { %3348 = vst.msk [vmem:[%s7656_s4 + $0x1a0] sm:$0xff] %vm3295_vm3, %v2296_v30  ;;  %v2322_v25 = vpop.xlane.xlu0 %2321  ;;  %vm2514_vm11 = vcmp.eq.s32.totalorder %v5428_v41, %v2296_v30  ;;  %v2415_v30 = vshll.u32 %v2414_v47, 16 }
 0x337   :  { %3351 = vst.msk [vmem:[%s7656_s4 + $0x1b8] sm:$0xff] %vm3295_vm3, %v2341_v55  ;;  %v2323_v6 = vcvt.f32.s32 %v2322_v25  ;;  %v4094_v24 = vsel %vm2514_vm11, 1.0, %v4607_v54  ;;  %v3856_v61 = vadd.f32 %v3855_v31, %v3854_v9  ;;  %vm2517_vm12 = vcmp.eq.s32.totalorder %v5428_v41, %v2341_v55 }
 0x338   :  { %4478 = vmatprep.mubr.msk.f32.mxu1 %vm1181_vm1, %v4094_v24  ;;  %v3857_v57 = vsel %vm1181_vm1, %v4094_v24, 0.0  ;;  %v4097_v34 = vsel %vm2517_vm12, 1.0, %v4607_v54  ;;  %v2445_v9 = vshll.u32 %v2444_v33, 16  ;;  %v2459_v25 = vcvt.f32.s32 %v6612_v10  ;;  %v4504_v33 = vld [vmem:[%s7652_s0 + $0x20] sm:$0xff] }
 0x339   :  { %v2326_v18 = vadd.s32 %v2325_v22, %v2323_v6  ;;  %4479 = vmatmul.mubr.msk.f32.gmra.mxu1 %vm1181_vm1, %v4095_v4  ;;  %v3858_v62 = vadd.f32 %v3857_v57, %v3856_v61  ;;  %v3863_v60 = vsel %vm1181_vm1, %v4097_v34, 0.0 }
 0x33a   :  { %v2367_v52 = vpop.xlane.xlu1 %2366  ;;  %v2460_v57 = vshll.u32 %v2459_v25, 16 }
 0x33b   :  { %3350 = vst.msk [vmem:[%s7656_s4 + $0x1b0] sm:$0xff] %vm3295_vm3, %v2326_v18  ;;  %v2368_v43 = vcvt.f32.s32 %v2367_v52  ;;  %vm2516_vm13 = vcmp.eq.s32.totalorder %v5428_v41, %v2326_v18  ;;  %v3860_v35 = vadd.f32 %v3859_v23, %v3858_v62 }
 0x33c   :  { %v4096_v27 = vsel %vm2516_vm13, 1.0, %v4607_v54 }
 0x33d   :  { %v2371_v3 = vadd.s32 %v2370_v38, %v2368_v43  ;;  %4481 = vmatprep.mubr.msk.f32.mxu1 %vm1181_vm1, %v4096_v27  ;;  %v3861_v7 = vsel %vm1181_vm1, %v4096_v27, 0.0 }
 0x33e   :  { %v2352_v39 = vpop.xlane.xlu0 %2351  ;;  %4482 = vmatmul.mubr.msk.f32.gmra.mxu1 %vm1181_vm1, %v4097_v34  ;;  %v3862_v14 = vadd.f32 %v3861_v7, %v3860_v35 }
 0x33f   :  { %3353 = vst.msk [vmem:[%s7656_s4 + $0x1c8] sm:$0xff] %vm3295_vm3, %v2371_v3  ;;  %v2353_v50 = vcvt.f32.s32 %v2352_v39  ;;  %vm2519_vm15 = vcmp.eq.s32.totalorder %v5428_v41, %v2371_v3 }
 0x340   :  { %v4099_v16 = vsel %vm2519_vm15, 1.0, %v4607_v54  ;;  %v3864_v46 = vadd.f32 %v3863_v60, %v3862_v14 }
 0x341   :  { %v2356_v11 = vadd.s32 %v2355_v8, %v2353_v50  ;;  %v3867_v59 = vsel %vm1181_vm1, %v4099_v16, 0.0 }
 0x342   :  { %v2397_v37 = vpop.xlane.xlu1 %2396 }
 0x343   :  { %3352 = vst.msk [vmem:[%s7656_s4 + $0x1c0] sm:$0xff] %vm3295_vm3, %v2356_v11  ;;  %v2398_v20 = vcvt.f32.s32 %v2397_v37  ;;  %vm2518_vm2 = vcmp.eq.s32.totalorder %v5428_v41, %v2356_v11  ;;  %v4500_v11 = vld [vmem:[%s7652_s0] sm:$0xff] }
 0x344   :  { %v4098_v32 = vsel %vm2518_vm2, 1.0, %v4607_v54 }
 0x345   :  { %v2401_v29 = vadd.s32 %v2400_v12, %v2398_v20  ;;  %4484 = vmatprep.mubr.msk.f32.mxu1 %vm1181_vm1, %v4098_v32  ;;  %v3865_v28 = vsel %vm1181_vm1, %v4098_v32, 0.0 }
 0x346   :  { %v2382_v0 = vpop.xlane.xlu0 %2381  ;;  %4485 = vmatmul.mubr.msk.f32.gmra.mxu1 %vm1181_vm1, %v4099_v16  ;;  %v3866_v58 = vadd.f32 %v3865_v28, %v3864_v46  ;;  %v4502_v28 = vld [vmem:[%s7652_s0 + $0x10] sm:$0xff] }
 0x347   :  { %3355 = vst.msk [vmem:[%s7656_s4 + $0x1d8] sm:$0xff] %vm3295_vm3, %v2401_v29  ;;  %v2383_v40 = vcvt.f32.s32 %v2382_v0  ;;  %vm2521_vm4 = vcmp.eq.s32.totalorder %v5428_v41, %v2401_v29 }
 0x348   :  { %v4101_v56 = vsel %vm2521_vm4, 1.0, %v4607_v54  ;;  %v3868_v44 = vadd.f32 %v3867_v59, %v3866_v58  ;;  %v4503_v59 = vld [vmem:[%s7652_s0 + $0x28] sm:$0xff] }
 0x349   :  { %v2386_v1 = vadd.s32 %v2385_v21, %v2383_v40  ;;  %v3871_v51 = vsel %vm1181_vm1, %v4101_v56, 0.0  ;;  %v4501_v21 = vld [vmem:[%s7652_s0 + $0x18] sm:$0xff] }
 0x34a   :  { %v2427_v45 = vpop.xlane.xlu1 %2426 }
 0x34b   :  { %3354 = vst.msk [vmem:[%s7656_s4 + $0x1d0] sm:$0xff] %vm3295_vm3, %v2386_v1  ;;  %v2428_v48 = vcvt.f32.s32 %v2427_v45  ;;  %vm2520_vm5 = vcmp.eq.s32.totalorder %v5428_v41, %v2386_v1  ;;  %v3753_v1 = vld [vmem:[#allocation4] sm:$0x1] }
 0x34c   :  { %v4100_v2 = vsel %vm2520_vm5, 1.0, %v4607_v54 }
 0x34d   :  { %v2431_v13 = vadd.s32 %v2430_v17, %v2428_v48  ;;  %4487 = vmatprep.mubr.msk.f32.mxu1 %vm1181_vm1, %v4100_v2  ;;  %v3869_v42 = vsel %vm1181_vm1, %v4100_v2, 0.0 }
 0x34e   :  { %v2412_v5 = vpop.xlane.xlu0 %2411  ;;  %4488 = vmatmul.mubr.msk.f32.gmra.mxu1 %vm1181_vm1, %v4101_v56  ;;  %v3870_v49 = vadd.f32 %v3869_v42, %v3868_v44 }
 0x34f   :  { %3357 = vst.msk [vmem:[%s7656_s4 + $0x1e8] sm:$0xff] %vm3295_vm3, %v2431_v13  ;;  %v2413_v53 = vcvt.f32.s32 %v2412_v5  ;;  %vm2523_vm6 = vcmp.eq.s32.totalorder %v5428_v41, %v2431_v13 }
 0x350   :  { %v3872_v31 = vadd.f32 %v3871_v51, %v3870_v49  ;;  %v4103_v24 = vsel %vm2523_vm6, 1.0, %v4607_v54  ;;  %v4506_v51 = vld [vmem:[%s7652_s0 + $0x30] sm:$0xff] }
 0x351   :  { %v2416_v55 = vadd.s32 %v2415_v30, %v2413_v53  ;;  %v3875_v38 = vsel %vm1181_vm1, %v4103_v24, 0.0 }
 0x352   :  { %v2442_v22 = vpop.xlane.xlu0 %2441 }
 0x353   :  { %3356 = vst.msk [vmem:[%s7656_s4 + $0x1e0] sm:$0xff] %vm3295_vm3, %v2416_v55  ;;  %v2443_v36 = vcvt.f32.s32 %v2442_v22  ;;  %vm2522_vm7 = vcmp.eq.s32.totalorder %v5428_v41, %v2416_v55  ;;  %v4505_v55 = vld [vmem:[%s7652_s0 + $0x38] sm:$0xff] }
 0x354   :  { %v4102_v6 = vsel %vm2522_vm7, 1.0, %v4607_v54 }
 0x355   :  { %v2446_v61 = vadd.s32 %v2445_v9, %v2443_v36  ;;  %4490 = vmatprep.mubr.msk.f32.mxu1 %vm1181_vm1, %v4102_v6  ;;  %v3873_v10 = vsel %vm1181_vm1, %v4102_v6, 0.0 }
 0x356   :  { %v3874_v4 = vadd.f32 %v3873_v10, %v3872_v31  ;;  %v2457_v18 = vpop.xlane.xlu1 %2456  ;;  %4491 = vmatmul.mubr.msk.f32.gmra.mxu1 %vm1181_vm1, %v4103_v24  ;;  %v4507_v10 = vld [vmem:[%s7652_s0 + $0x48] sm:$0xff] }
 0x357   :  { %3358 = vst.msk [vmem:[%s7656_s4 + $0x1f0] sm:$0xff] %vm3295_vm3, %v2446_v61  ;;  %v2458_v52 = vcvt.f32.s32 %v2457_v18  ;;  %vm2524_vm8 = vcmp.eq.s32.totalorder %v5428_v41, %v2446_v61 }
 0x358   :  { %v3876_v63 = vadd.f32 %v3875_v38, %v3874_v4  ;;  %v4104_v43 = vsel %vm2524_vm8, 1.0, %v4607_v54 }
 0x359   :  { %v2461_v62 = vadd.s32 %v2460_v57, %v2458_v52  ;;  %4493 = vmatprep.mubr.msk.f32.mxu1 %vm1181_vm1, %v4104_v43  ;;  %v3877_v27 = vsel %vm1181_vm1, %v4104_v43, 0.0  ;;  %v4508_v52 = vld [vmem:[%s7652_s0 + $0x40] sm:$0xff] }
 0x35a   :  { %v3878_v3 = vadd.f32 %v3877_v27, %v3876_v63 }
 0x35b   :  { %3359 = vst.msk [vmem:[%s7656_s4 + $0x1f8] sm:$0xff] %vm3295_vm3, %v2461_v62  ;;  %vm2525_vm9 = vcmp.eq.s32.totalorder %v5428_v41, %v2461_v62 }
 0x35c   :  { %v4105_v34 = vsel %vm2525_vm9, 1.0, %v4607_v54 }
 0x35d   :  { %v4402_v39 = vpop.f32.mrf.mxu1  ;;  %4494 = vmatmul.mubr.msk.f32.gmra.mxu1 %vm1181_vm1, %v4105_v34  ;;  %v3879_v8 = vsel %vm1181_vm1, %v4105_v34, 0.0  ;;  %vm74_vm1 = vcmask 0  }
 0x35e   :  { %3232 = vst.msk [vmem:[%s7655_s3 + $0x8] sm:$0xff] %vm208_vm0, %v4402_v39  ;;  %v3361_v23 = vsub.f32 %v4402_v39, %v4499_v26  ;;  %v3880_v50 = vadd.f32 %v3879_v8, %v3878_v3  ;;  %v4509_v3 = vld [vmem:[%s7652_s0 + $0x58] sm:$0xff]  ;;  %v4510_v26 = vld [vmem:[%s7652_s0 + $0x50] sm:$0xff] }
 0x35f   :  { %v2912_v41 = vpop.f32.mrf.mxu1  ;;  %75 = vst.msk [vmem:[#allocation2] sm:$0x1] %vm74_vm1, %v4607_v54 }
 0x360   :  { %v3425_v35 = vmul.f32 %v3361_v23, %v3361_v23  ;;  %v3881_v7 = vrot.slane %v3880_v50, 4  ;;  %3231 = vst.msk [vmem:[%s7655_s3] sm:$0xff] %vm208_vm0, %v2912_v41  ;;  %v3360_v15 = vsub.f32 %v2912_v41, %v4500_v11  ;;  %v4511_v11 = vld [vmem:[%s7652_s0 + $0x68] sm:$0xff] }
 0x362   :  { %v3882_v37 = vadd.f32 %v3881_v7, %v3880_v50  ;;  %v3424_v12 = vmul.f32 %v3360_v15, %v3360_v15  ;;  %v3491_v20 = vsel %vm208_vm0, %v3425_v35, 0.0 }
 0x363   :  { %3492 = vadd.xlane.f32.xlu1 %v3491_v20  ;;  %v4512_v20 = vld [vmem:[%s7652_s0 + $0x60] sm:$0xff] }
 0x364   :  { %v3883_v14 = vrot.slane %v3882_v37, 2  ;;  %v3488_v32 = vsel %vm208_vm0, %v3424_v12, 0.0 }
 0x365   :  { %3489 = vadd.xlane.f32.xlu0 %v3488_v32  ;;  %v4405_v29 = vpop.f32.mrf.mxu1 }
 0x366   :  { %v3884_v16 = vadd.f32 %v3883_v14, %v3882_v37  ;;  %3234 = vst.msk [vmem:[%s7655_s3 + $0x18] sm:$0xff] %vm208_vm0, %v4405_v29  ;;  %v3363_v0 = vsub.f32 %v4405_v29, %v4501_v21 }
 0x367   :  { %v2922_v19 = vpop.f32.mrf.mxu1 }
 0x368   :  { %v3427_v60 = vmul.f32 %v3363_v0, %v3363_v0  ;;  %3233 = vst.msk [vmem:[%s7655_s3 + $0x10] sm:$0xff] %vm208_vm0, %v2922_v19  ;;  %v3362_v40 = vsub.f32 %v2922_v19, %v4502_v28  ;;  %v3885_v46 = vrot.slane %v3884_v16, 1  ;;  %v4513_v0 = vld [vmem:[%s7652_s0 + $0x78] sm:$0xff] }
 0x36a   :  { %v3426_v58 = vmul.f32 %v3362_v40, %v3362_v40  ;;  %v3497_v45 = vsel %vm208_vm0, %v3427_v60, 0.0  ;;  %v3886_v17 = vadd.f32 %v3885_v46, %v3884_v16  ;;  %v4514_v40 = vld [vmem:[%s7652_s0 + $0x70] sm:$0xff] }
 0x36b   :  { %3498 = vadd.xlane.f32.xlu1 %v3497_v45 }
 0x36c   :  { %v3494_v47 = vsel %vm208_vm0, %v3426_v58, 0.0  ;;  %v3887_v48 = vadd.f32 %v3886_v17, %v3753_v1 }
 0x36d   :  { %3495 = vadd.xlane.f32.xlu0 %v3494_v47  ;;  %v4408_v2 = vpop.f32.mrf.mxu1  ;;  %v4515_v47 = vld [vmem:[%s7652_s0 + $0x88] sm:$0xff] }
 0x36e   :  { %3236 = vst.msk [vmem:[%s7655_s3 + $0x28] sm:$0xff] %vm208_vm0, %v4408_v2  ;;  %v3365_v13 = vsub.f32 %v4408_v2, %v4503_v59 }
 0x36f   :  { %3889 = vst.msk [vmem:[#allocation4] sm:$0x1] %vm76_vm14, %v3887_v48  ;;  %v2932_v42 = vpop.f32.mrf.mxu1 }
 0x370   :  { %v3429_v56 = vmul.f32 %v3365_v13, %v3365_v13  ;;  %3235 = vst.msk [vmem:[%s7655_s3 + $0x20] sm:$0xff] %vm208_vm0, %v2932_v42  ;;  %v3364_v44 = vsub.f32 %v2932_v42, %v4504_v33  ;;  %v4516_v13 = vld [vmem:[%s7652_s0 + $0x80] sm:$0xff] }
 0x372   :  { %v3428_v5 = vmul.f32 %v3364_v44, %v3364_v44  ;;  %v3503_v30 = vsel %vm208_vm0, %v3429_v56, 0.0 }
 0x373   :  { %3504 = vadd.xlane.f32.xlu1 %v3503_v30  ;;  %v4517_v30 = vld [vmem:[%s7652_s0 + $0x98] sm:$0xff] }
 0x374   :  { %v3500_v53 = vsel %vm208_vm0, %v3428_v5, 0.0 }
 0x375   :  { %3501 = vadd.xlane.f32.xlu0 %v3500_v53  ;;  %v4411_v49 = vpop.f32.mrf.mxu1 }
 0x376   :  { %3238 = vst.msk [vmem:[%s7655_s3 + $0x38] sm:$0xff] %vm208_vm0, %v4411_v49  ;;  %v3367_v9 = vsub.f32 %v4411_v49, %v4505_v55 }
 0x377   :  { %v2942_v22 = vpop.f32.mrf.mxu1 }
 0x378   :  { %v3431_v25 = vmul.f32 %v3367_v9, %v3367_v9  ;;  %3237 = vst.msk [vmem:[%s7655_s3 + $0x30] sm:$0xff] %vm208_vm0, %v2942_v22  ;;  %v3366_v36 = vsub.f32 %v2942_v22, %v4506_v51  ;;  %v4518_v9 = vld [vmem:[%s7652_s0 + $0x90] sm:$0xff] }
 0x37a   :  { %v3430_v31 = vmul.f32 %v3366_v36, %v3366_v36  ;;  %v3509_v6 = vsel %vm208_vm0, %v3431_v25, 0.0 }
 0x37b   :  { %3510 = vadd.xlane.f32.xlu1 %v3509_v6  ;;  %v4519_v6 = vld [vmem:[%s7652_s0 + $0xa8] sm:$0xff] }
 0x37c   :  { %v3506_v24 = vsel %vm208_vm0, %v3430_v31, 0.0 }
 0x37d   :  { %3507 = vadd.xlane.f32.xlu0 %v3506_v24  ;;  %v4414_v61 = vpop.f32.mrf.mxu1 }
 0x37e   :  { %3240 = vst.msk [vmem:[%s7655_s3 + $0x48] sm:$0xff] %vm208_vm0, %v4414_v61  ;;  %v3369_v4 = vsub.f32 %v4414_v61, %v4507_v10 }
 0x37f   :  { %v2952_v18 = vpop.f32.mrf.mxu1 }
 0x380   :  { %v3433_v57 = vmul.f32 %v3369_v4, %v3369_v4  ;;  %3239 = vst.msk [vmem:[%s7655_s3 + $0x40] sm:$0xff] %vm208_vm0, %v2952_v18  ;;  %v3368_v38 = vsub.f32 %v2952_v18, %v4508_v52  ;;  %v4520_v4 = vld [vmem:[%s7652_s0 + $0xa0] sm:$0xff] }
 0x382   :  { %v3432_v63 = vmul.f32 %v3368_v38, %v3368_v38  ;;  %v3515_v43 = vsel %vm208_vm0, %v3433_v57, 0.0 }
 0x383   :  { %3516 = vadd.xlane.f32.xlu1 %v3515_v43  ;;  %v4521_v43 = vld [vmem:[%s7652_s0 + $0xb8] sm:$0xff] }
 0x384   :  { %v3512_v62 = vsel %vm208_vm0, %v3432_v63, 0.0 }
 0x385   :  { %3513 = vadd.xlane.f32.xlu0 %v3512_v62  ;;  %v4417_v27 = vpop.f32.mrf.mxu1 }
 0x386   :  { %3242 = vst.msk [vmem:[%s7655_s3 + $0x58] sm:$0xff] %vm208_vm0, %v4417_v27  ;;  %v3371_v34 = vsub.f32 %v4417_v27, %v4509_v3 }
 0x387   :  { %v2962_v39 = vpop.f32.mrf.mxu1 }
 0x388   :  { %v3435_v8 = vmul.f32 %v3371_v34, %v3371_v34  ;;  %3241 = vst.msk [vmem:[%s7655_s3 + $0x50] sm:$0xff] %vm208_vm0, %v2962_v39  ;;  %v3370_v23 = vsub.f32 %v2962_v39, %v4510_v26  ;;  %v4522_v34 = vld [vmem:[%s7652_s0 + $0xb0] sm:$0xff] }
 0x38a   :  { %v3434_v50 = vmul.f32 %v3370_v23, %v3370_v23  ;;  %v3521_v41 = vsel %vm208_vm0, %v3435_v8, 0.0 }
 0x38b   :  { %3522 = vadd.xlane.f32.xlu1 %v3521_v41  ;;  %v4523_v41 = vld [vmem:[%s7652_s0 + $0xc8] sm:$0xff] }
 0x38c   :  { %v3518_v35 = vsel %vm208_vm0, %v3434_v50, 0.0 }
 0x38d   :  { %3519 = vadd.xlane.f32.xlu0 %v3518_v35  ;;  %v4420_v7 = vpop.f32.mrf.mxu1 }
 0x38e   :  { %3244 = vst.msk [vmem:[%s7655_s3 + $0x68] sm:$0xff] %vm208_vm0, %v4420_v7  ;;  %v3373_v15 = vsub.f32 %v4420_v7, %v4511_v11 }
 0x38f   :  { %v2972_v37 = vpop.f32.mrf.mxu1 }
 0x390   :  { %v3437_v12 = vmul.f32 %v3373_v15, %v3373_v15  ;;  %3243 = vst.msk [vmem:[%s7655_s3 + $0x60] sm:$0xff] %vm208_vm0, %v2972_v37  ;;  %v3372_v14 = vsub.f32 %v2972_v37, %v4512_v20  ;;  %v4524_v15 = vld [vmem:[%s7652_s0 + $0xc0] sm:$0xff] }
 0x392   :  { %v3436_v32 = vmul.f32 %v3372_v14, %v3372_v14  ;;  %v3527_v29 = vsel %vm208_vm0, %v3437_v12, 0.0 }
 0x393   :  { %3528 = vadd.xlane.f32.xlu1 %v3527_v29  ;;  %v4525_v29 = vld [vmem:[%s7652_s0 + $0xd8] sm:$0xff] }
 0x394   :  { %v3524_v16 = vsel %vm208_vm0, %v3436_v32, 0.0 }
 0x395   :  { %3525 = vadd.xlane.f32.xlu0 %v3524_v16  ;;  %v4423_v21 = vpop.f32.mrf.mxu1 }
 0x396   :  { %3246 = vst.msk [vmem:[%s7655_s3 + $0x78] sm:$0xff] %vm208_vm0, %v4423_v21  ;;  %v3375_v19 = vsub.f32 %v4423_v21, %v4513_v0 }
 0x397   :  { %v2982_v60 = vpop.f32.mrf.mxu1 }
 0x398   :  { %v3439_v28 = vmul.f32 %v3375_v19, %v3375_v19  ;;  %3245 = vst.msk [vmem:[%s7655_s3 + $0x70] sm:$0xff] %vm208_vm0, %v2982_v60  ;;  %v3374_v46 = vsub.f32 %v2982_v60, %v4514_v40  ;;  %v4526_v19 = vld [vmem:[%s7652_s0 + $0xd0] sm:$0xff] }
 0x39a   :  { %v3438_v1 = vmul.f32 %v3374_v46, %v3374_v46  ;;  %v3533_v58 = vsel %vm208_vm0, %v3439_v28, 0.0  ;;  %v4527_v46 = vld [vmem:[%s7652_s0 + $0xe8] sm:$0xff] }
 0x39b   :  { %3534 = vadd.xlane.f32.xlu1 %v3533_v58 }
 0x39c   :  { %v3530_v45 = vsel %vm208_vm0, %v3438_v1, 0.0 }
 0x39d   :  { %3531 = vadd.xlane.f32.xlu0 %v3530_v45  ;;  %v4426_v17 = vpop.f32.mrf.mxu1 }
 0x39e   :  { %3248 = vst.msk [vmem:[%s7655_s3 + $0x88] sm:$0xff] %vm208_vm0, %v4426_v17  ;;  %v3377_v48 = vsub.f32 %v4426_v17, %v4515_v47  ;;  %v4528_v47 = vld [vmem:[%s7652_s0 + $0xe0] sm:$0xff] }
 0x39f   :  { %v2992_v2 = vpop.f32.mrf.mxu1 }
 0x3a0   :  { %v3441_v59 = vmul.f32 %v3377_v48, %v3377_v48  ;;  %3247 = vst.msk [vmem:[%s7655_s3 + $0x80] sm:$0xff] %vm208_vm0, %v2992_v2  ;;  %v3376_v42 = vsub.f32 %v2992_v2, %v4516_v13 }
 0x3a2   :  { %v3440_v56 = vmul.f32 %v3376_v42, %v3376_v42  ;;  %v3539_v33 = vsel %vm208_vm0, %v3441_v59, 0.0  ;;  %v4529_v42 = vld [vmem:[%s7652_s0 + $0xf8] sm:$0xff] }
 0x3a3   :  { %3540 = vadd.xlane.f32.xlu1 %v3539_v33 }
 0x3a4   :  { %v3536_v44 = vsel %vm208_vm0, %v3440_v56, 0.0 }
 0x3a5   :  { %3537 = vadd.xlane.f32.xlu0 %v3536_v44  ;;  %v4429_v5 = vpop.f32.mrf.mxu1 }
 0x3a6   :  { %3250 = vst.msk [vmem:[%s7655_s3 + $0x98] sm:$0xff] %vm208_vm0, %v4429_v5  ;;  %v3379_v53 = vsub.f32 %v4429_v5, %v4517_v30  ;;  %v4530_v30 = vld [vmem:[%s7652_s0 + $0xf0] sm:$0xff] }
 0x3a7   :  { %v3002_v49 = vpop.f32.mrf.mxu1 }
 0x3a8   :  { %v3443_v55 = vmul.f32 %v3379_v53, %v3379_v53  ;;  %3249 = vst.msk [vmem:[%s7655_s3 + $0x90] sm:$0xff] %vm208_vm0, %v3002_v49  ;;  %v3378_v22 = vsub.f32 %v3002_v49, %v4518_v9 }
 0x3aa   :  { %v3442_v25 = vmul.f32 %v3378_v22, %v3378_v22  ;;  %v3545_v51 = vsel %vm208_vm0, %v3443_v55, 0.0  ;;  %v4531_v22 = vld [vmem:[%s7652_s0 + $0x108] sm:$0xff] }
 0x3ab   :  { %3546 = vadd.xlane.f32.xlu1 %v3545_v51 }
 0x3ac   :  { %v3542_v36 = vsel %vm208_vm0, %v3442_v25, 0.0 }
 0x3ad   :  { %3543 = vadd.xlane.f32.xlu0 %v3542_v36  ;;  %v4432_v31 = vpop.f32.mrf.mxu1 }
 0x3ae   :  { %3252 = vst.msk [vmem:[%s7655_s3 + $0xa8] sm:$0xff] %vm208_vm0, %v4432_v31  ;;  %v3381_v24 = vsub.f32 %v4432_v31, %v4519_v6  ;;  %v4532_v6 = vld [vmem:[%s7652_s0 + $0x100] sm:$0xff] }
 0x3af   :  { %v3012_v61 = vpop.f32.mrf.mxu1 }
 0x3b0   :  { %v3445_v10 = vmul.f32 %v3381_v24, %v3381_v24  ;;  %3251 = vst.msk [vmem:[%s7655_s3 + $0xa0] sm:$0xff] %vm208_vm0, %v3012_v61  ;;  %v3380_v18 = vsub.f32 %v3012_v61, %v4520_v4 }
 0x3b2   :  { %v3444_v57 = vmul.f32 %v3380_v18, %v3380_v18  ;;  %v3551_v52 = vsel %vm208_vm0, %v3445_v10, 0.0  ;;  %v4533_v18 = vld [vmem:[%s7652_s0 + $0x118] sm:$0xff] }
 0x3b3   :  { %3552 = vadd.xlane.f32.xlu1 %v3551_v52 }
 0x3b4   :  { %v3548_v38 = vsel %vm208_vm0, %v3444_v57, 0.0 }
 0x3b5   :  { %3549 = vadd.xlane.f32.xlu0 %v3548_v38  ;;  %v4435_v63 = vpop.f32.mrf.mxu1 }
 0x3b6   :  { %3254 = vst.msk [vmem:[%s7655_s3 + $0xb8] sm:$0xff] %vm208_vm0, %v4435_v63  ;;  %v3383_v62 = vsub.f32 %v4435_v63, %v4521_v43  ;;  %v4534_v43 = vld [vmem:[%s7652_s0 + $0x110] sm:$0xff] }
 0x3b7   :  { %v3022_v27 = vpop.f32.mrf.mxu1 }
 0x3b8   :  { %v3447_v3 = vmul.f32 %v3383_v62, %v3383_v62  ;;  %3253 = vst.msk [vmem:[%s7655_s3 + $0xb0] sm:$0xff] %vm208_vm0, %v3022_v27  ;;  %v3382_v39 = vsub.f32 %v3022_v27, %v4522_v34 }
 0x3ba   :  { %v3446_v8 = vmul.f32 %v3382_v39, %v3382_v39  ;;  %v3557_v26 = vsel %vm208_vm0, %v3447_v3, 0.0  ;;  %v4535_v39 = vld [vmem:[%s7652_s0 + $0x128] sm:$0xff] }
 0x3bb   :  { %3558 = vadd.xlane.f32.xlu1 %v3557_v26 }
 0x3bc   :  { %v3554_v23 = vsel %vm208_vm0, %v3446_v8, 0.0 }
 0x3bd   :  { %3555 = vadd.xlane.f32.xlu0 %v3554_v23  ;;  %v4438_v50 = vpop.f32.mrf.mxu1 }
 0x3be   :  { %3256 = vst.msk [vmem:[%s7655_s3 + $0xc8] sm:$0xff] %vm208_vm0, %v4438_v50  ;;  %v3385_v35 = vsub.f32 %v4438_v50, %v4523_v41  ;;  %v4536_v41 = vld [vmem:[%s7652_s0 + $0x120] sm:$0xff] }
 0x3bf   :  { %v3032_v7 = vpop.f32.mrf.mxu1 }
 0x3c0   :  { %v3449_v11 = vmul.f32 %v3385_v35, %v3385_v35  ;;  %3255 = vst.msk [vmem:[%s7655_s3 + $0xc0] sm:$0xff] %vm208_vm0, %v3032_v7  ;;  %v3384_v37 = vsub.f32 %v3032_v7, %v4524_v15 }
 0x3c2   :  { %v3448_v12 = vmul.f32 %v3384_v37, %v3384_v37  ;;  %v3563_v20 = vsel %vm208_vm0, %v3449_v11, 0.0  ;;  %v4537_v37 = vld [vmem:[%s7652_s0 + $0x138] sm:$0xff] }
 0x3c3   :  { %3564 = vadd.xlane.f32.xlu1 %v3563_v20 }
 0x3c4   :  { %v3560_v14 = vsel %vm208_vm0, %v3448_v12, 0.0 }
 0x3c5   :  { %3561 = vadd.xlane.f32.xlu0 %v3560_v14  ;;  %v4441_v32 = vpop.f32.mrf.mxu1 }
 0x3c6   :  { %3258 = vst.msk [vmem:[%s7655_s3 + $0xd8] sm:$0xff] %vm208_vm0, %v4441_v32  ;;  %v3387_v16 = vsub.f32 %v4441_v32, %v4525_v29  ;;  %v4538_v29 = vld [vmem:[%s7652_s0 + $0x130] sm:$0xff] }
 0x3c7   :  { %v3042_v21 = vpop.f32.mrf.mxu1 }
 0x3c8   :  { %v3451_v0 = vmul.f32 %v3387_v16, %v3387_v16  ;;  %3257 = vst.msk [vmem:[%s7655_s3 + $0xd0] sm:$0xff] %vm208_vm0, %v3042_v21  ;;  %v3386_v60 = vsub.f32 %v3042_v21, %v4526_v19 }
 0x3c9   :  { %v4444_v28 = vpop.f32.mrf.mxu1 }
 0x3ca   :  { %v3450_v40 = vmul.f32 %v3386_v60, %v3386_v60  ;;  %3260 = vst.msk [vmem:[%s7655_s3 + $0xe8] sm:$0xff] %vm208_vm0, %v4444_v28  ;;  %v3389_v1 = vsub.f32 %v4444_v28, %v4527_v46  ;;  %v3569_v58 = vsel %vm208_vm0, %v3451_v0, 0.0  ;;  %v4539_v60 = vld [vmem:[%s7652_s0 + $0x148] sm:$0xff] }
 0x3cb   :  { %3570 = vadd.xlane.f32.xlu1 %v3569_v58  ;;  %v3052_v45 = vpop.f32.mrf.mxu1  ;;  %v4540_v58 = vld [vmem:[%s7652_s0 + $0x140] sm:$0xff] }
 0x3cc   :  { %v3453_v17 = vmul.f32 %v3389_v1, %v3389_v1  ;;  %3259 = vst.msk [vmem:[%s7655_s3 + $0xe0] sm:$0xff] %vm208_vm0, %v3052_v45  ;;  %v3388_v48 = vsub.f32 %v3052_v45, %v4528_v47  ;;  %v3566_v2 = vsel %vm208_vm0, %v3450_v40, 0.0 }
 0x3cd   :  { %3567 = vadd.xlane.f32.xlu0 %v3566_v2  ;;  %v4447_v59 = vpop.f32.mrf.mxu1  ;;  %v4541_v2 = vld [vmem:[%s7652_s0 + $0x158] sm:$0xff] }
 0x3ce   :  { %v3452_v13 = vmul.f32 %v3388_v48, %v3388_v48  ;;  %3262 = vst.msk [vmem:[%s7655_s3 + $0xf8] sm:$0xff] %vm208_vm0, %v4447_v59  ;;  %v3391_v56 = vsub.f32 %v4447_v59, %v4529_v42  ;;  %v3575_v33 = vsel %vm208_vm0, %v3453_v17, 0.0 }
 0x3cf   :  { %3576 = vadd.xlane.f32.xlu1 %v3575_v33  ;;  %v3062_v44 = vpop.f32.mrf.mxu1  ;;  %v4542_v33 = vld [vmem:[%s7652_s0 + $0x150] sm:$0xff] }
 0x3d0   :  { %v3455_v5 = vmul.f32 %v3391_v56, %v3391_v56  ;;  %3261 = vst.msk [vmem:[%s7655_s3 + $0xf0] sm:$0xff] %vm208_vm0, %v3062_v44  ;;  %v3390_v53 = vsub.f32 %v3062_v44, %v4530_v30  ;;  %v3572_v49 = vsel %vm208_vm0, %v3452_v13, 0.0 }
 0x3d1   :  { %3573 = vadd.xlane.f32.xlu0 %v3572_v49  ;;  %v4450_v55 = vpop.f32.mrf.mxu1  ;;  %v4543_v49 = vld [vmem:[%s7652_s0 + $0x168] sm:$0xff] }
 0x3d2   :  { %v3454_v9 = vmul.f32 %v3390_v53, %v3390_v53  ;;  %3264 = vst.msk [vmem:[%s7655_s3 + $0x108] sm:$0xff] %vm208_vm0, %v4450_v55  ;;  %v3393_v25 = vsub.f32 %v4450_v55, %v4531_v22  ;;  %v3581_v51 = vsel %vm208_vm0, %v3455_v5, 0.0 }
 0x3d3   :  { %3582 = vadd.xlane.f32.xlu1 %v3581_v51  ;;  %v3072_v36 = vpop.f32.mrf.mxu1  ;;  %v4544_v51 = vld [vmem:[%s7652_s0 + $0x160] sm:$0xff] }
 0x3d4   :  { %v3457_v31 = vmul.f32 %v3393_v25, %v3393_v25  ;;  %3263 = vst.msk [vmem:[%s7655_s3 + $0x100] sm:$0xff] %vm208_vm0, %v3072_v36  ;;  %v3392_v24 = vsub.f32 %v3072_v36, %v4532_v6  ;;  %v3578_v61 = vsel %vm208_vm0, %v3454_v9, 0.0 }
 0x3d5   :  { %3579 = vadd.xlane.f32.xlu0 %v3578_v61  ;;  %v4453_v10 = vpop.f32.mrf.mxu1  ;;  %v4545_v61 = vld [vmem:[%s7652_s0 + $0x178] sm:$0xff] }
 0x3d6   :  { %v3456_v4 = vmul.f32 %v3392_v24, %v3392_v24  ;;  %3266 = vst.msk [vmem:[%s7655_s3 + $0x118] sm:$0xff] %vm208_vm0, %v4453_v10  ;;  %v3395_v57 = vsub.f32 %v4453_v10, %v4533_v18  ;;  %v3587_v52 = vsel %vm208_vm0, %v3457_v31, 0.0 }
 0x3d7   :  { %3588 = vadd.xlane.f32.xlu1 %v3587_v52  ;;  %v3082_v38 = vpop.f32.mrf.mxu1  ;;  %v4546_v52 = vld [vmem:[%s7652_s0 + $0x170] sm:$0xff] }
 0x3d8   :  { %v3459_v63 = vmul.f32 %v3395_v57, %v3395_v57  ;;  %3265 = vst.msk [vmem:[%s7655_s3 + $0x110] sm:$0xff] %vm208_vm0, %v3082_v38  ;;  %v3394_v62 = vsub.f32 %v3082_v38, %v4534_v43  ;;  %v3584_v27 = vsel %vm208_vm0, %v3456_v4, 0.0 }
 0x3d9   :  { %3585 = vadd.xlane.f32.xlu0 %v3584_v27  ;;  %v4456_v3 = vpop.f32.mrf.mxu1  ;;  %v4547_v27 = vld [vmem:[%s7652_s0 + $0x188] sm:$0xff] }
 0x3da   :  { %v3458_v34 = vmul.f32 %v3394_v62, %v3394_v62  ;;  %3268 = vst.msk [vmem:[%s7655_s3 + $0x128] sm:$0xff] %vm208_vm0, %v4456_v3  ;;  %v3397_v8 = vsub.f32 %v4456_v3, %v4535_v39  ;;  %v3593_v26 = vsel %vm208_vm0, %v3459_v63, 0.0 }
 0x3db   :  { %3594 = vadd.xlane.f32.xlu1 %v3593_v26  ;;  %v3092_v23 = vpop.f32.mrf.mxu1  ;;  %v4548_v26 = vld [vmem:[%s7652_s0 + $0x180] sm:$0xff] }
 0x3dc   :  { %v3461_v50 = vmul.f32 %v3397_v8, %v3397_v8  ;;  %3267 = vst.msk [vmem:[%s7655_s3 + $0x120] sm:$0xff] %vm208_vm0, %v3092_v23  ;;  %v3396_v35 = vsub.f32 %v3092_v23, %v4536_v41  ;;  %v3590_v7 = vsel %vm208_vm0, %v3458_v34, 0.0 }
 0x3dd   :  { %3591 = vadd.xlane.f32.xlu0 %v3590_v7  ;;  %v4459_v11 = vpop.f32.mrf.mxu1  ;;  %v4549_v7 = vld [vmem:[%s7652_s0 + $0x198] sm:$0xff] }
 0x3de   :  { %v3460_v15 = vmul.f32 %v3396_v35, %v3396_v35  ;;  %3270 = vst.msk [vmem:[%s7655_s3 + $0x138] sm:$0xff] %vm208_vm0, %v4459_v11  ;;  %v3399_v12 = vsub.f32 %v4459_v11, %v4537_v37  ;;  %v3599_v20 = vsel %vm208_vm0, %v3461_v50, 0.0 }
 0x3df   :  { %3600 = vadd.xlane.f32.xlu1 %v3599_v20  ;;  %v3102_v14 = vpop.f32.mrf.mxu1  ;;  %v4550_v20 = vld [vmem:[%s7652_s0 + $0x190] sm:$0xff] }
 0x3e0   :  { %v3463_v32 = vmul.f32 %v3399_v12, %v3399_v12  ;;  %3269 = vst.msk [vmem:[%s7655_s3 + $0x130] sm:$0xff] %vm208_vm0, %v3102_v14  ;;  %v3398_v16 = vsub.f32 %v3102_v14, %v4538_v29  ;;  %v3596_v21 = vsel %vm208_vm0, %v3460_v15, 0.0 }
 0x3e1   :  { %3597 = vadd.xlane.f32.xlu0 %v3596_v21  ;;  %v4462_v0 = vpop.f32.mrf.mxu1  ;;  %v4551_v21 = vld [vmem:[%s7652_s0 + $0x1a8] sm:$0xff] }
 0x3e2   :  { %v3462_v19 = vmul.f32 %v3398_v16, %v3398_v16  ;;  %3272 = vst.msk [vmem:[%s7655_s3 + $0x148] sm:$0xff] %vm208_vm0, %v4462_v0  ;;  %v3401_v28 = vsub.f32 %v4462_v0, %v4539_v60  ;;  %v3605_v40 = vsel %vm208_vm0, %v3463_v32, 0.0 }
 0x3e3   :  { %3606 = vadd.xlane.f32.xlu1 %v3605_v40  ;;  %v3112_v46 = vpop.f32.mrf.mxu1  ;;  %v4552_v40 = vld [vmem:[%s7652_s0 + $0x1a0] sm:$0xff] }
 0x3e4   :  { %v3465_v1 = vmul.f32 %v3401_v28, %v3401_v28  ;;  %3271 = vst.msk [vmem:[%s7655_s3 + $0x140] sm:$0xff] %vm208_vm0, %v3112_v46  ;;  %v3400_v45 = vsub.f32 %v3112_v46, %v4540_v58  ;;  %v3602_v17 = vsel %vm208_vm0, %v3462_v19, 0.0 }
 0x3e5   :  { %3603 = vadd.xlane.f32.xlu0 %v3602_v17  ;;  %v4465_v47 = vpop.f32.mrf.mxu1 }
 0x3e6   :  { %v3464_v48 = vmul.f32 %v3400_v45, %v3400_v45  ;;  %3274 = vst.msk [vmem:[%s7655_s3 + $0x158] sm:$0xff] %vm208_vm0, %v4465_v47  ;;  %v3403_v59 = vsub.f32 %v4465_v47, %v4541_v2  ;;  %v3611_v13 = vsel %vm208_vm0, %v3465_v1, 0.0  ;;  %v4553_v47 = vld [vmem:[%s7652_s0 + $0x1b8] sm:$0xff] }
 0x3e7   :  { %3612 = vadd.xlane.f32.xlu1 %v3611_v13  ;;  %v3122_v42 = vpop.f32.mrf.mxu1 }
 0x3e8   :  { %v3467_v56 = vmul.f32 %v3403_v59, %v3403_v59  ;;  %3273 = vst.msk [vmem:[%s7655_s3 + $0x150] sm:$0xff] %vm208_vm0, %v3122_v42  ;;  %v3402_v44 = vsub.f32 %v3122_v42, %v4542_v33  ;;  %v3608_v5 = vsel %vm208_vm0, %v3464_v48, 0.0  ;;  %v4554_v42 = vld [vmem:[%s7652_s0 + $0x1b0] sm:$0xff] }
 0x3e9   :  { %3609 = vadd.xlane.f32.xlu0 %v3608_v5  ;;  %v4468_v30 = vpop.f32.mrf.mxu1 }
 0x3ea   :  { %v3466_v53 = vmul.f32 %v3402_v44, %v3402_v44  ;;  %3276 = vst.msk [vmem:[%s7655_s3 + $0x168] sm:$0xff] %vm208_vm0, %v4468_v30  ;;  %v3405_v55 = vsub.f32 %v4468_v30, %v4543_v49  ;;  %v3617_v9 = vsel %vm208_vm0, %v3467_v56, 0.0 }
 0x3eb   :  { %3618 = vadd.xlane.f32.xlu1 %v3617_v9  ;;  %v3132_v22 = vpop.f32.mrf.mxu1 }
 0x3ec   :  { %v3469_v25 = vmul.f32 %v3405_v55, %v3405_v55  ;;  %3275 = vst.msk [vmem:[%s7655_s3 + $0x160] sm:$0xff] %vm208_vm0, %v3132_v22  ;;  %v3404_v36 = vsub.f32 %v3132_v22, %v4544_v51  ;;  %v3614_v31 = vsel %vm208_vm0, %v3466_v53, 0.0  ;;  %v4555_v53 = vld [vmem:[%s7652_s0 + $0x1c8] sm:$0xff] }
 0x3ed   :  { %3615 = vadd.xlane.f32.xlu0 %v3614_v31  ;;  %v4471_v6 = vpop.f32.mrf.mxu1 }
 0x3ee   :  { %v3468_v24 = vmul.f32 %v3404_v36, %v3404_v36  ;;  %3278 = vst.msk [vmem:[%s7655_s3 + $0x178] sm:$0xff] %vm208_vm0, %v4471_v6  ;;  %v3407_v10 = vsub.f32 %v4471_v6, %v4545_v61  ;;  %v3623_v4 = vsel %vm208_vm0, %v3469_v25, 0.0  ;;  %v3490_v55 = vpop.xlane.xlu0 %3489  ;;  %v4556_v25 = vld [vmem:[%s7652_s0 + $0x1c0] sm:$0xff]  ;;  %v3493_v6 = vpop.xlane.xlu1 %3492 }
 0x3ef   :  { %3624 = vadd.xlane.f32.xlu1 %v3623_v4  ;;  %v3142_v18 = vpop.f32.mrf.mxu1  ;;  %v3681_v61 = vadd.f32 %v3493_v6, %v3490_v55 }
 0x3f0   :  { %v3471_v57 = vmul.f32 %v3407_v10, %v3407_v10  ;;  %3277 = vst.msk [vmem:[%s7655_s3 + $0x170] sm:$0xff] %vm208_vm0, %v3142_v18  ;;  %v3406_v38 = vsub.f32 %v3142_v18, %v4546_v52  ;;  %v3620_v63 = vsel %vm208_vm0, %v3468_v24, 0.0 }
 0x3f1   :  { %3621 = vadd.xlane.f32.xlu0 %v3620_v63  ;;  %v4474_v43 = vpop.f32.mrf.mxu1 }
 0x3f2   :  { %v3470_v62 = vmul.f32 %v3406_v38, %v3406_v38  ;;  %3280 = vst.msk [vmem:[%s7655_s3 + $0x188] sm:$0xff] %vm208_vm0, %v4474_v43  ;;  %v3409_v3 = vsub.f32 %v4474_v43, %v4547_v27  ;;  %v3629_v34 = vsel %vm208_vm0, %v3471_v57, 0.0  ;;  %v4557_v57 = vld [vmem:[%s7652_s0 + $0x1d8] sm:$0xff]  ;;  %v4558_v43 = vld [vmem:[%s7652_s0 + $0x1d0] sm:$0xff] }
 0x3f3   :  { %3630 = vadd.xlane.f32.xlu1 %v3629_v34  ;;  %v3152_v39 = vpop.f32.mrf.mxu1 }
 0x3f4   :  { %v3473_v8 = vmul.f32 %v3409_v3, %v3409_v3  ;;  %3279 = vst.msk [vmem:[%s7655_s3 + $0x180] sm:$0xff] %vm208_vm0, %v3152_v39  ;;  %v3408_v23 = vsub.f32 %v3152_v39, %v4548_v26  ;;  %v3626_v50 = vsel %vm208_vm0, %v3470_v62, 0.0  ;;  %v3499_v27 = vpop.xlane.xlu1 %3498 }
 0x3f5   :  { %3627 = vadd.xlane.f32.xlu0 %v3626_v50  ;;  %v4477_v41 = vpop.f32.mrf.mxu1 }
 0x3f6   :  { %v3472_v35 = vmul.f32 %v3408_v23, %v3408_v23  ;;  %3282 = vst.msk [vmem:[%s7655_s3 + $0x198] sm:$0xff] %vm208_vm0, %v4477_v41  ;;  %v3411_v11 = vsub.f32 %v4477_v41, %v4549_v7  ;;  %v3635_v15 = vsel %vm208_vm0, %v3473_v8, 0.0  ;;  %v3496_v24 = vpop.xlane.xlu0 %3495 }
 0x3f7   :  { %3636 = vadd.xlane.f32.xlu1 %v3635_v15  ;;  %v3162_v37 = vpop.f32.mrf.mxu1  ;;  %v3682_v18 = vadd.f32 %v3681_v61, %v3496_v24 }
 0x3f8   :  { %v3475_v12 = vmul.f32 %v3411_v11, %v3411_v11  ;;  %3281 = vst.msk [vmem:[%s7655_s3 + $0x190] sm:$0xff] %vm208_vm0, %v3162_v37  ;;  %v3410_v14 = vsub.f32 %v3162_v37, %v4550_v20  ;;  %v3632_v32 = vsel %vm208_vm0, %v3472_v35, 0.0  ;;  %v4559_v35 = vld [vmem:[%s7652_s0 + $0x1e8] sm:$0xff]  ;;  %v4560_v20 = vld [vmem:[%s7652_s0 + $0x1e0] sm:$0xff] }
 0x3f9   :  { %3633 = vadd.xlane.f32.xlu0 %v3632_v32  ;;  %v4480_v29 = vpop.f32.mrf.mxu1  ;;  %v3683_v34 = vadd.f32 %v3682_v18, %v3499_v27 }
 0x3fa   :  { %v3474_v16 = vmul.f32 %v3410_v14, %v3410_v14  ;;  %3284 = vst.msk [vmem:[%s7655_s3 + $0x1a8] sm:$0xff] %vm208_vm0, %v4480_v29  ;;  %v3413_v0 = vsub.f32 %v4480_v29, %v4551_v21  ;;  %v3641_v19 = vsel %vm208_vm0, %v3475_v12, 0.0 }
 0x3fb   :  { %3642 = vadd.xlane.f32.xlu1 %v3641_v19  ;;  %v3172_v60 = vpop.f32.mrf.mxu1 }
 0x3fc   :  { %v3477_v28 = vmul.f32 %v3413_v0, %v3413_v0  ;;  %3283 = vst.msk [vmem:[%s7655_s3 + $0x1a0] sm:$0xff] %vm208_vm0, %v3172_v60  ;;  %v3412_v46 = vsub.f32 %v3172_v60, %v4552_v40  ;;  %v3638_v1 = vsel %vm208_vm0, %v3474_v16, 0.0  ;;  %v3505_v41 = vpop.xlane.xlu1 %3504 }
 0x3fd   :  { %3639 = vadd.xlane.f32.xlu0 %v3638_v1 }
 0x3fe   :  { %v3476_v58 = vmul.f32 %v3412_v46, %v3412_v46  ;;  %v4483_v45 = vpop.f32.mrf.mxu1  ;;  %v3647_v17 = vsel %vm208_vm0, %v3477_v28, 0.0  ;;  %v3502_v3 = vpop.xlane.xlu0 %3501  ;;  %v4561_v28 = vld [vmem:[%s7652_s0 + $0x1f8] sm:$0xff] }
 0x3ff   :  { %3286 = vst.msk [vmem:[%s7655_s3 + $0x1b8] sm:$0xff] %vm208_vm0, %v4483_v45  ;;  %v3415_v48 = vsub.f32 %v4483_v45, %v4553_v47  ;;  %3648 = vadd.xlane.f32.xlu1 %v3647_v17  ;;  %v3684_v26 = vadd.f32 %v3683_v34, %v3502_v3  ;;  %v4562_v45 = vld [vmem:[%s7652_s0 + $0x1f0] sm:$0xff]  ;;  %s4608_s0 = smov [#allocation4]  }
 0x400   :  { %v3182_v2 = vpop.f32.mrf.mxu1  ;;  %v3644_v59 = vsel %vm208_vm0, %v3476_v58, 0.0 }
 0x401   :  { %v3479_v13 = vmul.f32 %v3415_v48, %v3415_v48  ;;  %3285 = vst.msk [vmem:[%s7655_s3 + $0x1b0] sm:$0xff] %vm208_vm0, %v3182_v2  ;;  %v3414_v56 = vsub.f32 %v3182_v2, %v4554_v42  ;;  %3645 = vadd.xlane.f32.xlu0 %v3644_v59  ;;  %v3685_v37 = vadd.f32 %v3684_v26, %v3505_v41 }
 0x403   :  { %v3478_v33 = vmul.f32 %v3414_v56, %v3414_v56  ;;  %v3653_v44 = vsel %vm208_vm0, %v3479_v13, 0.0 }
 0x404   :  { %3654 = vadd.xlane.f32.xlu1 %v3653_v44  ;;  %v3511_v19 = vpop.xlane.xlu1 %3510 }
 0x405   :  { %v3650_v5 = vsel %vm208_vm0, %v3478_v33, 0.0 }
 0x406   :  { %3651 = vadd.xlane.f32.xlu0 %v3650_v5  ;;  %v4486_v30 = vpop.f32.mrf.mxu1  ;;  %v3508_v11 = vpop.xlane.xlu0 %3507 }
 0x407   :  { %3288 = vst.msk [vmem:[%s7655_s3 + $0x1c8] sm:$0xff] %vm208_vm0, %v4486_v30  ;;  %v3417_v49 = vsub.f32 %v4486_v30, %v4555_v53  ;;  %v3686_v32 = vadd.f32 %v3685_v37, %v3508_v11 }
 0x408   :  { %v3192_v9 = vpop.f32.mrf.mxu1 }
 0x409   :  { %v3481_v22 = vmul.f32 %v3417_v49, %v3417_v49  ;;  %3287 = vst.msk [vmem:[%s7655_s3 + $0x1c0] sm:$0xff] %vm208_vm0, %v3192_v9  ;;  %v3416_v51 = vsub.f32 %v3192_v9, %v4556_v25  ;;  %v3687_v46 = vadd.f32 %v3686_v32, %v3511_v19 }
 0x40b   :  { %v3480_v36 = vmul.f32 %v3416_v51, %v3416_v51  ;;  %v3659_v31 = vsel %vm208_vm0, %v3481_v22, 0.0 }
 0x40c   :  { %3660 = vadd.xlane.f32.xlu1 %v3659_v31  ;;  %v3517_v59 = vpop.xlane.xlu1 %3516 }
 0x40d   :  { %v3656_v10 = vsel %vm208_vm0, %v3480_v36, 0.0 }
 0x40e   :  { %3657 = vadd.xlane.f32.xlu0 %v3656_v10  ;;  %v4489_v4 = vpop.f32.mrf.mxu1  ;;  %v3514_v60 = vpop.xlane.xlu0 %3513 }
 0x40f   :  { %3290 = vst.msk [vmem:[%s7655_s3 + $0x1d8] sm:$0xff] %vm208_vm0, %v4489_v4  ;;  %v3419_v52 = vsub.f32 %v4489_v4, %v4557_v57  ;;  %v3688_v47 = vadd.f32 %v3687_v46, %v3514_v60 }
 0x410   :  { %v3202_v38 = vpop.f32.mrf.mxu1 }
 0x411   :  { %v3483_v63 = vmul.f32 %v3419_v52, %v3419_v52  ;;  %3289 = vst.msk [vmem:[%s7655_s3 + $0x1d0] sm:$0xff] %vm208_vm0, %v3202_v38  ;;  %v3418_v62 = vsub.f32 %v3202_v38, %v4558_v43  ;;  %v3689_v56 = vadd.f32 %v3688_v47, %v3517_v59 }
 0x413   :  { %v3482_v39 = vmul.f32 %v3418_v62, %v3418_v62  ;;  %v3665_v8 = vsel %vm208_vm0, %v3483_v63, 0.0 }
 0x414   :  { %3666 = vadd.xlane.f32.xlu1 %v3665_v8  ;;  %v3523_v44 = vpop.xlane.xlu1 %3522 }
 0x415   :  { %v3662_v23 = vsel %vm208_vm0, %v3482_v39, 0.0 }
 0x416   :  { %3663 = vadd.xlane.f32.xlu0 %v3662_v23  ;;  %v4492_v50 = vpop.f32.mrf.mxu1  ;;  %v3520_v13 = vpop.xlane.xlu0 %3519 }
 0x417   :  { %3292 = vst.msk [vmem:[%s7655_s3 + $0x1e8] sm:$0xff] %vm208_vm0, %v4492_v50  ;;  %v3421_v7 = vsub.f32 %v4492_v50, %v4559_v35  ;;  %v3690_v33 = vadd.f32 %v3689_v56, %v3520_v13 }
 0x418   :  { %v3212_v15 = vpop.f32.mrf.mxu1 }
 0x419   :  { %v3485_v12 = vmul.f32 %v3421_v7, %v3421_v7  ;;  %3291 = vst.msk [vmem:[%s7655_s3 + $0x1e0] sm:$0xff] %vm208_vm0, %v3212_v15  ;;  %v3420_v14 = vsub.f32 %v3212_v15, %v4560_v20  ;;  %v3691_v30 = vadd.f32 %v3690_v33, %v3523_v44 }
 0x41b   :  { %v3484_v29 = vmul.f32 %v3420_v14, %v3420_v14  ;;  %v3671_v16 = vsel %vm208_vm0, %v3485_v12, 0.0 }
 0x41c   :  { %3672 = vadd.xlane.f32.xlu1 %v3671_v16  ;;  %v3529_v49 = vpop.xlane.xlu1 %3528 }
 0x41d   :  { %v4495_v21 = vpop.f32.mrf.mxu1  ;;  %v3668_v0 = vsel %vm208_vm0, %v3484_v29, 0.0 }
 0x41e   :  { %3294 = vst.msk [vmem:[%s7655_s3 + $0x1f8] sm:$0xff] %vm208_vm0, %v4495_v21  ;;  %v3423_v40 = vsub.f32 %v4495_v21, %v4561_v28  ;;  %3669 = vadd.xlane.f32.xlu0 %v3668_v0  ;;  %v3526_v5 = vpop.xlane.xlu0 %3525 }
 0x41f   :  { %v3222_v1 = vpop.f32.mrf.mxu1  ;;  %v3692_v53 = vadd.f32 %v3691_v30, %v3526_v5 }
 0x420   :  { %v3487_v58 = vmul.f32 %v3423_v40, %v3423_v40  ;;  %3293 = vst.msk [vmem:[%s7655_s3 + $0x1f0] sm:$0xff] %vm208_vm0, %v3222_v1  ;;  %v3422_v17 = vsub.f32 %v3222_v1, %v4562_v45  ;;  %s3926_s3 = sshll.u32 %s4608_s0, 4  ;;  %s3927_s3 = int_to_ptr.vmem [resolvable:$true] %s3926_s3 }
 0x421   :  { %v3693_v9 = vadd.f32 %v3692_v53, %v3529_v49  ;;  %s4563_s12 = scalar_lea.vmem %s3927_s3, 16  ;;  %s4567_s13 = scalar_lea.vmem %s3927_s3, 32 }
 0x422   :  { %v3486_v48 = vmul.f32 %v3422_v17, %v3422_v17  ;;  %v3677_v2 = vsel %vm208_vm0, %v3487_v58, 0.0  ;;  %p4564_p0 = scmp.ne.s32.totalorder %s3927_s3, %s4563_s12  ;;  %p4568_p1 = scmp.lt.s32.totalorder %s3927_s3, %s3927_s3 }
 0x423   :  { %3678 = vadd.xlane.f32.xlu1 %v3677_v2  ;;  %p4569_p2 = scmp.lt.s32.totalorder %s4567_s13, %s4563_s12 }
 0x424   :  { %v3674_v42 = vsel %vm208_vm0, %v3486_v48, 0.0  ;;  %v3535_v25 = vpop.xlane.xlu1 %3534 }
 0x425   :  { %3675 = vadd.xlane.f32.xlu0 %v3674_v42  ;;  %p4570_p3 = por %p4569_p2, %p4568_p1 }
 0x426   :  { %v3532_v55 = vpop.xlane.xlu0 %3531 }
 0x427   :  { %v3694_v22 = vadd.f32 %v3693_v9, %v3532_v55  ;;  %p4571_p4 = pnand %p4570_p3, %p4564_p0 }
 0x429   :  { %v3695_v36 = vadd.f32 %v3694_v22, %v3535_v25 }
 0x42c   :  { %v3541_v6 = vpop.xlane.xlu1 %3540 }
 0x42e   :  { %v3538_v51 = vpop.xlane.xlu0 %3537 }
 0x42f   :  { %v3696_v31 = vadd.f32 %v3695_v36, %v3538_v51 }
 0x431   :  { %v3697_v61 = vadd.f32 %v3696_v31, %v3541_v6 }
 0x434   :  { %v3547_v4 = vpop.xlane.xlu1 %3546 }
 0x436   :  { %v3544_v24 = vpop.xlane.xlu0 %3543 }
 0x437   :  { %v3698_v10 = vadd.f32 %v3697_v61, %v3544_v24 }
 0x439   :  { %v3699_v57 = vadd.f32 %v3698_v10, %v3547_v4 }
 0x43e   :  { %v3550_v18 = vpop.xlane.xlu0 %3549 }
 0x43f   :  { %4574 = shalt.err (!%p4571_p4)
}
 0x440   :  { %3929 = dma.vmem_to_hbm [thread:$0]  %s3927_s3, 16, %s7658_s6, [#allocation5]   ;;  %v3700_v54 = vadd.f32 %v3699_v57, %v3550_v18  ;;  %v3553_v52 = vpop.xlane.xlu1 %3552 }
 0x441   :  { %s4609_s6 = smov [#allocation2]  }
 0x442   :  { %v3701_v63 = vadd.f32 %v3700_v54, %v3553_v52  ;;  %s3916_s16 = sshll.u32 %s4609_s6, 4  ;;  %s3917_s16 = int_to_ptr.vmem [resolvable:$true] %s3916_s16 }
 0x443   :  { %s4583_s17 = scalar_lea.vmem %s3917_s16, 16  ;;  %s4587_s18 = scalar_lea.vmem %s3917_s16, 32 }
 0x444   :  { %v3559_v62 = vpop.xlane.xlu1 %3558  ;;  %p4584_p5 = scmp.ne.s32.totalorder %s3917_s16, %s4583_s17  ;;  %p4588_p6 = scmp.lt.s32.totalorder %s3917_s16, %s3917_s16 }
 0x445   :  { %p4589_p7 = scmp.lt.s32.totalorder %s4587_s18, %s4583_s17 }
 0x446   :  { %v3556_v38 = vpop.xlane.xlu0 %3555 }
 0x447   :  { %v3702_v43 = vadd.f32 %v3701_v63, %v3556_v38  ;;  %p4590_p8 = por %p4589_p7, %p4588_p6 }
 0x449   :  { %v3703_v3 = vadd.f32 %v3702_v43, %v3559_v62  ;;  %p4591_p9 = pnand %p4590_p8, %p4584_p5 }
 0x44c   :  { %v3565_v34 = vpop.xlane.xlu1 %3564 }
 0x44e   :  { %v3562_v27 = vpop.xlane.xlu0 %3561 }
 0x44f   :  { %v3704_v39 = vadd.f32 %v3703_v3, %v3562_v27 }
 0x451   :  { %v3705_v26 = vadd.f32 %v3704_v39, %v3565_v34 }
 0x454   :  { %v3571_v8 = vpop.xlane.xlu1 %3570 }
 0x456   :  { %v3568_v23 = vpop.xlane.xlu0 %3567 }
 0x457   :  { %v3706_v50 = vadd.f32 %v3705_v26, %v3568_v23 }
 0x458   :  { %v3577_v41 = vpop.xlane.xlu1 %3576 }
 0x459   :  { %v3707_v35 = vadd.f32 %v3706_v50, %v3571_v8 }
 0x45a   :  { %v3574_v7 = vpop.xlane.xlu0 %3573 }
 0x45b   :  { %v3708_v11 = vadd.f32 %v3707_v35, %v3574_v7 }
 0x45c   :  { %v3583_v15 = vpop.xlane.xlu1 %3582 }
 0x45d   :  { %v3709_v37 = vadd.f32 %v3708_v11, %v3577_v41 }
 0x45e   :  { %v3580_v12 = vpop.xlane.xlu0 %3579 }
 0x45f   :  { %v3710_v20 = vadd.f32 %v3709_v37, %v3580_v12 }
 0x460   :  { %v3589_v14 = vpop.xlane.xlu1 %3588 }
 0x461   :  { %v3711_v32 = vadd.f32 %v3710_v20, %v3583_v15 }
 0x462   :  { %v3586_v29 = vpop.xlane.xlu0 %3585 }
 0x463   :  { %v3712_v16 = vadd.f32 %v3711_v32, %v3586_v29 }
 0x464   :  { %v3595_v21 = vpop.xlane.xlu1 %3594 }
 0x465   :  { %v3713_v0 = vadd.f32 %v3712_v16, %v3589_v14 }
 0x466   :  { %v3592_v19 = vpop.xlane.xlu0 %3591 }
 0x467   :  { %v3714_v60 = vadd.f32 %v3713_v0, %v3592_v19  ;;  %v3680_v19 = vld [vmem:[#allocation2] sm:$0x1] }
 0x468   :  { %v3601_v28 = vpop.xlane.xlu1 %3600 }
 0x469   :  { %v3715_v40 = vadd.f32 %v3714_v60, %v3595_v21 }
 0x46a   :  { %v3598_v46 = vpop.xlane.xlu0 %3597 }
 0x46b   :  { %v3716_v1 = vadd.f32 %v3715_v40, %v3598_v46 }
 0x46c   :  { %v3607_v58 = vpop.xlane.xlu1 %3606 }
 0x46d   :  { %v3717_v45 = vadd.f32 %v3716_v1, %v3601_v28 }
 0x46e   :  { %v3604_v17 = vpop.xlane.xlu0 %3603 }
 0x46f   :  { %v3718_v47 = vadd.f32 %v3717_v45, %v3604_v17 }
 0x470   :  { %v3613_v48 = vpop.xlane.xlu1 %3612 }
 0x471   :  { %v3719_v2 = vadd.f32 %v3718_v47, %v3607_v58 }
 0x472   :  { %v3610_v59 = vpop.xlane.xlu0 %3609 }
 0x473   :  { %v3720_v13 = vadd.f32 %v3719_v2, %v3610_v59 }
 0x474   :  { %v3619_v42 = vpop.xlane.xlu1 %3618 }
 0x475   :  { %v3721_v56 = vadd.f32 %v3720_v13, %v3613_v48 }
 0x476   :  { %v3616_v33 = vpop.xlane.xlu0 %3615 }
 0x477   :  { %v3722_v44 = vadd.f32 %v3721_v56, %v3616_v33 }
 0x478   :  { %v3625_v5 = vpop.xlane.xlu1 %3624 }
 0x479   :  { %v3723_v30 = vadd.f32 %v3722_v44, %v3619_v42 }
 0x47a   :  { %v3622_v53 = vpop.xlane.xlu0 %3621 }
 0x47b   :  { %v3724_v49 = vadd.f32 %v3723_v30, %v3622_v53 }
 0x47c   :  { %v3631_v9 = vpop.xlane.xlu1 %3630 }
 0x47d   :  { %v3725_v55 = vadd.f32 %v3724_v49, %v3625_v5 }
 0x47e   :  { %v3628_v22 = vpop.xlane.xlu0 %3627 }
 0x47f   :  { %v3726_v25 = vadd.f32 %v3725_v55, %v3628_v22 }
 0x480   :  { %v3637_v6 = vpop.xlane.xlu1 %3636 }
 0x481   :  { %v3727_v51 = vadd.f32 %v3726_v25, %v3631_v9 }
 0x482   :  { %v3634_v36 = vpop.xlane.xlu0 %3633 }
 0x483   :  { %v3728_v31 = vadd.f32 %v3727_v51, %v3634_v36 }
 0x484   :  { %v3643_v4 = vpop.xlane.xlu1 %3642 }
 0x485   :  { %v3729_v24 = vadd.f32 %v3728_v31, %v3637_v6 }
 0x486   :  { %v3640_v61 = vpop.xlane.xlu0 %3639 }
 0x487   :  { %v3730_v10 = vadd.f32 %v3729_v24, %v3640_v61 }
 0x488   :  { %v3649_v52 = vpop.xlane.xlu1 %3648 }
 0x489   :  { %v3731_v18 = vadd.f32 %v3730_v10, %v3643_v4 }
 0x48a   :  { %v3646_v57 = vpop.xlane.xlu0 %3645 }
 0x48b   :  { %v3732_v54 = vadd.f32 %v3731_v18, %v3646_v57 }
 0x48d   :  { %v3733_v38 = vadd.f32 %v3732_v54, %v3649_v52  ;;  %v3655_v62 = vpop.xlane.xlu1 %3654 }
 0x48f   :  { %v3652_v63 = vpop.xlane.xlu0 %3651 }
 0x490   :  { %v3734_v43 = vadd.f32 %v3733_v38, %v3652_v63 }
 0x492   :  { %v3735_v3 = vadd.f32 %v3734_v43, %v3655_v62 }
 0x495   :  { %v3661_v39 = vpop.xlane.xlu1 %3660 }
 0x497   :  { %v3658_v27 = vpop.xlane.xlu0 %3657 }
 0x498   :  { %v3736_v34 = vadd.f32 %v3735_v3, %v3658_v27 }
 0x49a   :  { %v3737_v26 = vadd.f32 %v3736_v34, %v3661_v39 }
 0x49d   :  { %v3667_v50 = vpop.xlane.xlu1 %3666 }
 0x49f   :  { %v3664_v8 = vpop.xlane.xlu0 %3663 }
 0x4a0   :  { %v3738_v23 = vadd.f32 %v3737_v26, %v3664_v8 }
 0x4a2   :  { %v3739_v41 = vadd.f32 %v3738_v23, %v3667_v50 }
 0x4a5   :  { %v3673_v11 = vpop.xlane.xlu1 %3672 }
 0x4a7   :  { %v3670_v35 = vpop.xlane.xlu0 %3669 }
 0x4a8   :  { %v3740_v7 = vadd.f32 %v3739_v41, %v3670_v35 }
 0x4aa   :  { %v3741_v15 = vadd.f32 %v3740_v7, %v3673_v11 }
 0x4ac   :  { %v3679_v20 = vpop.xlane.xlu1 %3678 }
 0x4ae   :  { %v3676_v37 = vpop.xlane.xlu0 %3675 }
 0x4af   :  { %v3742_v12 = vadd.f32 %v3741_v15, %v3676_v37 }
 0x4b1   :  { %v3743_v14 = vadd.f32 %v3742_v12, %v3679_v20 }
 0x4b3   :  { %v3744_v32 = vrot.slane %v3743_v14, 4 }
 0x4b5   :  { %v3745_v29 = vadd.f32 %v3744_v32, %v3743_v14 }
 0x4b7   :  { %v3746_v16 = vrot.slane %v3745_v29, 2 }
 0x4b9   :  { %v3747_v21 = vadd.f32 %v3746_v16, %v3745_v29 }
 0x4bb   :  { %v3748_v0 = vrot.slane %v3747_v21, 1 }
 0x4bd   :  { %v3749_v60 = vadd.f32 %v3748_v0, %v3747_v21 }
 0x4bf   :  { %v3750_v28 = vadd.f32 %v3749_v60, %v3680_v19 }
 0x4c1   :  { %3752 = vst.msk [vmem:[#allocation2] sm:$0x1] %vm74_vm1, %v3750_v28 }
 0x4c2   :  { %4594 = shalt.err (!%p4591_p9)
}
 0x4c3   :  { %3919 = dma.vmem_to_hbm [thread:$0]  %s3917_s16, 16, %s7657_s5, [#allocation3]  }
 0x4c4   :  { %4603 = dma.done.wait [#allocation3], 16  }
 0x4c5   :  { %4604 = vsyncadd [#allocation3], 4294967280 }
 0x4c6   :  { %4605 = dma.done.wait [#allocation5], 16  }
 0x4c7   :  { %4606 = vsyncadd [#allocation5], 4294967280 }
 0x4c8   :  { %3952 = vsyncpa [#allocation3], 1 }
 0x4c9   :  { %3953 = vsyncpa [#allocation5], 1 }

</bundles_post_ra>
